<compile_context>
chip_gen: v5e
topology: v5e:2x2
jax: 0.10.0
libtpu: 0.0.40
codegen_flags: <defaults>
</compile_context>

<pallas_src>
import jax
import jax.numpy as jnp
from jax.experimental import pallas as pl
from jax.experimental.pallas import tpu as pltpu

NUM_CLASSES = 7
OUT_PAD = 128            # lane-dense padded classifier width
IN_FEATURES = 48 * 48    # 2304 = 18 * 128
H1, H2, H3 = 512, 256, 128
THRESHOLD = 1.0
BETA = 0.9               # unused at t=0 with zero initial membrane (single timestep)


def _round_up(x, m):
    return ((x + m - 1) // m) * m


def _pick_tb(B):
    """Batch tile: 16-sublane aligned for tiny batches; for big batches 128 on
    2-TC chips (v7x) / v6e, 256 on single-TC MXU-bound v5e."""
    if B <= 256:
        return _round_up(B, 16)
    try:
        kind = jax.devices()[0].device_kind.lower()
    except Exception:
        kind = ""
    return 256 if "v5" in kind else 128


def snn_kernel(x_ref, w1_ref, b1_ref, w2_ref, b2_ref, w3_ref, b3_ref,
               w4_ref, b4_ref, out_ref, spk3_ref, mem3_ref):
    # x arrives f32 from HBM; cast to bf16 on the VPU (kernel is MXU/DMA bound).
    x = x_ref[...].astype(jnp.bfloat16)  # (TB, 2304)

    # fc1 + lif1
    cur1 = jnp.dot(x, w1_ref[...], preferred_element_type=jnp.float32) + b1_ref[...]
    spk1 = (cur1 > THRESHOLD).astype(jnp.bfloat16)   # spikes are exactly 0/1

    # fc2 + lif2
    cur2 = jnp.dot(spk1, w2_ref[...], preferred_element_type=jnp.float32) + b2_ref[...]
    spk2 = (cur2 > THRESHOLD).astype(jnp.bfloat16)

    # fc3 + lif3
    cur3 = jnp.dot(spk2, w3_ref[...], preferred_element_type=jnp.float32) + b3_ref[...]
    spk3 = (cur3 > THRESHOLD)

    # fc4 (lif4 exists in the module but is never applied in forward)
    out = jnp.dot(spk3.astype(jnp.bfloat16), w4_ref[...],
                  preferred_element_type=jnp.float32) + b4_ref[...]

    out_ref[...] = out
    spk3_ref[...] = spk3.astype(jnp.float32)
    mem3_ref[...] = cur3  # mem3 == cur3 for zero initial membrane (reset_delay)


def feedforward_snn(x, params):
    """x: (B, 1, 48, 48) or (B, 48*48), any float dtype. Returns (out, spk3, mem3)."""
    B = x.shape[0]
    x_flat = x.reshape(B, -1)  # view only; dtype cast happens inside the kernel
    assert x_flat.shape[1] == IN_FEATURES

    TB = _pick_tb(B)
    grid = (pl.cdiv(B, TB),)   # ragged last tile: OOB rows are masked on store

    # Weights stay resident across batch tiles (constant index_map -> fetched once).
    def pinned(shape):
        return pl.BlockSpec(shape, lambda i: (0, 0))

    out_p, spk3, mem3 = pl.pallas_call(
        snn_kernel,
        out_shape=(
            jax.ShapeDtypeStruct((B, OUT_PAD), jnp.float32),
            jax.ShapeDtypeStruct((B, H3), jnp.float32),
            jax.ShapeDtypeStruct((B, H3), jnp.float32),
        ),
        grid=grid,
        in_specs=[
            pl.BlockSpec((TB, IN_FEATURES), lambda i: (i, 0)),   # x tile (f32)
            pinned((IN_FEATURES, H1)), pinned((1, H1)),          # fc1
            pinned((H1, H2)), pinned((1, H2)),                   # fc2
            pinned((H2, H3)), pinned((1, H3)),                   # fc3
            pinned((H3, OUT_PAD)), pinned((1, OUT_PAD)),         # fc4 (lane-padded)
        ],
        out_specs=(
            pl.BlockSpec((TB, OUT_PAD), lambda i: (i, 0)),
            pl.BlockSpec((TB, H3), lambda i: (i, 0)),
            pl.BlockSpec((TB, H3), lambda i: (i, 0)),
        ),
        compiler_params=pltpu.CompilerParams(
            dimension_semantics=("parallel",),
            vmem_limit_bytes=32 * 1024 * 1024,
        ),
    )(
        x_flat,
        params["w1"], params["b1"],
        params["w2"], params["b2"],
        params["w3"], params["b3"],
        params["w4"], params["b4"],
    )

    out = out_p[:, :NUM_CLASSES]   # drop lane padding of the classifier head
    return out, spk3, mem3


def init_params(key):
    """PyTorch-style nn.Linear init: U(-1/sqrt(fan_in), 1/sqrt(fan_in)).
    Weights stored transposed as (in, out) in bf16; biases as (1, out) in f32.
    fc4 weight/bias are zero-padded to 128 output lanes."""
    dims = [(IN_FEATURES, H1), (H1, H2), (H2, H3), (H3, NUM_CLASSES)]
    params = {}
    keys = jax.random.split(key, 2 * len(dims))
    for i, (fan_in, fan_out) in enumerate(dims):
        bound = 1.0 / jnp.sqrt(float(fan_in))
        w = jax.random.uniform(keys[2 * i], (fan_in, fan_out), jnp.float32,
                               minval=-bound, maxval=bound)
        b = jax.random.uniform(keys[2 * i + 1], (1, fan_out), jnp.float32,
                               minval=-bound, maxval=bound)
        if i == 3:  # pad classifier to lane-dense width
            w = jnp.pad(w, ((0, 0), (0, OUT_PAD - fan_out)))
            b = jnp.pad(b, ((0, 0), (0, OUT_PAD - fan_out)))
        params[f"w{i + 1}"] = w.astype(jnp.bfloat16)
        params[f"b{i + 1}"] = b  # keep biases f32 (added to f32 MXU accumulator)
    return params


if __name__ == "__main__":
    key = jax.random.PRNGKey(0)
    k_param, k_x = jax.random.split(key)

    params = init_params(k_param)
    # Small batch; spatial dims fixed at 48x48 by the module's fc1 definition.
    x = jax.random.uniform(k_x, (2, 1, 48, 48), jnp.float32) * 2.0  # NCHW input

    out, spk3, mem3 = feedforward_snn(x, params)
    jax.block_until_ready((out, spk3, mem3))

    assert out.shape == (2, NUM_CLASSES)
    assert spk3.shape == (2, H3)
    assert mem3.shape == (2, H3)
    # spikes emitted by the kernel must be consistent with the returned membrane
    assert bool(jnp.all(spk3 == (mem3 > THRESHOLD).astype(jnp.float32)))
    # spikes are binary
    assert bool(jnp.all((spk3 == 0.0) | (spk3 == 1.0)))
    print("KERNEL_OK")
</pallas_src>

<mosaic_0001>
module attributes {stable_mosaic.version = 11 : i64} {
  func.func @snn_kernel(%arg0: i32, %arg1: memref<16x2304xf32, #tpu.memory_space<vmem>>, %arg2: memref<2304x512xbf16, #tpu.memory_space<vmem>>, %arg3: memref<1x512xf32, #tpu.memory_space<vmem>>, %arg4: memref<512x256xbf16, #tpu.memory_space<vmem>>, %arg5: memref<1x256xf32, #tpu.memory_space<vmem>>, %arg6: memref<256x128xbf16, #tpu.memory_space<vmem>>, %arg7: memref<1x128xf32, #tpu.memory_space<vmem>>, %arg8: memref<128x128xbf16, #tpu.memory_space<vmem>>, %arg9: memref<1x128xf32, #tpu.memory_space<vmem>>, %arg10: memref<16x128xf32, #tpu.memory_space<vmem>>, %arg11: memref<16x128xf32, #tpu.memory_space<vmem>>, %arg12: memref<16x128xf32, #tpu.memory_space<vmem>>) attributes {dimension_semantics = [#tpu.dimension_semantics<parallel>], iteration_bounds = array<i64: 1>, scalar_prefetch = 0 : i64, scratch_operands = 0 : i64, tpu.core_type = #tpu.core_type<tc>, window_params = [{transform_indices = @transform_0, window_bounds = array<i64: 16, 2304>}, {pipeline_mode = #tpu.pipeline_mode<synchronous>, transform_indices = @transform_1, window_bounds = array<i64: 2304, 512>}, {pipeline_mode = #tpu.pipeline_mode<synchronous>, transform_indices = @transform_2, window_bounds = array<i64: 1, 512>}, {pipeline_mode = #tpu.pipeline_mode<synchronous>, transform_indices = @transform_3, window_bounds = array<i64: 512, 256>}, {pipeline_mode = #tpu.pipeline_mode<synchronous>, transform_indices = @transform_4, window_bounds = array<i64: 1, 256>}, {pipeline_mode = #tpu.pipeline_mode<synchronous>, transform_indices = @transform_5, window_bounds = array<i64: 256, 128>}, {pipeline_mode = #tpu.pipeline_mode<synchronous>, transform_indices = @transform_6, window_bounds = array<i64: 1, 128>}, {pipeline_mode = #tpu.pipeline_mode<synchronous>, transform_indices = @transform_7, window_bounds = array<i64: 128, 128>}, {pipeline_mode = #tpu.pipeline_mode<synchronous>, transform_indices = @transform_8, window_bounds = array<i64: 1, 128>}, {transform_indices = @transform_9, window_bounds = array<i64: 16, 128>}, {transform_indices = @transform_10, window_bounds = array<i64: 16, 128>}, {transform_indices = @transform_11, window_bounds = array<i64: 16, 128>}]} {
    %c0 = arith.constant 0 : index
    %c0_0 = arith.constant 0 : index
    %0 = vector.load %arg1[%c0, %c0_0] : memref<16x2304xf32, #tpu.memory_space<vmem>>, vector<16x2304xf32>
    %1 = arith.truncf %0 : vector<16x2304xf32> to vector<16x2304xbf16>
    %c0_1 = arith.constant 0 : index
    %c0_2 = arith.constant 0 : index
    %2 = vector.load %arg2[%c0_1, %c0_2] : memref<2304x512xbf16, #tpu.memory_space<vmem>>, vector<2304x512xbf16>
    %cst = arith.constant dense<0.000000e+00> : vector<16x512xf32>
    %3 = tpu.matmul %1, %2, %cst {dimension_numbers = #tpu.dot_dimension_numbers<[1], [0], [0], [1], [0, 0, 1, 1], [], []>} : vector<16x2304xbf16>, vector<2304x512xbf16>, vector<16x512xf32> -> vector<16x512xf32>
    %c0_3 = arith.constant 0 : index
    %c0_4 = arith.constant 0 : index
    %4 = vector.load %arg3[%c0_3, %c0_4] : memref<1x512xf32, #tpu.memory_space<vmem>>, vector<1x512xf32>
    %5 = vector.broadcast %4 : vector<1x512xf32> to vector<16x512xf32>
    %6 = arith.addf %3, %5 : vector<16x512xf32>
    %cst_5 = arith.constant 1.000000e+00 : f32
    %7 = vector.broadcast %cst_5 : f32 to vector<16x512xf32>
    %8 = arith.cmpf ogt, %6, %7 : vector<16x512xf32>
    %9 = arith.extui %8 : vector<16x512xi1> to vector<16x512xi32>
    %10 = arith.sitofp %9 : vector<16x512xi32> to vector<16x512xf32>
    %11 = arith.truncf %10 : vector<16x512xf32> to vector<16x512xbf16>
    %c0_6 = arith.constant 0 : index
    %c0_7 = arith.constant 0 : index
    %12 = vector.load %arg4[%c0_6, %c0_7] : memref<512x256xbf16, #tpu.memory_space<vmem>>, vector<512x256xbf16>
    %cst_8 = arith.constant dense<0.000000e+00> : vector<16x256xf32>
    %13 = tpu.matmul %11, %12, %cst_8 {dimension_numbers = #tpu.dot_dimension_numbers<[1], [0], [0], [1], [0, 0, 1, 1], [], []>} : vector<16x512xbf16>, vector<512x256xbf16>, vector<16x256xf32> -> vector<16x256xf32>
    %c0_9 = arith.constant 0 : index
    %c0_10 = arith.constant 0 : index
    %14 = vector.load %arg5[%c0_9, %c0_10] : memref<1x256xf32, #tpu.memory_space<vmem>>, vector<1x256xf32>
    %15 = vector.broadcast %14 : vector<1x256xf32> to vector<16x256xf32>
    %16 = arith.addf %13, %15 : vector<16x256xf32>
    %cst_11 = arith.constant 1.000000e+00 : f32
    %17 = vector.broadcast %cst_11 : f32 to vector<16x256xf32>
    %18 = arith.cmpf ogt, %16, %17 : vector<16x256xf32>
    %19 = arith.extui %18 : vector<16x256xi1> to vector<16x256xi32>
    %20 = arith.sitofp %19 : vector<16x256xi32> to vector<16x256xf32>
    %21 = arith.truncf %20 : vector<16x256xf32> to vector<16x256xbf16>
    %c0_12 = arith.constant 0 : index
    %c0_13 = arith.constant 0 : index
    %22 = vector.load %arg6[%c0_12, %c0_13] : memref<256x128xbf16, #tpu.memory_space<vmem>>, vector<256x128xbf16>
    %cst_14 = arith.constant dense<0.000000e+00> : vector<16x128xf32>
    %23 = tpu.matmul %21, %22, %cst_14 {dimension_numbers = #tpu.dot_dimension_numbers<[1], [0], [0], [1], [0, 0, 1, 1], [], []>} : vector<16x256xbf16>, vector<256x128xbf16>, vector<16x128xf32> -> vector<16x128xf32>
    %c0_15 = arith.constant 0 : index
    %c0_16 = arith.constant 0 : index
    %24 = vector.load %arg7[%c0_15, %c0_16] : memref<1x128xf32, #tpu.memory_space<vmem>>, vector<1x128xf32>
    %25 = vector.broadcast %24 : vector<1x128xf32> to vector<16x128xf32>
    %26 = arith.addf %23, %25 : vector<16x128xf32>
    %cst_17 = arith.constant 1.000000e+00 : f32
    %27 = vector.broadcast %cst_17 : f32 to vector<16x128xf32>
    %28 = arith.cmpf ogt, %26, %27 : vector<16x128xf32>
    %29 = arith.extui %28 : vector<16x128xi1> to vector<16x128xi32>
    %30 = arith.sitofp %29 : vector<16x128xi32> to vector<16x128xf32>
    %31 = arith.truncf %30 : vector<16x128xf32> to vector<16x128xbf16>
    %c0_18 = arith.constant 0 : index
    %c0_19 = arith.constant 0 : index
    %32 = vector.load %arg8[%c0_18, %c0_19] : memref<128x128xbf16, #tpu.memory_space<vmem>>, vector<128x128xbf16>
    %cst_20 = arith.constant dense<0.000000e+00> : vector<16x128xf32>
    %33 = tpu.matmul %31, %32, %cst_20 {dimension_numbers = #tpu.dot_dimension_numbers<[1], [0], [0], [1], [0, 0, 1, 1], [], []>} : vector<16x128xbf16>, vector<128x128xbf16>, vector<16x128xf32> -> vector<16x128xf32>
    %c0_21 = arith.constant 0 : index
    %c0_22 = arith.constant 0 : index
    %34 = vector.load %arg9[%c0_21, %c0_22] : memref<1x128xf32, #tpu.memory_space<vmem>>, vector<1x128xf32>
    %35 = vector.broadcast %34 : vector<1x128xf32> to vector<16x128xf32>
    %36 = arith.addf %33, %35 : vector<16x128xf32>
    %c0_23 = arith.constant 0 : index
    %c0_24 = arith.constant 0 : index
    %37 = vector.load %arg10[%c0_23, %c0_24] : memref<16x128xf32, #tpu.memory_space<vmem>>, vector<16x128xf32>
    tpu.vector_store %arg10[%c0_23, %c0_24], %36 {strides = array<i32>} : memref<16x128xf32, #tpu.memory_space<vmem>>, vector<16x128xf32>,
    %38 = arith.extui %28 : vector<16x128xi1> to vector<16x128xi32>
    %39 = arith.sitofp %38 : vector<16x128xi32> to vector<16x128xf32>
    %c0_25 = arith.constant 0 : index
    %c0_26 = arith.constant 0 : index
    %40 = vector.load %arg11[%c0_25, %c0_26] : memref<16x128xf32, #tpu.memory_space<vmem>>, vector<16x128xf32>
    tpu.vector_store %arg11[%c0_25, %c0_26], %39 {strides = array<i32>} : memref<16x128xf32, #tpu.memory_space<vmem>>, vector<16x128xf32>,
    %c0_27 = arith.constant 0 : index
    %c0_28 = arith.constant 0 : index
    %41 = vector.load %arg12[%c0_27, %c0_28] : memref<16x128xf32, #tpu.memory_space<vmem>>, vector<16x128xf32>
    tpu.vector_store %arg12[%c0_27, %c0_28], %26 {strides = array<i32>} : memref<16x128xf32, #tpu.memory_space<vmem>>, vector<16x128xf32>,
    return
  }
  func.func @transform_0(%arg0: i32) -> (i32, i32) {
    %c0_i32 = arith.constant 0 : i32
    %c0_i32_0 = arith.constant 0 : i32
    return %arg0, %c0_i32 : i32, i32
  }
  func.func @transform_1(%arg0: i32) -> (i32, i32) {
    %c0_i32 = arith.constant 0 : i32
    %c0_i32_0 = arith.constant 0 : i32
    %c0_i32_1 = arith.constant 0 : i32
    return %c0_i32, %c0_i32_0 : i32, i32
  }
  func.func @transform_2(%arg0: i32) -> (i32, i32) {
    %c0_i32 = arith.constant 0 : i32
    %c0_i32_0 = arith.constant 0 : i32
    %c0_i32_1 = arith.constant 0 : i32
    return %c0_i32, %c0_i32_0 : i32, i32
  }
  func.func @transform_3(%arg0: i32) -> (i32, i32) {
    %c0_i32 = arith.constant 0 : i32
    %c0_i32_0 = arith.constant 0 : i32
    %c0_i32_1 = arith.constant 0 : i32
    return %c0_i32, %c0_i32_0 : i32, i32
  }
  func.func @transform_4(%arg0: i32) -> (i32, i32) {
    %c0_i32 = arith.constant 0 : i32
    %c0_i32_0 = arith.constant 0 : i32
    %c0_i32_1 = arith.constant 0 : i32
    return %c0_i32, %c0_i32_0 : i32, i32
  }
  func.func @transform_5(%arg0: i32) -> (i32, i32) {
    %c0_i32 = arith.constant 0 : i32
    %c0_i32_0 = arith.constant 0 : i32
    %c0_i32_1 = arith.constant 0 : i32
    return %c0_i32, %c0_i32_0 : i32, i32
  }
  func.func @transform_6(%arg0: i32) -> (i32, i32) {
    %c0_i32 = arith.constant 0 : i32
    %c0_i32_0 = arith.constant 0 : i32
    %c0_i32_1 = arith.constant 0 : i32
    return %c0_i32, %c0_i32_0 : i32, i32
  }
  func.func @transform_7(%arg0: i32) -> (i32, i32) {
    %c0_i32 = arith.constant 0 : i32
    %c0_i32_0 = arith.constant 0 : i32
    %c0_i32_1 = arith.constant 0 : i32
    return %c0_i32, %c0_i32_0 : i32, i32
  }
  func.func @transform_8(%arg0: i32) -> (i32, i32) {
    %c0_i32 = arith.constant 0 : i32
    %c0_i32_0 = arith.constant 0 : i32
    %c0_i32_1 = arith.constant 0 : i32
    return %c0_i32, %c0_i32_0 : i32, i32
  }
  func.func @transform_9(%arg0: i32) -> (i32, i32) {
    %c0_i32 = arith.constant 0 : i32
    %c0_i32_0 = arith.constant 0 : i32
    return %arg0, %c0_i32 : i32, i32
  }
  func.func @transform_10(%arg0: i32) -> (i32, i32) {
    %c0_i32 = arith.constant 0 : i32
    %c0_i32_0 = arith.constant 0 : i32
    return %arg0, %c0_i32 : i32, i32
  }
  func.func @transform_11(%arg0: i32) -> (i32, i32) {
    %c0_i32 = arith.constant 0 : i32
    %c0_i32_0 = arith.constant 0 : i32
    return %arg0, %c0_i32 : i32, i32
  }
}

</mosaic_0001>

<bundles_post_ra>
// kernel: tpu_custom_call.1
= control target key start
LH: loop header
LB: loop body
LE: loop exit
PB: predicated region body
PF: predicated region fallthrough
CT: control target
= control target key end

     0   :  { %17 = vsyncpa [#allocation3], 0  ;;  %s9917_s0 = inlined_call_operand.hbm [shape: f32[2,2304], index: 0, kind: input, shape index: {}]   ;;  %s9918_s1 = inlined_call_operand.hbm [shape: bf16[2304,512], index: 1, kind: input, shape index: {}]   ;;  %s9919_s2 = inlined_call_operand.hbm [shape: f32[1,512], index: 2, kind: input, shape index: {}]   ;;  %s9920_s3 = inlined_call_operand.hbm [shape: bf16[512,256], index: 3, kind: input, shape index: {}]   ;;  %s9921_s4 = inlined_call_operand.hbm [shape: f32[1,256], index: 4, kind: input, shape index: {}]   ;;  %s9922_s5 = inlined_call_operand.hbm [shape: bf16[256,128], index: 5, kind: input, shape index: {}]   ;;  %s9923_s6 = inlined_call_operand.hbm [shape: f32[1,128], index: 6, kind: input, shape index: {}]   ;;  %s9924_s7 = inlined_call_operand.hbm [shape: bf16[128,128], index: 7, kind: input, shape index: {}]   ;;  %s9925_s8 = inlined_call_operand.hbm [shape: f32[1,128], index: 8, kind: input, shape index: {}]   ;;  %s9926_s9 = inlined_call_operand.hbm [shape: f32[2,128], index: 9, kind: output, shape index: {0}]   ;;  %s9927_s10 = inlined_call_operand.hbm [shape: f32[2,128], index: 10, kind: output, shape index: {1}]   ;;  %s9928_s11 = inlined_call_operand.hbm [shape: f32[2,128], index: 11, kind: output, shape index: {2}]  }
   0x1   :  { %18 = vsyncpa [#allocation6], 0 }
   0x2   :  { %19 = vsyncpa [#allocation9], 0 }
   0x3   :  { %20 = vsyncpa [#allocation12], 0 }
   0x4   :  { %21 = vsyncpa [#allocation15], 0 }
   0x5   :  { %22 = vsyncpa [#allocation4], 0 }
   0x6   :  { %23 = vsyncpa [#allocation19], 0  ;;  %s41_s19 = sshll.u32 %s9918_s1, 4  ;;  %s42_s19 = int_to_ptr.hbm [resolvable:$true] %s41_s19 }
   0x7   :  { %27 = vsyncadd [#allocation3], 4032  ;;  %s9403_s20 = smov [#allocation5]   ;;  %s65_s24 = sshll.u32 %s9920_s3, 4  ;;  %s66_s24 = int_to_ptr.hbm [resolvable:$true] %s65_s24 }
   0x8   :  { %s43_s21 = sshll.u32 %s9403_s20, 4  ;;  %s9404_s25 = smov 256   ;;  %s44_s21 = int_to_ptr.vmem [resolvable:$true] %s43_s21 }
   0x9   :  { %s9405_s26 = smov 16   ;;  %s9406_s27 = smov [#allocation8]  }
   0xa   :  { %49 = dma.hbm_to_vmem [thread:$0]  %s42_s19, 73728, %s44_s21, [#allocation6], %s9404_s25, %s9404_s25, %s9405_s26  }
   0xb   :  { %s67_s28 = sshll.u32 %s9406_s27, 4  ;;  %s9407_s29 = smov 128   ;;  %s68_s28 = int_to_ptr.vmem [resolvable:$true] %s67_s28 }
   0xc   :  { %s9408_s30 = smov 8   ;;  %s89_s13 = sshll.u32 %s9922_s5, 4  ;;  %s90_s13 = int_to_ptr.hbm [resolvable:$true] %s89_s13 }
   0xd   :  { %73 = dma.hbm_to_vmem [thread:$0]  %s66_s24, 8192, %s68_s28, [#allocation9], %s9407_s29, %s9407_s29, %s9408_s30  }
   0xe   :  { %s9409_s14 = smov [#allocation11]   ;;  %s113_s17 = sshll.u32 %s9924_s7, 4  ;;  %s114_s17 = int_to_ptr.hbm [resolvable:$true] %s113_s17 }
   0xf   :  { %s91_s15 = sshll.u32 %s9409_s14, 4  ;;  %s9410_s18 = smov 64   ;;  %s92_s15 = int_to_ptr.vmem [resolvable:$true] %s91_s15 }
  0x10   :  { %s9411_s19 = smov 4   ;;  %s9412_s20 = smov [#allocation14]  }
  0x11   :  { %97 = dma.hbm_to_vmem [thread:$0]  %s90_s13, 2048, %s92_s15, [#allocation12], %s9410_s18, %s9410_s18, %s9411_s19  }
  0x12   :  { %s115_s21 = sshll.u32 %s9412_s20, 4  ;;  %s28_s24 = sshll.u32 %s9917_s0, 4  ;;  %s116_s21 = int_to_ptr.vmem [resolvable:$true] %s115_s21  ;;  %s29_s24 = int_to_ptr.hbm [resolvable:$true] %s28_s24 }
  0x13   :  { %121 = dma.hbm_to_vmem [thread:$0]  %s114_s17, 1024, %s116_s21, [#allocation15], %s9410_s18, %s9410_s18, %s9411_s19  }
  0x14   :  { %s9413_s5 = smov [#allocation2]   ;;  %s55_s7 = sshll.u32 %s9919_s2, 4  ;;  %s56_s7 = int_to_ptr.hbm [resolvable:$true] %s55_s7 }
  0x15   :  { %s30_s25 = sshll.u32 %s9413_s5, 4  ;;  %s9414_s28 = smov 576   ;;  %s31_s25 = int_to_ptr.vmem [resolvable:$true] %s30_s25 }
  0x16   :  { %s9415_s29 = smov 36   ;;  %s9416_s30 = smov [#allocation7]  }
  0x17   :  { %36 = dma.hbm_to_vmem [thread:$0]  %s29_s24, 576, %s31_s25, [#allocation3], %s9414_s28, %s9414_s28, %s9415_s29  }
  0x18   :  { %s57_s1 = sshll.u32 %s9416_s30, 4  ;;  %s79_s0 = sshll.u32 %s9921_s4, 4  ;;  %s58_s1 = int_to_ptr.vmem [resolvable:$true] %s57_s1  ;;  %s80_s0 = int_to_ptr.hbm [resolvable:$true] %s79_s0 }
  0x19   :  { %60 = dma.hbm_to_vmem [thread:$0]  %s56_s7, 64, %s58_s1, [#allocation6]  }
  0x1a   :  { %s103_s16 = sshll.u32 %s9923_s6, 4  ;;  %s9417_s3 = smov [#allocation10]   ;;  %s104_s16 = int_to_ptr.hbm [resolvable:$true] %s103_s16 }
  0x1b   :  { %s81_s17 = sshll.u32 %s9417_s3, 4  ;;  %s9418_s2 = smov [#allocation13]   ;;  %s82_s17 = int_to_ptr.vmem [resolvable:$true] %s81_s17 }
  0x1c   :  { %84 = dma.hbm_to_vmem [thread:$0]  %s80_s0, 32, %s82_s17, [#allocation9]  }
  0x1d   :  { %s105_s18 = sshll.u32 %s9418_s2, 4  ;;  %s127_s21 = sshll.u32 %s9925_s8, 4  ;;  %s106_s18 = int_to_ptr.vmem [resolvable:$true] %s105_s18  ;;  %s128_s21 = int_to_ptr.hbm [resolvable:$true] %s127_s21 }
  0x1e   :  { %108 = dma.hbm_to_vmem [thread:$0]  %s104_s16, 16, %s106_s18, [#allocation12]  }
  0x1f   :  { %s9419_s4 = smov [#allocation16]  }
  0x20   :  { %s129_s22 = sshll.u32 %s9419_s4, 4  ;;  %s130_s22 = int_to_ptr.vmem [resolvable:$true] %s129_s22 }
  0x21   :  { %132 = dma.hbm_to_vmem [thread:$0]  %s128_s21, 16, %s130_s22, [#allocation15]  }
  0x22   :  { %9389 = dma.done.wait [#allocation3], 4608  }
  0x23   :  { %9390 = vsyncadd [#allocation3], 4294962688 }
  0x24   :  { %9391 = dma.done.wait [#allocation6], 73792  }
  0x25   :  { %9392 = vsyncadd [#allocation6], 4294893504 }
  0x26   :  { %9393 = dma.done.wait [#allocation9], 8224  }
  0x27   :  { %9394 = vsyncadd [#allocation9], 4294959072 }
  0x28   :  { %9395 = dma.done.wait [#allocation12], 2064  }
  0x29   :  { %9396 = vsyncadd [#allocation12], 4294965232 }
  0x2a   :  { %9397 = dma.done.wait [#allocation15], 1040  }
  0x2b   :  { %9398 = vsyncadd [#allocation15], 4294966256  ;;  %v5831_v0 = vld [vmem:[#allocation5 + $0xe0] sm:$0xf]  ;;  %v8439_v1 = vld [vmem:[#allocation5 + $0xec] sm:$0xf0] }
  0x2c   :  { %v5959_v2 = vld [vmem:[#allocation5 + $0x1e0] sm:$0xf]  ;;  %v5832_v3 = vor.u32 %v8439_v1, %v5831_v0  ;;  %v8471_v4 = vld [vmem:[#allocation5 + $0x1ec] sm:$0xf0] }
  0x2d   :  { %v6087_v5 = vld [vmem:[#allocation5 + $0x2e0] sm:$0xf]  ;;  %v8503_v6 = vld [vmem:[#allocation5 + $0x2ec] sm:$0xf0]  ;;  %v5960_v7 = vor.u32 %v8471_v4, %v5959_v2 }
  0x2e   :  { %v6088_v8 = vor.u32 %v8503_v6, %v6087_v5  ;;  %v6215_v9 = vld [vmem:[#allocation5 + $0x3e0] sm:$0xf]  ;;  %v8535_v10 = vld [vmem:[#allocation5 + $0x3ec] sm:$0xf0]  ;;  %3852 = vmatpush.bf16.msra.mxu0 %v5832_v3 }
  0x2f   :  { %v5815_v11 = vld [vmem:[#allocation5 + $0xc0] sm:$0xf]  ;;  %v6216_v12 = vor.u32 %v8535_v10, %v6215_v9  ;;  %v8435_v13 = vld [vmem:[#allocation5 + $0xcc] sm:$0xf0]  ;;  %3866 = vmatpush.bf16.msra.mxu1 %v5960_v7 }
  0x30   :  { %v5943_v14 = vld [vmem:[#allocation5 + $0x1c0] sm:$0xf]  ;;  %v8467_v15 = vld [vmem:[#allocation5 + $0x1cc] sm:$0xf0]  ;;  %3880 = vmatpush.bf16.msra.mxu2 %v6088_v8  ;;  %v5816_v16 = vor.u32 %v8435_v13, %v5815_v11 }
  0x31   :  { %v5944_v17 = vor.u32 %v8467_v15, %v5943_v14  ;;  %v6071_v18 = vld [vmem:[#allocation5 + $0x2c0] sm:$0xf]  ;;  %v8499_v19 = vld [vmem:[#allocation5 + $0x2cc] sm:$0xf0]  ;;  %3894 = vmatpush.bf16.msra.mxu3 %v6216_v12 }
  0x32   :  { %v6199_v20 = vld [vmem:[#allocation5 + $0x3c0] sm:$0xf]  ;;  %v6072_v21 = vor.u32 %v8499_v19, %v6071_v18  ;;  %v8531_v22 = vld [vmem:[#allocation5 + $0x3cc] sm:$0xf0]  ;;  %3853 = vmatpush.bf16.msra.mxu0 %v5816_v16 }
  0x33   :  { %v5799_v23 = vld [vmem:[#allocation5 + $0xa0] sm:$0xf]  ;;  %v8431_v24 = vld [vmem:[#allocation5 + $0xac] sm:$0xf0]  ;;  %v6200_v25 = vor.u32 %v8531_v22, %v6199_v20  ;;  %3867 = vmatpush.bf16.msra.mxu1 %v5944_v17 }
  0x34   :  { %v5927_v26 = vld [vmem:[#allocation5 + $0x1a0] sm:$0xf]  ;;  %v8463_v27 = vld [vmem:[#allocation5 + $0x1ac] sm:$0xf0]  ;;  %v5800_v29 = vor.u32 %v8431_v24, %v5799_v23  ;;  %3881 = vmatpush.bf16.msra.mxu2 %v6072_v21 }
  0x35   :  { %v6055_v28 = vld [vmem:[#allocation5 + $0x2a0] sm:$0xf]  ;;  %v8495_v30 = vld [vmem:[#allocation5 + $0x2ac] sm:$0xf0]  ;;  %v5928_v33 = vor.u32 %v8463_v27, %v5927_v26  ;;  %3895 = vmatpush.bf16.msra.mxu3 %v6200_v25 }
  0x36   :  { %v6183_v31 = vld [vmem:[#allocation5 + $0x3a0] sm:$0xf]  ;;  %v8527_v32 = vld [vmem:[#allocation5 + $0x3ac] sm:$0xf0]  ;;  %v6056_v34 = vor.u32 %v8495_v30, %v6055_v28  ;;  %3854 = vmatpush.bf16.msra.mxu0 %v5800_v29 }
  0x37   :  { %v5783_v35 = vld [vmem:[#allocation5 + $0x80] sm:$0xf]  ;;  %v8427_v36 = vld [vmem:[#allocation5 + $0x8c] sm:$0xf0]  ;;  %v6184_v38 = vor.u32 %v8527_v32, %v6183_v31  ;;  %3868 = vmatpush.bf16.msra.mxu1 %v5928_v33 }
  0x38   :  { %v5911_v37 = vld [vmem:[#allocation5 + $0x180] sm:$0xf]  ;;  %v8459_v39 = vld [vmem:[#allocation5 + $0x18c] sm:$0xf0]  ;;  %v5784_v44 = vor.u32 %v8427_v36, %v5783_v35  ;;  %3882 = vmatpush.bf16.msra.mxu2 %v6056_v34 }
  0x39   :  { %v6039_v40 = vld [vmem:[#allocation5 + $0x280] sm:$0xf]  ;;  %v8491_v41 = vld [vmem:[#allocation5 + $0x28c] sm:$0xf0]  ;;  %v5912_v45 = vor.u32 %v8459_v39, %v5911_v37  ;;  %3896 = vmatpush.bf16.msra.mxu3 %v6184_v38 }
  0x3a   :  { %v6167_v42 = vld [vmem:[#allocation5 + $0x380] sm:$0xf]  ;;  %v8523_v43 = vld [vmem:[#allocation5 + $0x38c] sm:$0xf0]  ;;  %v6040_v46 = vor.u32 %v8491_v41, %v6039_v40  ;;  %3855 = vmatpush.bf16.msra.mxu0 %v5784_v44 }
  0x3b   :  { %v5767_v47 = vld [vmem:[#allocation5 + $0x60] sm:$0xf]  ;;  %v8423_v48 = vld [vmem:[#allocation5 + $0x6c] sm:$0xf0]  ;;  %v6168_v50 = vor.u32 %v8523_v43, %v6167_v42  ;;  %3869 = vmatpush.bf16.msra.mxu1 %v5912_v45 }
  0x3c   :  { %v5895_v49 = vld [vmem:[#allocation5 + $0x160] sm:$0xf]  ;;  %v8455_v51 = vld [vmem:[#allocation5 + $0x16c] sm:$0xf0]  ;;  %v5768_v56 = vor.u32 %v8423_v48, %v5767_v47  ;;  %3883 = vmatpush.bf16.msra.mxu2 %v6040_v46 }
  0x3d   :  { %v6023_v52 = vld [vmem:[#allocation5 + $0x260] sm:$0xf]  ;;  %v8487_v53 = vld [vmem:[#allocation5 + $0x26c] sm:$0xf0]  ;;  %v5896_v57 = vor.u32 %v8455_v51, %v5895_v49  ;;  %3897 = vmatpush.bf16.msra.mxu3 %v6168_v50 }
  0x3e   :  { %v6151_v54 = vld [vmem:[#allocation5 + $0x360] sm:$0xf]  ;;  %v8519_v55 = vld [vmem:[#allocation5 + $0x36c] sm:$0xf0]  ;;  %v6024_v58 = vor.u32 %v8487_v53, %v6023_v52  ;;  %3856 = vmatpush.bf16.msra.mxu0 %v5768_v56 }
  0x3f   :  { %v5751_v59 = vld [vmem:[#allocation5 + $0x40] sm:$0xf]  ;;  %v8419_v60 = vld [vmem:[#allocation5 + $0x4c] sm:$0xf0]  ;;  %v6152_v62 = vor.u32 %v8519_v55, %v6151_v54  ;;  %3870 = vmatpush.bf16.msra.mxu1 %v5896_v57 }
  0x40   :  { %v5879_v61 = vld [vmem:[#allocation5 + $0x140] sm:$0xf]  ;;  %v8451_v63 = vld [vmem:[#allocation5 + $0x14c] sm:$0xf0]  ;;  %v5752_v4 = vor.u32 %v8419_v60, %v5751_v59  ;;  %3884 = vmatpush.bf16.msra.mxu2 %v6024_v58  ;;  %v174_v60 = vld [vmem:[#allocation2 + $0x24] sm:$0xff] }
  0x41   :  { %v6007_v0 = vld [vmem:[#allocation5 + $0x240] sm:$0xf]  ;;  %v8483_v1 = vld [vmem:[#allocation5 + $0x24c] sm:$0xf0]  ;;  %v5880_v5 = vor.u32 %v8451_v63, %v5879_v61  ;;  %3898 = vmatpush.bf16.msra.mxu3 %v6152_v62  ;;  %251 = vst [vmem:[#allocation1 + $0x1] ss:$4 sm:$0xff] %v174_v60 }
  0x42   :  { %v6135_v2 = vld [vmem:[#allocation5 + $0x340] sm:$0xf]  ;;  %v8515_v3 = vld [vmem:[#allocation5 + $0x34c] sm:$0xf0]  ;;  %v6008_v6 = vor.u32 %v8483_v1, %v6007_v0  ;;  %3857 = vmatpush.bf16.msra.mxu0 %v5752_v4  ;;  %v170_v0 = vld [vmem:[#allocation2 + $0x8] sm:$0xff] }
  0x43   :  { %v5735_v7 = vld [vmem:[#allocation5 + $0x20] sm:$0xf]  ;;  %v8415_v8 = vld [vmem:[#allocation5 + $0x2c] sm:$0xf0]  ;;  %v6136_v10 = vor.u32 %v8515_v3, %v6135_v2  ;;  %3871 = vmatpush.bf16.msra.mxu1 %v5880_v5  ;;  %v179_v1 = vld [vmem:[#allocation2 + $0x48] sm:$0xff] }
  0x44   :  { %v5863_v9 = vld [vmem:[#allocation5 + $0x120] sm:$0xf]  ;;  %v8447_v11 = vld [vmem:[#allocation5 + $0x12c] sm:$0xf0]  ;;  %v5736_v16 = vor.u32 %v8415_v8, %v5735_v7  ;;  %3885 = vmatpush.bf16.msra.mxu2 %v6008_v6  ;;  %253 = vst [vmem:[#allocation1 + $0x2] ss:$4 sm:$0xff] %v179_v1 }
  0x45   :  { %v5991_v12 = vld [vmem:[#allocation5 + $0x220] sm:$0xf]  ;;  %v8479_v13 = vld [vmem:[#allocation5 + $0x22c] sm:$0xf0]  ;;  %v5864_v19 = vor.u32 %v8447_v11, %v5863_v9  ;;  %3899 = vmatpush.bf16.msra.mxu3 %v6136_v10  ;;  %v185_v11 = vld [vmem:[#allocation2 + $0x74] sm:$0xff] }
  0x46   :  { %v6119_v14 = vld [vmem:[#allocation5 + $0x320] sm:$0xf]  ;;  %v8511_v15 = vld [vmem:[#allocation5 + $0x32c] sm:$0xf0]  ;;  %v5992_v20 = vor.u32 %v8479_v13, %v5991_v12  ;;  %3858 = vmatpush.bf16.msra.mxu0 %v5736_v16  ;;  %257 = vst [vmem:[#allocation1 + $0x20] ss:$4 sm:$0xff] %v170_v0 }
  0x47   :  { %v5719_v17 = vld [vmem:[#allocation5] sm:$0xf]  ;;  %v8411_v18 = vld [vmem:[#allocation5 + $0xc] sm:$0xf0]  ;;  %v6120_v24 = vor.u32 %v8511_v15, %v6119_v14  ;;  %3872 = vmatpush.bf16.msra.mxu1 %v5864_v19  ;;  %263 = vst [vmem:[#allocation1 + $0x23] ss:$4 sm:$0xff] %v185_v11 }
  0x48   :  { %v5847_v21 = vld [vmem:[#allocation5 + $0x100] sm:$0xf]  ;;  %v8443_v22 = vld [vmem:[#allocation5 + $0x10c] sm:$0xf0]  ;;  %v5720_v31 = vor.u32 %v8411_v18, %v5719_v17  ;;  %3886 = vmatpush.bf16.msra.mxu2 %v5992_v20 }
  0x49   :  { %v5975_v23 = vld [vmem:[#allocation5 + $0x200] sm:$0xf]  ;;  %v8475_v25 = vld [vmem:[#allocation5 + $0x20c] sm:$0xf0]  ;;  %v5848_v35 = vor.u32 %v8443_v22, %v5847_v21  ;;  %3900 = vmatpush.bf16.msra.mxu3 %v6120_v24 }
  0x4a   :  { %v6103_v26 = vld [vmem:[#allocation5 + $0x300] sm:$0xf]  ;;  %v8507_v27 = vld [vmem:[#allocation5 + $0x30c] sm:$0xf0]  ;;  %v5976_v36 = vor.u32 %v8475_v25, %v5975_v23  ;;  %3859 = vmatpush.bf16.msra.mxu0 %v5720_v31 }
  0x4b   :  { %v6343_v28 = vld [vmem:[#allocation5 + $0x4e0] sm:$0xf]  ;;  %v8567_v29 = vld [vmem:[#allocation5 + $0x4ec] sm:$0xf0]  ;;  %v6104_v39 = vor.u32 %v8507_v27, %v6103_v26  ;;  %3873 = vmatpush.bf16.msra.mxu1 %v5848_v35 }
  0x4c   :  { %v6471_v30 = vld [vmem:[#allocation5 + $0x5e0] sm:$0xf]  ;;  %v8599_v32 = vld [vmem:[#allocation5 + $0x5ec] sm:$0xf0]  ;;  %v6344_v40 = vor.u32 %v8567_v29, %v6343_v28  ;;  %3887 = vmatpush.bf16.msra.mxu2 %v5976_v36 }
  0x4d   :  { %v6599_v33 = vld [vmem:[#allocation5 + $0x6e0] sm:$0xf]  ;;  %v8631_v34 = vld [vmem:[#allocation5 + $0x6ec] sm:$0xf0]  ;;  %v6472_v43 = vor.u32 %v8599_v32, %v6471_v30  ;;  %3901 = vmatpush.bf16.msra.mxu3 %v6104_v39  ;;  %v172_v30 = vld [vmem:[#allocation2 + $0x18] sm:$0xff] }
  0x4e   :  { %v6727_v37 = vld [vmem:[#allocation5 + $0x7e0] sm:$0xf]  ;;  %v8663_v38 = vld [vmem:[#allocation5 + $0x7ec] sm:$0xf0]  ;;  %v6600_v44 = vor.u32 %v8631_v34, %v6599_v33  ;;  %3908 = vmatpush.bf16.msrb.mxu0 %v6344_v40 }
  0x4f   :  { %v6327_v41 = vld [vmem:[#allocation5 + $0x4c0] sm:$0xf]  ;;  %v8563_v42 = vld [vmem:[#allocation5 + $0x4cc] sm:$0xf0]  ;;  %v6728_v48 = vor.u32 %v8663_v38, %v6727_v37  ;;  %3922 = vmatpush.bf16.msrb.mxu1 %v6472_v43 }
  0x50   :  { %v6455_v45 = vld [vmem:[#allocation5 + $0x5c0] sm:$0xf]  ;;  %v8595_v46 = vld [vmem:[#allocation5 + $0x5cc] sm:$0xf0]  ;;  %v6328_v55 = vor.u32 %v8563_v42, %v6327_v41  ;;  %3936 = vmatpush.bf16.msrb.mxu2 %v6600_v44  ;;  %v187_v44 = vld [vmem:[#allocation2 + $0x84] sm:$0xff] }
  0x51   :  { %v6583_v47 = vld [vmem:[#allocation5 + $0x6c0] sm:$0xf]  ;;  %v8627_v49 = vld [vmem:[#allocation5 + $0x6cc] sm:$0xf0]  ;;  %v6456_v61 = vor.u32 %v8595_v46, %v6455_v45  ;;  %3950 = vmatpush.bf16.msrb.mxu3 %v6728_v48 }
  0x52   :  { %v6711_v50 = vld [vmem:[#allocation5 + $0x7c0] sm:$0xf]  ;;  %v8659_v51 = vld [vmem:[#allocation5 + $0x7cc] sm:$0xf0]  ;;  %v6584_v62 = vor.u32 %v8627_v49, %v6583_v47  ;;  %3909 = vmatpush.bf16.msrb.mxu0 %v6328_v55 }
  0x53   :  { %v6311_v52 = vld [vmem:[#allocation5 + $0x4a0] sm:$0xf]  ;;  %v8559_v53 = vld [vmem:[#allocation5 + $0x4ac] sm:$0xf0]  ;;  %v6712_v2 = vor.u32 %v8659_v51, %v6711_v50  ;;  %3923 = vmatpush.bf16.msrb.mxu1 %v6456_v61 }
  0x54   :  { %v169_v54 = vld [vmem:[#allocation2] sm:$0xff]  ;;  %v8591_v57 = vld [vmem:[#allocation5 + $0x5ac] sm:$0xf0]  ;;  %v6312_v9 = vor.u32 %v8559_v53, %v6311_v52  ;;  %3937 = vmatpush.bf16.msrb.mxu2 %v6584_v62 }
  0x55   :  { %v6439_v56 = vld [vmem:[#allocation5 + $0x5a0] sm:$0xf]  ;;  %v8623_v59 = vld [vmem:[#allocation5 + $0x6ac] sm:$0xf0]  ;;  %249 = vst [vmem:[#allocation1] ss:$4 sm:$0xff] %v169_v54  ;;  %3951 = vmatpush.bf16.msrb.mxu3 %v6712_v2 }
  0x56   :  { %v6567_v58 = vld [vmem:[#allocation5 + $0x6a0] sm:$0xf]  ;;  %v8655_v3 = vld [vmem:[#allocation5 + $0x7ac] sm:$0xf0]  ;;  %v6440_v12 = vor.u32 %v8591_v57, %v6439_v56  ;;  %3910 = vmatpush.bf16.msrb.mxu0 %v6312_v9 }
  0x57   :  { %v6695_v63 = vld [vmem:[#allocation5 + $0x7a0] sm:$0xf]  ;;  %v175_v4 = vld [vmem:[#allocation2 + $0x2c] sm:$0xff]  ;;  %v6568_v13 = vor.u32 %v8623_v59, %v6567_v58 }
  0x58   :  { %v184_v5 = vld [vmem:[#allocation2 + $0x6c] sm:$0xff]  ;;  %v6295_v6 = vld [vmem:[#allocation5 + $0x480] sm:$0xf]  ;;  %259 = vst [vmem:[#allocation1 + $0x21] ss:$4 sm:$0xff] %v175_v4  ;;  %v6696_v15 = vor.u32 %v8655_v3, %v6695_v63  ;;  %3924 = vmatpush.bf16.msrb.mxu1 %v6440_v12 }
  0x59   :  { %v8555_v7 = vld [vmem:[#allocation5 + $0x48c] sm:$0xf0]  ;;  %255 = vst [vmem:[#allocation1 + $0x3] ss:$4 sm:$0xff] %v184_v5  ;;  %v6423_v10 = vld [vmem:[#allocation5 + $0x580] sm:$0xf]  ;;  %3938 = vmatpush.bf16.msrb.mxu2 %v6568_v13 }
  0x5a   :  { %v180_v8 = vld [vmem:[#allocation2 + $0x50] sm:$0xff]  ;;  %v6551_v16 = vld [vmem:[#allocation5 + $0x680] sm:$0xf]  ;;  %v6296_v20 = vor.u32 %v8555_v7, %v6295_v6  ;;  %3952 = vmatpush.bf16.msrb.mxu3 %v6696_v15  ;;  %v199_v15 = vld [vmem:[#allocation2 + $0xd8] sm:$0xff] }
  0x5b   :  { %v8587_v14 = vld [vmem:[#allocation5 + $0x58c] sm:$0xf0]  ;;  %261 = vst [vmem:[#allocation1 + $0x22] ss:$4 sm:$0xff] %v180_v8  ;;  %v6679_v18 = vld [vmem:[#allocation5 + $0x780] sm:$0xf] }
  0x5c   :  { %v8619_v17 = vld [vmem:[#allocation5 + $0x68c] sm:$0xf0]  ;;  %v6424_v21 = vor.u32 %v8587_v14, %v6423_v10  ;;  %v6279_v23 = vld [vmem:[#allocation5 + $0x460] sm:$0xf]  ;;  %3911 = vmatpush.bf16.msrb.mxu0 %v6296_v20  ;;  %v194_v14 = vld [vmem:[#allocation2 + $0xb4] sm:$0xff] }
  0x5d   :  { %v8651_v19 = vld [vmem:[#allocation5 + $0x78c] sm:$0xf0]  ;;  %v6552_v22 = vor.u32 %v8619_v17, %v6551_v16  ;;  %v6407_v25 = vld [vmem:[#allocation5 + $0x560] sm:$0xf] }
  0x5e   :  { %v8551_v24 = vld [vmem:[#allocation5 + $0x46c] sm:$0xf0]  ;;  %v6680_v26 = vor.u32 %v8651_v19, %v6679_v18  ;;  %v6535_v28 = vld [vmem:[#allocation5 + $0x660] sm:$0xf]  ;;  %3925 = vmatpush.bf16.msrb.mxu1 %v6424_v21 }
  0x5f   :  { %v8583_v27 = vld [vmem:[#allocation5 + $0x56c] sm:$0xf0]  ;;  %v6663_v31 = vld [vmem:[#allocation5 + $0x760] sm:$0xf]  ;;  %v6280_v34 = vor.u32 %v8551_v24, %v6279_v23  ;;  %3939 = vmatpush.bf16.msrb.mxu2 %v6552_v22 }
  0x60   :  { %v8615_v29 = vld [vmem:[#allocation5 + $0x66c] sm:$0xf0]  ;;  %v177_v33 = vld [vmem:[#allocation2 + $0x3c] sm:$0xff]  ;;  %v6408_v39 = vor.u32 %v8583_v27, %v6407_v25  ;;  %3953 = vmatpush.bf16.msrb.mxu3 %v6680_v26  ;;  %v266_v24 = vld.sshfl [vmem:[#allocation1 + $0x10] sm:$0xff pattern:$0x73625140] }
  0x61   :  { %v8647_v32 = vld [vmem:[#allocation5 + $0x76c] sm:$0xf0]  ;;  %v6263_v35 = vld [vmem:[#allocation5 + $0x440] sm:$0xf]  ;;  %v6536_v40 = vor.u32 %v8615_v29, %v6535_v28  ;;  %3912 = vmatpush.bf16.msrb.mxu0 %v6280_v34  ;;  %v176_v29 = vld [vmem:[#allocation2 + $0x34] sm:$0xff] }
  0x62   :  { %v8547_v36 = vld [vmem:[#allocation5 + $0x44c] sm:$0xf0]  ;;  %v6391_v37 = vld [vmem:[#allocation5 + $0x540] sm:$0xf]  ;;  %v6664_v47 = vor.u32 %v8647_v32, %v6663_v31  ;;  %3926 = vmatpush.bf16.msrb.mxu1 %v6408_v39 }
  0x63   :  { %v182_v38 = vld [vmem:[#allocation2 + $0x60] sm:$0xff]  ;;  %v8579_v41 = vld [vmem:[#allocation5 + $0x54c] sm:$0xf0]  ;;  %v9514_v45 = vld.sshfl [vmem:[#allocation1 + $0x20] sm:$0xff pattern:$0x73625140]  ;;  %v6264_v50 = vor.u32 %v8547_v36, %v6263_v35  ;;  %3940 = vmatpush.bf16.msrb.mxu2 %v6536_v40 }
  0x64   :  { %v6519_v42 = vld [vmem:[#allocation5 + $0x640] sm:$0xf]  ;;  %v8611_v43 = vld [vmem:[#allocation5 + $0x64c] sm:$0xf0]  ;;  %v6392_v53 = vor.u32 %v8579_v41, %v6391_v37  ;;  %3954 = vmatpush.bf16.msrb.mxu3 %v6664_v47 }
  0x65   :  { %v9516_v46 = vld.sshfl [vmem:[#allocation1 + $0x28] sm:$0xff pattern:$0x73625140]  ;;  %v9518_v48 = vld.sshfl [vmem:[#allocation1 + $0x30] sm:$0xff pattern:$0x73625140]  ;;  %v6520_v54 = vor.u32 %v8611_v43, %v6519_v42  ;;  %3913 = vmatpush.bf16.msrb.mxu0 %v6264_v50 }
  0x66   :  { %v9520_v49 = vld.sshfl [vmem:[#allocation1 + $0x38] sm:$0xff pattern:$0x73625140]  ;;  %v6647_v51 = vld [vmem:[#allocation5 + $0x740] sm:$0xf]  ;;  %3927 = vmatpush.bf16.msrb.mxu1 %v6392_v53 }
  0x67   :  { %276 = vst [vmem:[#allocation1 + $0x20] ss:$4 sm:$0xff] %v172_v30  ;;  %v8643_v52 = vld [vmem:[#allocation5 + $0x74c] sm:$0xf0]  ;;  %v6247_v55 = vld [vmem:[#allocation5 + $0x420] sm:$0xf]  ;;  %3941 = vmatpush.bf16.msrb.mxu2 %v6520_v54 }
  0x68   :  { %277 = vst [vmem:[#allocation1 + $0x21] ss:$4 sm:$0xff] %v177_v33  ;;  %v8543_v56 = vld [vmem:[#allocation5 + $0x42c] sm:$0xf0]  ;;  %v6648_v57 = vor.u32 %v8643_v52, %v6647_v51  ;;  %v6375_v58 = vld [vmem:[#allocation5 + $0x520] sm:$0xf] }
  0x69   :  { %278 = vst [vmem:[#allocation1 + $0x22] ss:$4 sm:$0xff] %v182_v38  ;;  %v8575_v59 = vld [vmem:[#allocation5 + $0x52c] sm:$0xf0]  ;;  %v6503_v60 = vld [vmem:[#allocation5 + $0x620] sm:$0xf]  ;;  %v6248_v62 = vor.u32 %v8543_v56, %v6247_v55 }
  0x6a   :  { %279 = vst [vmem:[#allocation1 + $0x23] ss:$4 sm:$0xff] %v187_v44  ;;  %v8607_v61 = vld [vmem:[#allocation5 + $0x62c] sm:$0xf0]  ;;  %v6631_v63 = vld [vmem:[#allocation5 + $0x720] sm:$0xf]  ;;  %v6376_v1 = vor.u32 %v8575_v59, %v6375_v58  ;;  %3955 = vmatpush.bf16.msrb.mxu3 %v6648_v57 }
  0x6b   :  { %v8639_v0 = vld [vmem:[#allocation5 + $0x72c] sm:$0xf0]  ;;  %v6504_v2 = vor.u32 %v8607_v61, %v6503_v60  ;;  %v6231_v3 = vld [vmem:[#allocation5 + $0x400] sm:$0xf]  ;;  %3914 = vmatpush.bf16.msrb.mxu0 %v6248_v62  ;;  %v181_v30 = vld [vmem:[#allocation2 + $0x58] sm:$0xff] }
  0x6c   :  { %v8539_v4 = vld [vmem:[#allocation5 + $0x40c] sm:$0xf0]  ;;  %v6359_v5 = vld [vmem:[#allocation5 + $0x500] sm:$0xf]  ;;  %v6632_v6 = vor.u32 %v8639_v0, %v6631_v63  ;;  %3928 = vmatpush.bf16.msrb.mxu1 %v6376_v1  ;;  %v178_v59 = vld [vmem:[#allocation2 + $0x44] sm:$0xf] }
  0x6d   :  { %v8571_v7 = vld [vmem:[#allocation5 + $0x50c] sm:$0xf0]  ;;  %v6487_v8 = vld [vmem:[#allocation5 + $0x600] sm:$0xf]  ;;  %v6232_v12 = vor.u32 %v8539_v4, %v6231_v3  ;;  %3942 = vmatpush.bf16.msrb.mxu2 %v6504_v2  ;;  %v183_v63 = vld [vmem:[#allocation2 + $0x68] sm:$0xf] }
  0x6e   :  { %v8603_v9 = vld [vmem:[#allocation5 + $0x60c] sm:$0xf0]  ;;  %v6615_v10 = vld [vmem:[#allocation5 + $0x700] sm:$0xf]  ;;  %v6360_v16 = vor.u32 %v8571_v7, %v6359_v5  ;;  %3956 = vmatpush.bf16.msrb.mxu3 %v6632_v6  ;;  %v188_v3 = vld [vmem:[#allocation2 + $0x8c] sm:$0xf] }
  0x6f   :  { %v8635_v11 = vld [vmem:[#allocation5 + $0x70c] sm:$0xf0]  ;;  %v6488_v17 = vor.u32 %v8603_v9, %v6487_v8  ;;  %v264_v21 = vld.sshfl [vmem:[#allocation1] sm:$0xff pattern:$0x73625140]  ;;  %3915 = vmatpush.bf16.msrb.mxu0 %v6232_v12 }
  0x70   :  { %v189_v13 = vld [vmem:[#allocation2 + $0x90] sm:$0xff]  ;;  %v6616_v20 = vor.u32 %v8635_v11, %v6615_v10  ;;  %v204_v25 = vld [vmem:[#allocation2 + $0xfc] sm:$0xff]  ;;  %3929 = vmatpush.bf16.msrb.mxu1 %v6360_v16 }
  0x71   :  { %v9522_v18 = vld.sshfl [vmem:[#allocation1 + $0x20] sm:$0xff pattern:$0x73625140]  ;;  %v9524_v19 = vld.sshfl [vmem:[#allocation1 + $0x28] sm:$0xff pattern:$0x73625140]  ;;  %3943 = vmatpush.bf16.msrb.mxu2 %v6488_v17 }
  0x72   :  { %v9526_v22 = vld.sshfl [vmem:[#allocation1 + $0x30] sm:$0xff pattern:$0x73625140]  ;;  %v9528_v23 = vld.sshfl [vmem:[#allocation1 + $0x38] sm:$0xff pattern:$0x73625140]  ;;  %3957 = vmatpush.bf16.msrb.mxu3 %v6616_v20 }
  0x73   :  { %292 = vst [vmem:[#allocation1 + $0x20] ss:$4 sm:$0xff] %v189_v13  ;;  %v265_v26 = vld.sshfl [vmem:[#allocation1 + $0x8] sm:$0xff pattern:$0x73625140]  ;;  %v171_v28 = vld [vmem:[#allocation2 + $0x10] sm:$0xff] }
  0x74   :  { %293 = vst [vmem:[#allocation1 + $0x21] ss:$4 sm:$0xff] %v194_v14  ;;  %v267_v27 = vld.sshfl [vmem:[#allocation1 + $0x18] sm:$0xff pattern:$0x73625140]  ;;  %v186_v31 = vld [vmem:[#allocation2 + $0x7c] sm:$0xff] }
  0x75   :  { %294 = vst [vmem:[#allocation1 + $0x22] ss:$4 sm:$0xff] %v199_v15  ;;  %v6855_v32 = vld [vmem:[#allocation5 + $0x8e0] sm:$0xf]  ;;  %v8695_v33 = vld [vmem:[#allocation5 + $0x8ec] sm:$0xf0] }
  0x76   :  { %295 = vst [vmem:[#allocation1 + $0x23] ss:$4 sm:$0xff] %v204_v25  ;;  %v6983_v34 = vld [vmem:[#allocation5 + $0x9e0] sm:$0xf]  ;;  %v8727_v35 = vld [vmem:[#allocation5 + $0x9ec] sm:$0xf0]  ;;  %v6856_v52 = vor.u32 %v8695_v33, %v6855_v32 }
  0x77   :  { %272 = vst [vmem:[#allocation1] ss:$4 sm:$0xff] %v171_v28  ;;  %v7111_v36 = vld [vmem:[#allocation5 + $0xae0] sm:$0xf]  ;;  %v8759_v37 = vld [vmem:[#allocation5 + $0xaec] sm:$0xf0]  ;;  %v6984_v53 = vor.u32 %v8727_v35, %v6983_v34 }
  0x78   :  { %273 = vst [vmem:[#allocation1 + $0x1] ss:$4 sm:$0xff] %v176_v29  ;;  %v7239_v38 = vld [vmem:[#allocation5 + $0xbe0] sm:$0xf]  ;;  %v8791_v39 = vld [vmem:[#allocation5 + $0xbec] sm:$0xf0]  ;;  %v7112_v57 = vor.u32 %v8759_v37, %v7111_v36 }
  0x79   :  { %274 = vst [vmem:[#allocation1 + $0x2] ss:$4 sm:$0xff] %v181_v30  ;;  %v6839_v42 = vld [vmem:[#allocation5 + $0x8c0] sm:$0xf]  ;;  %v8691_v43 = vld [vmem:[#allocation5 + $0x8cc] sm:$0xf0]  ;;  %v7240_v58 = vor.u32 %v8791_v39, %v7239_v38 }
  0x7a   :  { %275 = vst [vmem:[#allocation1 + $0x3] ss:$4 sm:$0xff] %v186_v31  ;;  %v173_v54 = vld [vmem:[#allocation2 + $0x20] sm:$0xf]  ;;  %v8723_v61 = vld [vmem:[#allocation5 + $0x9cc] sm:$0xf0]  ;;  %v6840_v12 = vor.u32 %v8691_v43, %v6839_v42 }
  0x7b   :  { %v6967_v60 = vld [vmem:[#allocation5 + $0x9c0] sm:$0xf]  ;;  %v8755_v0 = vld [vmem:[#allocation5 + $0xacc] sm:$0xf0]  ;;  %v190_v36 = vld [vmem:[#allocation2 + $0x98] sm:$0xff] }
  0x7c   :  { %v7095_v62 = vld [vmem:[#allocation5 + $0xac0] sm:$0xf]  ;;  %v8787_v2 = vld [vmem:[#allocation5 + $0xbcc] sm:$0xf0]  ;;  %v6968_v13 = vor.u32 %v8723_v61, %v6967_v60 }
  0x7d   :  { %v298_v40 = vld.sshfl [vmem:[#allocation1 + $0x20] sm:$0xff pattern:$0x73625140]  ;;  %v300_v41 = vld.sshfl [vmem:[#allocation1 + $0x30] sm:$0xff pattern:$0x73625140]  ;;  %v7096_v14 = vor.u32 %v8755_v0, %v7095_v62 }
  0x7e   :  { %v9530_v44 = vpack.c.bf16 %v298_v40, %v264_v21  ;;  %v9532_v47 = vpack.c.bf16 %v300_v41, %v266_v24  ;;  %v299_v50 = vld.sshfl [vmem:[#allocation1 + $0x28] sm:$0xff pattern:$0x73625140]  ;;  %v301_v51 = vld.sshfl [vmem:[#allocation1 + $0x38] sm:$0xff pattern:$0x73625140] }
  0x7f   :  { %v9534_v55 = vpack.c.bf16 %v299_v50, %v265_v26  ;;  %v9536_v56 = vpack.c.bf16 %v301_v51, %v267_v27  ;;  %v7223_v1 = vld [vmem:[#allocation5 + $0xbc0] sm:$0xf]  ;;  %v8687_v7 = vld [vmem:[#allocation5 + $0x8ac] sm:$0xf0] }
  0x80   :  { %3860 = vmatmul.bf16.vlgmr.msra.gmra.mxu0 %v9530_v44  ;;  %3888 = vmatmul.bf16.vlgmr.msra.gmra.mxu2 %v9532_v47  ;;  %v6823_v6 = vld [vmem:[#allocation5 + $0x8a0] sm:$0xf]  ;;  %v8719_v9 = vld [vmem:[#allocation5 + $0x9ac] sm:$0xf0]  ;;  %v7224_v15 = vor.u32 %v8787_v2, %v7223_v1 }
  0x81   :  { %3874 = vmatmul.bf16.vlgmr.msra.gmra.mxu1 %v9534_v55  ;;  %3902 = vmatmul.bf16.vlgmr.msra.gmra.mxu3 %v9536_v56  ;;  %v9542_v4 = vld.sshfl [vmem:[#allocation1] sm:$0xff pattern:$0x73625140]  ;;  %v9544_v5 = vld.sshfl [vmem:[#allocation1 + $0x8] sm:$0xff pattern:$0x73625140]  ;;  %v6824_v24 = vor.u32 %v8687_v7, %v6823_v6 }
  0x82   :  { %v6951_v8 = vld [vmem:[#allocation5 + $0x9a0] sm:$0xf]  ;;  %3964 = vmatpush.bf16.msra.mxu0 %v6856_v52  ;;  %3978 = vmatpush.bf16.msra.mxu1 %v6984_v53  ;;  %v9546_v10 = vld.sshfl [vmem:[#allocation1 + $0x10] sm:$0xff pattern:$0x73625140] }
  0x83   :  { %v9548_v11 = vld.sshfl [vmem:[#allocation1 + $0x18] sm:$0xff pattern:$0x73625140]  ;;  %3992 = vmatpush.bf16.msra.mxu2 %v7112_v57  ;;  %4006 = vmatpush.bf16.msra.mxu3 %v7240_v58  ;;  %v7079_v16 = vld [vmem:[#allocation5 + $0xaa0] sm:$0xf]  ;;  %v6952_v25 = vor.u32 %v8719_v9, %v6951_v8 }
  0x84   :  { %288 = vst [vmem:[#allocation1] ss:$4 sm:$0xff] %v173_v54  ;;  %v8751_v17 = vld [vmem:[#allocation5 + $0xaac] sm:$0xf0]  ;;  %v7207_v20 = vld [vmem:[#allocation5 + $0xba0] sm:$0xf] }
  0x85   :  { %289 = vst [vmem:[#allocation1 + $0x1] ss:$4 sm:$0xff] %v178_v59  ;;  %v8783_v21 = vld [vmem:[#allocation5 + $0xbac] sm:$0xf0]  ;;  %v6807_v26 = vld [vmem:[#allocation5 + $0x880] sm:$0xf]  ;;  %v7080_v28 = vor.u32 %v8751_v17, %v7079_v16 }
  0x86   :  { %290 = vst [vmem:[#allocation1 + $0x2] ss:$4 sm:$0xff] %v183_v63  ;;  %3965 = vmatpush.bf16.msra.mxu0 %v6840_v12  ;;  %3979 = vmatpush.bf16.msra.mxu1 %v6968_v13  ;;  %v8683_v27 = vld [vmem:[#allocation5 + $0x88c] sm:$0xf0]  ;;  %v7208_v29 = vor.u32 %v8783_v21, %v7207_v20  ;;  %v6935_v30 = vld [vmem:[#allocation5 + $0x980] sm:$0xf] }
  0x87   :  { %291 = vst [vmem:[#allocation1 + $0x3] ss:$4 sm:$0xff] %v188_v3  ;;  %3993 = vmatpush.bf16.msra.mxu2 %v7096_v14  ;;  %4007 = vmatpush.bf16.msra.mxu3 %v7224_v15  ;;  %v8715_v31 = vld [vmem:[#allocation5 + $0x98c] sm:$0xf0]  ;;  %v7063_v32 = vld [vmem:[#allocation5 + $0xa80] sm:$0xf]  ;;  %v6808_v38 = vor.u32 %v8683_v27, %v6807_v26 }
  0x88   :  { %v8747_v33 = vld [vmem:[#allocation5 + $0xa8c] sm:$0xf0]  ;;  %v7191_v34 = vld [vmem:[#allocation5 + $0xb80] sm:$0xf]  ;;  %v6936_v39 = vor.u32 %v8715_v31, %v6935_v30  ;;  %v205_v54 = vld [vmem:[#allocation2 + $0x104] sm:$0xff] }
  0x89   :  { %v8779_v35 = vld [vmem:[#allocation5 + $0xb8c] sm:$0xf0]  ;;  %v195_v37 = vld [vmem:[#allocation2 + $0xbc] sm:$0xff]  ;;  %v7064_v43 = vor.u32 %v8747_v33, %v7063_v32 }
  0x8a   :  { %3966 = vmatpush.bf16.msra.mxu0 %v6824_v24  ;;  %3980 = vmatpush.bf16.msra.mxu1 %v6952_v25  ;;  %v6791_v40 = vld [vmem:[#allocation5 + $0x860] sm:$0xf]  ;;  %v8679_v41 = vld [vmem:[#allocation5 + $0x86c] sm:$0xf0]  ;;  %v7192_v50 = vor.u32 %v8779_v35, %v7191_v34 }
  0x8b   :  { %v200_v42 = vld [vmem:[#allocation2 + $0xe0] sm:$0xff]  ;;  %3994 = vmatpush.bf16.msra.mxu2 %v7080_v28  ;;  %4008 = vmatpush.bf16.msra.mxu3 %v7208_v29  ;;  %v8711_v52 = vld [vmem:[#allocation5 + $0x96c] sm:$0xf0]  ;;  %v6792_v0 = vor.u32 %v8679_v41, %v6791_v40 }
  0x8c   :  { %v6919_v51 = vld [vmem:[#allocation5 + $0x960] sm:$0xf]  ;;  %v8743_v57 = vld [vmem:[#allocation5 + $0xa6c] sm:$0xf0]  ;;  %v196_v41 = vld [vmem:[#allocation2 + $0xc4] sm:$0xff] }
  0x8d   :  { %v7047_v53 = vld [vmem:[#allocation5 + $0xa60] sm:$0xf]  ;;  %v8775_v59 = vld [vmem:[#allocation5 + $0xb6c] sm:$0xf0]  ;;  %v6920_v1 = vor.u32 %v8711_v52, %v6919_v51  ;;  %307 = vst [vmem:[#allocation1 + $0x21] ss:$4 sm:$0xff] %v196_v41 }
  0x8e   :  { %v7175_v58 = vld [vmem:[#allocation5 + $0xb60] sm:$0xf]  ;;  %v9550_v60 = vld.sshfl [vmem:[#allocation1] sm:$0xff pattern:$0x73625140]  ;;  %3967 = vmatpush.bf16.msra.mxu0 %v6808_v38  ;;  %3981 = vmatpush.bf16.msra.mxu1 %v6936_v39  ;;  %v7048_v6 = vor.u32 %v8743_v57, %v7047_v53 }
  0x8f   :  { %v9552_v61 = vld.sshfl [vmem:[#allocation1 + $0x8] sm:$0xff pattern:$0x73625140]  ;;  %v8675_v63 = vld [vmem:[#allocation5 + $0x84c] sm:$0xf0]  ;;  %3995 = vmatpush.bf16.msra.mxu2 %v7064_v43  ;;  %4009 = vmatpush.bf16.msra.mxu3 %v7192_v50  ;;  %v7176_v7 = vor.u32 %v8775_v59, %v7175_v58 }
  0x90   :  { %v6775_v62 = vld [vmem:[#allocation5 + $0x840] sm:$0xf]  ;;  %302 = vst [vmem:[#allocation1] ss:$4 sm:$0xff] %v190_v36  ;;  %v8707_v3 = vld [vmem:[#allocation5 + $0x94c] sm:$0xf0] }
  0x91   :  { %v6903_v2 = vld [vmem:[#allocation5 + $0x940] sm:$0xf]  ;;  %303 = vst [vmem:[#allocation1 + $0x1] ss:$4 sm:$0xff] %v195_v37  ;;  %v8739_v9 = vld [vmem:[#allocation5 + $0xa4c] sm:$0xf0]  ;;  %v6776_v14 = vor.u32 %v8675_v63, %v6775_v62 }
  0x92   :  { %v7031_v8 = vld [vmem:[#allocation5 + $0xa40] sm:$0xf]  ;;  %304 = vst [vmem:[#allocation1 + $0x2] ss:$4 sm:$0xff] %v200_v42  ;;  %v8771_v13 = vld [vmem:[#allocation5 + $0xb4c] sm:$0xf0]  ;;  %3968 = vmatpush.bf16.msra.mxu0 %v6792_v0  ;;  %3982 = vmatpush.bf16.msra.mxu1 %v6920_v1  ;;  %v6904_v15 = vor.u32 %v8707_v3, %v6903_v2 }
  0x93   :  { %v7159_v12 = vld [vmem:[#allocation5 + $0xb40] sm:$0xf]  ;;  %305 = vst [vmem:[#allocation1 + $0x3] ss:$4 sm:$0xff] %v205_v54  ;;  %v8671_v17 = vld [vmem:[#allocation5 + $0x82c] sm:$0xf0]  ;;  %3996 = vmatpush.bf16.msra.mxu2 %v7048_v6  ;;  %4010 = vmatpush.bf16.msra.mxu3 %v7176_v7  ;;  %v7032_v21 = vor.u32 %v8739_v9, %v7031_v8 }
  0x94   :  { %v6759_v16 = vld [vmem:[#allocation5 + $0x820] sm:$0xf]  ;;  %v7160_v24 = vor.u32 %v8771_v13, %v7159_v12  ;;  %v8703_v25 = vld [vmem:[#allocation5 + $0x92c] sm:$0xf0]  ;;  %v201_v9 = vld [vmem:[#allocation2 + $0xe8] sm:$0xff] }
  0x95   :  { %v6887_v20 = vld [vmem:[#allocation5 + $0x920] sm:$0xf]  ;;  %v8735_v27 = vld [vmem:[#allocation5 + $0xa2c] sm:$0xf0]  ;;  %v6760_v34 = vor.u32 %v8671_v17, %v6759_v16  ;;  %308 = vst [vmem:[#allocation1 + $0x22] ss:$4 sm:$0xff] %v201_v9 }
  0x96   :  { %v7015_v26 = vld [vmem:[#allocation5 + $0xa20] sm:$0xf]  ;;  %v8767_v29 = vld [vmem:[#allocation5 + $0xb2c] sm:$0xf0]  ;;  %3969 = vmatpush.bf16.msra.mxu0 %v6776_v14  ;;  %3983 = vmatpush.bf16.msra.mxu1 %v6904_v15  ;;  %v6888_v35 = vor.u32 %v8703_v25, %v6887_v20 }
  0x97   :  { %v7143_v28 = vld [vmem:[#allocation5 + $0xb20] sm:$0xf]  ;;  %v8667_v31 = vld [vmem:[#allocation5 + $0x80c] sm:$0xf0]  ;;  %3997 = vmatpush.bf16.msra.mxu2 %v7032_v21  ;;  %4011 = vmatpush.bf16.msra.mxu3 %v7160_v24  ;;  %v7016_v50 = vor.u32 %v8735_v27, %v7015_v26 }
  0x98   :  { %v6743_v30 = vld [vmem:[#allocation5 + $0x800] sm:$0xf]  ;;  %v8699_v33 = vld [vmem:[#allocation5 + $0x90c] sm:$0xf0]  ;;  %v7144_v63 = vor.u32 %v8767_v29, %v7143_v28 }
  0x99   :  { %v6871_v32 = vld [vmem:[#allocation5 + $0x900] sm:$0xf]  ;;  %v8823_v37 = vld [vmem:[#allocation5 + $0xcec] sm:$0xf0]  ;;  %v6744_v0 = vor.u32 %v8667_v31, %v6743_v30 }
  0x9a   :  { %v7367_v36 = vld [vmem:[#allocation5 + $0xce0] sm:$0xf]  ;;  %v8855_v39 = vld [vmem:[#allocation5 + $0xdec] sm:$0xf0]  ;;  %3970 = vmatpush.bf16.msra.mxu0 %v6760_v34  ;;  %3984 = vmatpush.bf16.msra.mxu1 %v6888_v35 }
  0x9b   :  { %v7495_v38 = vld [vmem:[#allocation5 + $0xde0] sm:$0xf]  ;;  %v310_v42 = vld.sshfl [vmem:[#allocation1] sm:$0xff pattern:$0x73625140]  ;;  %v7368_v12 = vor.u32 %v8823_v37, %v7367_v36  ;;  %3998 = vmatpush.bf16.msra.mxu2 %v7016_v50  ;;  %4012 = vmatpush.bf16.msra.mxu3 %v7144_v63 }
  0x9c   :  { %v191_v40 = vld [vmem:[#allocation2 + $0xa0] sm:$0xff]  ;;  %v312_v43 = vld.sshfl [vmem:[#allocation1 + $0x10] sm:$0xff pattern:$0x73625140]  ;;  %v8731_v52 = vld [vmem:[#allocation5 + $0xa0c] sm:$0xf0]  ;;  %v9555_v57 = vpack.c.bf16 %v310_v42, %v9514_v45  ;;  %v6872_v45 = vor.u32 %v8699_v33, %v6871_v32  ;;  %v7496_v13 = vor.u32 %v8855_v39, %v7495_v38 }
  0x9d   :  { %v6999_v51 = vld [vmem:[#allocation5 + $0xa00] sm:$0xf]  ;;  %v8763_v54 = vld [vmem:[#allocation5 + $0xb0c] sm:$0xf0]  ;;  %v9558_v58 = vpack.c.bf16 %v312_v43, %v9518_v48  ;;  %306 = vst [vmem:[#allocation1 + $0x20] ss:$4 sm:$0xff] %v191_v40 }
  0x9e   :  { %v7127_v53 = vld [vmem:[#allocation5 + $0xb00] sm:$0xf]  ;;  %v313_v62 = vld.sshfl [vmem:[#allocation1 + $0x18] sm:$0xff pattern:$0x73625140]  ;;  %3916 = vmatmul.bf16.vlgmr.msrb.gmra.mxu0 %v9555_v57  ;;  %v7000_v16 = vor.u32 %v8731_v52, %v6999_v51  ;;  %3985 = vmatpush.bf16.msra.mxu1 %v6872_v45 }
  0x9f   :  { %v311_v59 = vld.sshfl [vmem:[#allocation1 + $0x8] sm:$0xff pattern:$0x73625140]  ;;  %v8887_v2 = vld [vmem:[#allocation5 + $0xeec] sm:$0xf0]  ;;  %v9564_v7 = vpack.c.bf16 %v313_v62, %v9520_v49  ;;  %3944 = vmatmul.bf16.vlgmr.msrb.gmra.mxu2 %v9558_v58  ;;  %v7128_v17 = vor.u32 %v8763_v54, %v7127_v53  ;;  %3971 = vmatpush.bf16.msra.mxu0 %v6744_v0 }
  0xa0   :  { %v7623_v1 = vld [vmem:[#allocation5 + $0xee0] sm:$0xf]  ;;  %v9561_v6 = vpack.c.bf16 %v311_v59, %v9516_v46  ;;  %v8919_v8 = vld [vmem:[#allocation5 + $0xfec] sm:$0xf0]  ;;  %3999 = vmatpush.bf16.msra.mxu2 %v7000_v16 }
  0xa1   :  { %v7751_v3 = vld [vmem:[#allocation5 + $0xfe0] sm:$0xf]  ;;  %v206_v48 = vld [vmem:[#allocation2 + $0x10c] sm:$0xff]  ;;  %3958 = vmatmul.bf16.vlgmr.msrb.gmra.mxu3 %v9564_v7  ;;  %v7624_v20 = vor.u32 %v8887_v2, %v7623_v1 }
  0xa2   :  { %v7351_v14 = vld [vmem:[#allocation5 + $0xcc0] sm:$0xf]  ;;  %v8819_v46 = vld [vmem:[#allocation5 + $0xccc] sm:$0xf0]  ;;  %3930 = vmatmul.bf16.vlgmr.msrb.gmra.mxu1 %v9561_v6  ;;  %309 = vst [vmem:[#allocation1 + $0x23] ss:$4 sm:$0xff] %v206_v48  ;;  %v7752_v21 = vor.u32 %v8919_v8, %v7751_v3  ;;  %4013 = vmatpush.bf16.msra.mxu3 %v7128_v17 }
  0xa3   :  { %v7479_v49 = vld [vmem:[#allocation5 + $0xdc0] sm:$0xf]  ;;  %v8851_v15 = vld [vmem:[#allocation5 + $0xdcc] sm:$0xf0]  ;;  %4020 = vmatpush.bf16.msrb.mxu0 %v7368_v12  ;;  %4034 = vmatpush.bf16.msrb.mxu1 %v7496_v13  ;;  %v7352_v26 = vor.u32 %v8819_v46, %v7351_v14 }
  0xa4   :  { %v7607_v24 = vld [vmem:[#allocation5 + $0xec0] sm:$0xf]  ;;  %v8883_v25 = vld [vmem:[#allocation5 + $0xecc] sm:$0xf0]  ;;  %v7480_v27 = vor.u32 %v8851_v15, %v7479_v49  ;;  %4048 = vmatpush.bf16.msrb.mxu2 %v7624_v20 }
  0xa5   :  { %v7735_v28 = vld [vmem:[#allocation5 + $0xfc0] sm:$0xf]  ;;  %v8915_v29 = vld [vmem:[#allocation5 + $0xfcc] sm:$0xf0]  ;;  %v7608_v34 = vor.u32 %v8883_v25, %v7607_v24 }
  0xa6   :  { %v7335_v30 = vld [vmem:[#allocation5 + $0xca0] sm:$0xf]  ;;  %v8815_v31 = vld [vmem:[#allocation5 + $0xcac] sm:$0xf0]  ;;  %4062 = vmatpush.bf16.msrb.mxu3 %v7752_v21  ;;  %v7736_v35 = vor.u32 %v8915_v29, %v7735_v28 }
  0xa7   :  { %v7463_v32 = vld [vmem:[#allocation5 + $0xda0] sm:$0xf]  ;;  %v8847_v33 = vld [vmem:[#allocation5 + $0xdac] sm:$0xf0]  ;;  %4021 = vmatpush.bf16.msrb.mxu0 %v7352_v26  ;;  %4035 = vmatpush.bf16.msrb.mxu1 %v7480_v27  ;;  %v7336_v37 = vor.u32 %v8815_v31, %v7335_v30 }
  0xa8   :  { %v7591_v36 = vld [vmem:[#allocation5 + $0xea0] sm:$0xf]  ;;  %v7464_v38 = vor.u32 %v8847_v33, %v7463_v32  ;;  %v8879_v39 = vld [vmem:[#allocation5 + $0xeac] sm:$0xf0]  ;;  %4049 = vmatpush.bf16.msrb.mxu2 %v7608_v34 }
  0xa9   :  { %v7719_v40 = vld [vmem:[#allocation5 + $0xfa0] sm:$0xf]  ;;  %v8911_v41 = vld [vmem:[#allocation5 + $0xfac] sm:$0xf0]  ;;  %v7592_v54 = vor.u32 %v8879_v39, %v7591_v36 }
  0xaa   :  { %v314_v42 = vld.sshfl [vmem:[#allocation1 + $0x20] sm:$0xff pattern:$0x73625140]  ;;  %v316_v43 = vld.sshfl [vmem:[#allocation1 + $0x30] sm:$0xff pattern:$0x73625140]  ;;  %4063 = vmatpush.bf16.msrb.mxu3 %v7736_v35  ;;  %v7720_v59 = vor.u32 %v8911_v41, %v7719_v40 }
  0xab   :  { %v7319_v50 = vld [vmem:[#allocation5 + $0xc80] sm:$0xf]  ;;  %v8811_v51 = vld [vmem:[#allocation5 + $0xc8c] sm:$0xf0]  ;;  %v9571_v1 = vpack.c.bf16 %v314_v42, %v9542_v4  ;;  %v9574_v2 = vpack.c.bf16 %v316_v43, %v9546_v10  ;;  %4022 = vmatpush.bf16.msrb.mxu0 %v7336_v37  ;;  %4036 = vmatpush.bf16.msrb.mxu1 %v7464_v38 }
  0xac   :  { %v315_v52 = vld.sshfl [vmem:[#allocation1 + $0x28] sm:$0xff pattern:$0x73625140]  ;;  %v317_v53 = vld.sshfl [vmem:[#allocation1 + $0x38] sm:$0xff pattern:$0x73625140]  ;;  %v7320_v12 = vor.u32 %v8811_v51, %v7319_v50  ;;  %4050 = vmatpush.bf16.msrb.mxu2 %v7592_v54 }
  0xad   :  { %v7447_v62 = vld [vmem:[#allocation5 + $0xd80] sm:$0xf]  ;;  %v8843_v63 = vld [vmem:[#allocation5 + $0xd8c] sm:$0xf0]  ;;  %v9577_v9 = vpack.c.bf16 %v315_v52, %v9544_v5  ;;  %v9580_v48 = vpack.c.bf16 %v317_v53, %v9548_v11  ;;  %v192_v52 = vld [vmem:[#allocation2 + $0xa8] sm:$0xff] }
  0xae   :  { %v7575_v0 = vld [vmem:[#allocation5 + $0xe80] sm:$0xf]  ;;  %v8875_v3 = vld [vmem:[#allocation5 + $0xe8c] sm:$0xf0]  ;;  %v7448_v13 = vor.u32 %v8843_v63, %v7447_v62  ;;  %4064 = vmatpush.bf16.msrb.mxu3 %v7720_v59  ;;  %3972 = vmatmul.bf16.vlgmr.msra.gmra.mxu0 %v9571_v1  ;;  %318 = vst [vmem:[#allocation1] ss:$4 sm:$0xff] %v192_v52 }
  0xaf   :  { %v7703_v45 = vld [vmem:[#allocation5 + $0xf80] sm:$0xf]  ;;  %v8907_v8 = vld [vmem:[#allocation5 + $0xf8c] sm:$0xf0]  ;;  %v7576_v4 = vor.u32 %v8875_v3, %v7575_v0  ;;  %4000 = vmatmul.bf16.vlgmr.msra.gmra.mxu2 %v9574_v2  ;;  %4023 = vmatpush.bf16.msrb.mxu0 %v7320_v12  ;;  %v207_v3 = vld [vmem:[#allocation2 + $0x114] sm:$0xff] }
  0xb0   :  { %v7303_v14 = vld [vmem:[#allocation5 + $0xc60] sm:$0xf]  ;;  %v8807_v46 = vld [vmem:[#allocation5 + $0xc6c] sm:$0xf0]  ;;  %v7704_v10 = vor.u32 %v8907_v8, %v7703_v45  ;;  %4037 = vmatpush.bf16.msrb.mxu1 %v7448_v13  ;;  %321 = vst [vmem:[#allocation1 + $0x3] ss:$4 sm:$0xff] %v207_v3 }
  0xb1   :  { %v7431_v49 = vld [vmem:[#allocation5 + $0xd60] sm:$0xf]  ;;  %v8839_v15 = vld [vmem:[#allocation5 + $0xd6c] sm:$0xf0]  ;;  %4014 = vmatmul.bf16.vlgmr.msra.gmra.mxu3 %v9580_v48  ;;  %v7304_v11 = vor.u32 %v8807_v46, %v7303_v14  ;;  %4051 = vmatpush.bf16.msrb.mxu2 %v7576_v4 }
  0xb2   :  { %v7559_v16 = vld [vmem:[#allocation5 + $0xe60] sm:$0xf]  ;;  %v8871_v5 = vld [vmem:[#allocation5 + $0xe6c] sm:$0xf0]  ;;  %3986 = vmatmul.bf16.vlgmr.msra.gmra.mxu1 %v9577_v9  ;;  %v7432_v21 = vor.u32 %v8839_v15, %v7431_v49  ;;  %4065 = vmatpush.bf16.msrb.mxu3 %v7704_v10 }
  0xb3   :  { %v7687_v17 = vld [vmem:[#allocation5 + $0xf60] sm:$0xf]  ;;  %v8903_v20 = vld [vmem:[#allocation5 + $0xf6c] sm:$0xf0]  ;;  %v7560_v26 = vor.u32 %v8871_v5, %v7559_v16  ;;  %4024 = vmatpush.bf16.msrb.mxu0 %v7304_v11 }
  0xb4   :  { %v7287_v24 = vld [vmem:[#allocation5 + $0xc40] sm:$0xf]  ;;  %v8803_v25 = vld [vmem:[#allocation5 + $0xc4c] sm:$0xf0]  ;;  %v7688_v27 = vor.u32 %v8903_v20, %v7687_v17  ;;  %4038 = vmatpush.bf16.msrb.mxu1 %v7432_v21  ;;  %v8437_v17 = vld [vmem:[#allocation5 + $0xe4] sm:$0xf] }
  0xb5   :  { %v7415_v28 = vld [vmem:[#allocation5 + $0xd40] sm:$0xf]  ;;  %v8835_v29 = vld [vmem:[#allocation5 + $0xd4c] sm:$0xf0]  ;;  %v7288_v36 = vor.u32 %v8803_v25, %v7287_v24  ;;  %4052 = vmatpush.bf16.msrb.mxu2 %v7560_v26  ;;  %v5833_v21 = vld [vmem:[#allocation5 + $0xf0] sm:$0xf0] }
  0xb6   :  { %v7543_v30 = vld [vmem:[#allocation5 + $0xe40] sm:$0xf]  ;;  %v8867_v31 = vld [vmem:[#allocation5 + $0xe4c] sm:$0xf0]  ;;  %v7416_v37 = vor.u32 %v8835_v29, %v7415_v28  ;;  %4066 = vmatpush.bf16.msrb.mxu3 %v7688_v27  ;;  %v8469_v24 = vld [vmem:[#allocation5 + $0x1e4] sm:$0xf] }
  0xb7   :  { %v7671_v32 = vld [vmem:[#allocation5 + $0xf40] sm:$0xf]  ;;  %v8899_v33 = vld [vmem:[#allocation5 + $0xf4c] sm:$0xf0]  ;;  %v7544_v41 = vor.u32 %v8867_v31, %v7543_v30  ;;  %4025 = vmatpush.bf16.msrb.mxu0 %v7288_v36  ;;  %v5961_v25 = vld [vmem:[#allocation5 + $0x1f0] sm:$0xf0] }
  0xb8   :  { %v7271_v34 = vld [vmem:[#allocation5 + $0xc20] sm:$0xf]  ;;  %v8799_v35 = vld [vmem:[#allocation5 + $0xc2c] sm:$0xf0]  ;;  %v7672_v42 = vor.u32 %v8899_v33, %v7671_v32  ;;  %4039 = vmatpush.bf16.msrb.mxu1 %v7416_v37  ;;  %v8433_v36 = vld [vmem:[#allocation5 + $0xc4] sm:$0xf] }
  0xb9   :  { %v7399_v38 = vld [vmem:[#allocation5 + $0xd20] sm:$0xf]  ;;  %v8831_v39 = vld [vmem:[#allocation5 + $0xd2c] sm:$0xf0]  ;;  %v7272_v45 = vor.u32 %v8799_v35, %v7271_v34  ;;  %4053 = vmatpush.bf16.msrb.mxu2 %v7544_v41  ;;  %v5836_v34 = vor.u32 %v8437_v17, %v5833_v21  ;;  %v5964_v35 = vor.u32 %v8469_v24, %v5961_v25  ;;  %v5817_v37 = vld [vmem:[#allocation5 + $0xd0] sm:$0xf0] }
  0xba   :  { %v7527_v40 = vld [vmem:[#allocation5 + $0xe20] sm:$0xf]  ;;  %v8863_v43 = vld [vmem:[#allocation5 + $0xe2c] sm:$0xf0]  ;;  %v7400_v8 = vor.u32 %v8831_v39, %v7399_v38  ;;  %4067 = vmatpush.bf16.msrb.mxu3 %v7672_v42  ;;  %v8465_v38 = vld [vmem:[#allocation5 + $0x1c4] sm:$0xf] }
  0xbb   :  { %v7655_v50 = vld [vmem:[#allocation5 + $0xf20] sm:$0xf]  ;;  %v8895_v51 = vld [vmem:[#allocation5 + $0xf2c] sm:$0xf0]  ;;  %v7528_v14 = vor.u32 %v8863_v43, %v7527_v40  ;;  %4026 = vmatpush.bf16.msrb.mxu0 %v7272_v45  ;;  %v5945_v39 = vld [vmem:[#allocation5 + $0x1d0] sm:$0xf0] }
  0xbc   :  { %v197_v53 = vld [vmem:[#allocation2 + $0xcc] sm:$0xff]  ;;  %v7255_v59 = vld [vmem:[#allocation5 + $0xc00] sm:$0xf]  ;;  %v7656_v46 = vor.u32 %v8895_v51, %v7655_v50  ;;  %4040 = vmatpush.bf16.msrb.mxu1 %v7400_v8  ;;  %v5948_v3 = vor.u32 %v8465_v38, %v5945_v39  ;;  %v8457_v17 = vld [vmem:[#allocation5 + $0x184] sm:$0xf] }
  0xbd   :  { %v202_v54 = vld [vmem:[#allocation2 + $0xf0] sm:$0xff]  ;;  %v7383_v63 = vld [vmem:[#allocation5 + $0xd00] sm:$0xf]  ;;  %319 = vst [vmem:[#allocation1 + $0x1] ss:$4 sm:$0xff] %v197_v53  ;;  %4054 = vmatpush.bf16.msrb.mxu2 %v7528_v14 }
  0xbe   :  { %v8795_v62 = vld [vmem:[#allocation5 + $0xc0c] sm:$0xf0]  ;;  %v7511_v12 = vld [vmem:[#allocation5 + $0xe00] sm:$0xf]  ;;  %320 = vst [vmem:[#allocation1 + $0x2] ss:$4 sm:$0xff] %v202_v54  ;;  %4068 = vmatpush.bf16.msrb.mxu3 %v7656_v46 }
  0xbf   :  { %v8827_v0 = vld [vmem:[#allocation5 + $0xd0c] sm:$0xf0]  ;;  %v7639_v4 = vld [vmem:[#allocation5 + $0xf00] sm:$0xf]  ;;  %v7256_v20 = vor.u32 %v8795_v62, %v7255_v59  ;;  %v5820_v62 = vor.u32 %v8433_v36, %v5817_v37 }
  0xc0   :  { %v8859_v13 = vld [vmem:[#allocation5 + $0xe0c] sm:$0xf0]  ;;  %v7879_v49 = vld [vmem:[#allocation5 + $0x10e0] sm:$0xf]  ;;  %v7384_v11 = vor.u32 %v8827_v0, %v7383_v63 }
  0xc1   :  { %v8891_v10 = vld [vmem:[#allocation5 + $0xf0c] sm:$0xf0]  ;;  %v8007_v16 = vld [vmem:[#allocation5 + $0x11e0] sm:$0xf]  ;;  %v7512_v26 = vor.u32 %v8859_v13, %v7511_v12  ;;  %4027 = vmatpush.bf16.msrb.mxu0 %v7256_v20  ;;  %v8429_v12 = vld [vmem:[#allocation5 + $0xa4] sm:$0xf] }
  0xc2   :  { %v8951_v15 = vld [vmem:[#allocation5 + $0x10ec] sm:$0xf0]  ;;  %v7640_v27 = vor.u32 %v8891_v10, %v7639_v4  ;;  %v7863_v28 = vld [vmem:[#allocation5 + $0x10c0] sm:$0xf]  ;;  %4041 = vmatpush.bf16.msrb.mxu1 %v7384_v11  ;;  %v5929_v13 = vld [vmem:[#allocation5 + $0x1b0] sm:$0xf0] }
  0xc3   :  { %v8983_v5 = vld [vmem:[#allocation5 + $0x11ec] sm:$0xf0]  ;;  %v7880_v29 = vor.u32 %v8951_v15, %v7879_v49  ;;  %v7991_v32 = vld [vmem:[#allocation5 + $0x11c0] sm:$0xf]  ;;  %4055 = vmatpush.bf16.msrb.mxu2 %v7512_v26  ;;  %v5913_v20 = vld [vmem:[#allocation5 + $0x190] sm:$0xf0] }
  0xc4   :  { %v8008_v30 = vor.u32 %v8983_v5, %v8007_v16  ;;  %v8947_v31 = vld [vmem:[#allocation5 + $0x10cc] sm:$0xf0]  ;;  %4069 = vmatpush.bf16.msrb.mxu3 %v7640_v27  ;;  %v7847_v50 = vld [vmem:[#allocation5 + $0x10a0] sm:$0xf]  ;;  %v8425_v16 = vld [vmem:[#allocation5 + $0x84] sm:$0xf]  ;;  %v5916_v27 = vor.u32 %v8457_v17, %v5913_v20 }
  0xc5   :  { %v8979_v33 = vld [vmem:[#allocation5 + $0x11cc] sm:$0xf0]  ;;  %v326_v40 = vld.sshfl [vmem:[#allocation1] sm:$0xff pattern:$0x73625140]  ;;  %v7864_v42 = vor.u32 %v8947_v31, %v7863_v28  ;;  %4076 = vmatpush.bf16.msra.mxu0 %v7880_v29 }
  0xc6   :  { %v328_v41 = vld.sshfl [vmem:[#allocation1 + $0x10] sm:$0xff pattern:$0x73625140]  ;;  %v7992_v43 = vor.u32 %v8979_v33, %v7991_v32  ;;  %v8943_v51 = vld [vmem:[#allocation5 + $0x10ac] sm:$0xf0]  ;;  %4090 = vmatpush.bf16.msra.mxu1 %v8008_v30  ;;  %v9587_v52 = vpack.c.bf16 %v326_v40, %v9522_v18 }
  0xc7   :  { %v9590_v53 = vpack.c.bf16 %v328_v41, %v9526_v22  ;;  %v327_v54 = vld.sshfl [vmem:[#allocation1 + $0x8] sm:$0xff pattern:$0x73625140]  ;;  %v329_v59 = vld.sshfl [vmem:[#allocation1 + $0x18] sm:$0xff pattern:$0x73625140]  ;;  %4104 = vmatpush.bf16.msra.mxu2 %v5836_v34 }
  0xc8   :  { %4118 = vmatpush.bf16.msra.mxu3 %v5964_v35  ;;  %v9593_v63 = vpack.c.bf16 %v327_v54, %v9524_v19  ;;  %v9596_v0 = vpack.c.bf16 %v329_v59, %v9528_v23  ;;  %v7975_v45 = vld [vmem:[#allocation5 + $0x11a0] sm:$0xf]  ;;  %v8975_v8 = vld [vmem:[#allocation5 + $0x11ac] sm:$0xf0]  ;;  %4028 = vmatmul.bf16.vlgmr.msrb.gmra.mxu0 %v9587_v52  ;;  %v5801_v18 = vld [vmem:[#allocation5 + $0xb0] sm:$0xf0]  ;;  %v7848_v19 = vor.u32 %v8943_v51, %v7847_v50 }
  0xc9   :  { %4056 = vmatmul.bf16.vlgmr.msrb.gmra.mxu2 %v9590_v53  ;;  %v8461_v22 = vld [vmem:[#allocation5 + $0x1a4] sm:$0xf]  ;;  %4077 = vmatpush.bf16.msra.mxu0 %v7864_v42  ;;  %v7976_v23 = vor.u32 %v8975_v8, %v7975_v45  ;;  %v7831_v14 = vld [vmem:[#allocation5 + $0x1080] sm:$0xf]  ;;  %v8939_v46 = vld [vmem:[#allocation5 + $0x108c] sm:$0xf0]  ;;  %v5804_v4 = vor.u32 %v8429_v12, %v5801_v18 }
  0xca   :  { %4042 = vmatmul.bf16.vlgmr.msrb.gmra.mxu1 %v9593_v63  ;;  %4070 = vmatmul.bf16.vlgmr.msrb.gmra.mxu3 %v9596_v0  ;;  %v5932_v10 = vor.u32 %v8461_v22, %v5929_v13  ;;  %v7959_v49 = vld [vmem:[#allocation5 + $0x1180] sm:$0xf]  ;;  %v8971_v15 = vld [vmem:[#allocation5 + $0x118c] sm:$0xf0]  ;;  %v5785_v5 = vld [vmem:[#allocation5 + $0x90] sm:$0xf0]  ;;  %v7832_v11 = vor.u32 %v8939_v46, %v7831_v14 }
  0xcb   :  { %4091 = vmatpush.bf16.msra.mxu1 %v7992_v43  ;;  %4105 = vmatpush.bf16.msra.mxu2 %v5820_v62  ;;  %v7960_v21 = vor.u32 %v8971_v15, %v7959_v49  ;;  %v7815_v24 = vld [vmem:[#allocation5 + $0x1060] sm:$0xf]  ;;  %v8935_v25 = vld [vmem:[#allocation5 + $0x106c] sm:$0xf0]  ;;  %v5788_v26 = vor.u32 %v8425_v16, %v5785_v5  ;;  %v8421_v30 = vld [vmem:[#allocation5 + $0x64] sm:$0xf] }
  0xcc   :  { %4119 = vmatpush.bf16.msra.mxu3 %v5948_v3  ;;  %v7943_v28 = vld [vmem:[#allocation5 + $0x1160] sm:$0xf]  ;;  %v8967_v29 = vld [vmem:[#allocation5 + $0x116c] sm:$0xf0]  ;;  %v5769_v31 = vld [vmem:[#allocation5 + $0x70] sm:$0xf0]  ;;  %v7816_v36 = vor.u32 %v8935_v25, %v7815_v24 }
  0xcd   :  { %4078 = vmatpush.bf16.msra.mxu0 %v7848_v19  ;;  %v8453_v32 = vld [vmem:[#allocation5 + $0x164] sm:$0xf]  ;;  %v5897_v33 = vld [vmem:[#allocation5 + $0x170] sm:$0xf0]  ;;  %v7799_v34 = vld [vmem:[#allocation5 + $0x1040] sm:$0xf]  ;;  %v7944_v37 = vor.u32 %v8967_v29, %v7943_v28  ;;  %v5772_v41 = vor.u32 %v8421_v30, %v5769_v31 }
  0xce   :  { %v8931_v35 = vld [vmem:[#allocation5 + $0x104c] sm:$0xf0]  ;;  %v7927_v38 = vld [vmem:[#allocation5 + $0x1140] sm:$0xf]  ;;  %v8417_v40 = vld [vmem:[#allocation5 + $0x44] sm:$0xf]  ;;  %v5900_v42 = vor.u32 %v8453_v32, %v5897_v33 }
  0xcf   :  { %4092 = vmatpush.bf16.msra.mxu1 %v7976_v23  ;;  %4106 = vmatpush.bf16.msra.mxu2 %v5804_v4  ;;  %v8963_v39 = vld [vmem:[#allocation5 + $0x114c] sm:$0xf0]  ;;  %v5753_v43 = vld [vmem:[#allocation5 + $0x50] sm:$0xf0]  ;;  %v8449_v50 = vld [vmem:[#allocation5 + $0x144] sm:$0xf]  ;;  %v7800_v12 = vor.u32 %v8931_v35, %v7799_v34 }
  0xd0   :  { %4120 = vmatpush.bf16.msra.mxu3 %v5932_v10  ;;  %v5881_v51 = vld [vmem:[#allocation5 + $0x150] sm:$0xf0]  ;;  %v193_v54 = vld [vmem:[#allocation2 + $0xb0] sm:$0xf]  ;;  %v203_v62 = vld [vmem:[#allocation2 + $0xf8] sm:$0xf]  ;;  %v7928_v18 = vor.u32 %v8963_v39, %v7927_v38  ;;  %v5756_v19 = vor.u32 %v8417_v40, %v5753_v43 }
  0xd1   :  { %4079 = vmatpush.bf16.msra.mxu0 %v7832_v11  ;;  %v198_v59 = vld [vmem:[#allocation2 + $0xd4] sm:$0xf]  ;;  %v7783_v3 = vld [vmem:[#allocation5 + $0x1020] sm:$0xf]  ;;  %v8927_v45 = vld [vmem:[#allocation5 + $0x102c] sm:$0xf0]  ;;  %v5884_v23 = vor.u32 %v8449_v50, %v5881_v51 }
  0xd2   :  { %v208_v8 = vld [vmem:[#allocation2 + $0x11c] sm:$0xf]  ;;  %322 = vst [vmem:[#allocation1 + $0x20] ss:$4 sm:$0xff] %v193_v54  ;;  %v7911_v22 = vld [vmem:[#allocation5 + $0x1120] sm:$0xf]  ;;  %v7784_v15 = vor.u32 %v8927_v45, %v7783_v3 }
  0xd3   :  { %4093 = vmatpush.bf16.msra.mxu1 %v7960_v21  ;;  %4107 = vmatpush.bf16.msra.mxu2 %v5788_v26  ;;  %v8959_v13 = vld [vmem:[#allocation5 + $0x112c] sm:$0xf0]  ;;  %323 = vst [vmem:[#allocation1 + $0x21] ss:$4 sm:$0xff] %v198_v59  ;;  %v8413_v14 = vld [vmem:[#allocation5 + $0x24] sm:$0xf] }
  0xd4   :  { %4121 = vmatpush.bf16.msra.mxu3 %v5916_v27  ;;  %v5737_v46 = vld [vmem:[#allocation5 + $0x30] sm:$0xf0]  ;;  %324 = vst [vmem:[#allocation1 + $0x22] ss:$4 sm:$0xff] %v203_v62  ;;  %v8445_v4 = vld [vmem:[#allocation5 + $0x124] sm:$0xf]  ;;  %v7912_v16 = vor.u32 %v8959_v13, %v7911_v22 }
  0xd5   :  { %4080 = vmatpush.bf16.msra.mxu0 %v7816_v36  ;;  %v5865_v10 = vld [vmem:[#allocation5 + $0x130] sm:$0xf0]  ;;  %325 = vst [vmem:[#allocation1 + $0x23] ss:$4 sm:$0xff] %v208_v8  ;;  %v7767_v49 = vld [vmem:[#allocation5 + $0x1000] sm:$0xf]  ;;  %v5740_v11 = vor.u32 %v8413_v14, %v5737_v46 }
  0xd6   :  { %v8923_v5 = vld [vmem:[#allocation5 + $0x100c] sm:$0xf0]  ;;  %v7895_v17 = vld [vmem:[#allocation5 + $0x1100] sm:$0xf]  ;;  %v5868_v21 = vor.u32 %v8445_v4, %v5865_v10  ;;  %v8409_v24 = vld [vmem:[#allocation5 + $0x4] sm:$0xf] }
  0xd7   :  { %4094 = vmatpush.bf16.msra.mxu1 %v7944_v37  ;;  %4108 = vmatpush.bf16.msra.mxu2 %v5772_v41  ;;  %v8955_v20 = vld [vmem:[#allocation5 + $0x110c] sm:$0xf0]  ;;  %v5721_v25 = vld [vmem:[#allocation5 + $0x10] sm:$0xf0]  ;;  %v8441_v26 = vld [vmem:[#allocation5 + $0x104] sm:$0xf]  ;;  %v7768_v33 = vor.u32 %v8923_v5, %v7767_v49 }
  0xd8   :  { %4122 = vmatpush.bf16.msra.mxu3 %v5900_v42  ;;  %v5849_v27 = vld [vmem:[#allocation5 + $0x110] sm:$0xf0]  ;;  %v8501_v28 = vld [vmem:[#allocation5 + $0x2e4] sm:$0xf]  ;;  %v7896_v34 = vor.u32 %v8955_v20, %v7895_v17  ;;  %v5724_v38 = vor.u32 %v8409_v24, %v5721_v25 }
  0xd9   :  { %4081 = vmatpush.bf16.msra.mxu0 %v7800_v12  ;;  %v6089_v29 = vld [vmem:[#allocation5 + $0x2f0] sm:$0xf0]  ;;  %v8533_v30 = vld [vmem:[#allocation5 + $0x3e4] sm:$0xf]  ;;  %v5852_v39 = vor.u32 %v8441_v26, %v5849_v27 }
  0xda   :  { %v6217_v31 = vld [vmem:[#allocation5 + $0x3f0] sm:$0xf0]  ;;  %v8565_v32 = vld [vmem:[#allocation5 + $0x4e4] sm:$0xf]  ;;  %v6092_v42 = vor.u32 %v8501_v28, %v6089_v29 }
  0xdb   :  { %4095 = vmatpush.bf16.msra.mxu1 %v7928_v18  ;;  %4109 = vmatpush.bf16.msra.mxu2 %v5756_v19  ;;  %v6345_v35 = vld [vmem:[#allocation5 + $0x4f0] sm:$0xf0]  ;;  %v8597_v36 = vld [vmem:[#allocation5 + $0x5e4] sm:$0xf]  ;;  %v6220_v43 = vor.u32 %v8533_v30, %v6217_v31 }
  0xdc   :  { %4123 = vmatpush.bf16.msra.mxu3 %v5884_v23  ;;  %v6473_v37 = vld [vmem:[#allocation5 + $0x5f0] sm:$0xf0]  ;;  %v330_v40 = vld.sshfl [vmem:[#allocation1 + $0x20] sm:$0xff pattern:$0x73625140]  ;;  %v6348_v54 = vor.u32 %v8565_v32, %v6345_v35 }
  0xdd   :  { %4082 = vmatpush.bf16.msra.mxu0 %v7784_v15  ;;  %v331_v41 = vld.sshfl [vmem:[#allocation1 + $0x28] sm:$0xff pattern:$0x73625140]  ;;  %v6073_v51 = vld [vmem:[#allocation5 + $0x2d0] sm:$0xf0]  ;;  %v6476_v59 = vor.u32 %v8597_v36, %v6473_v37  ;;  %v9603_v8 = vpack.c.bf16 %v330_v40, %v9550_v60 }
  0xde   :  { %v8497_v50 = vld [vmem:[#allocation5 + $0x2c4] sm:$0xf]  ;;  %v6201_v3 = vld [vmem:[#allocation5 + $0x3d0] sm:$0xf0]  ;;  %v9606_v12 = vpack.c.bf16 %v331_v41, %v9552_v61 }
  0xdf   :  { %4096 = vmatpush.bf16.msra.mxu1 %v7912_v16  ;;  %4110 = vmatpush.bf16.msra.mxu2 %v5740_v11  ;;  %v8529_v62 = vld [vmem:[#allocation5 + $0x3c4] sm:$0xf]  ;;  %v6329_v18 = vld [vmem:[#allocation5 + $0x4d0] sm:$0xf0]  ;;  %v6076_v19 = vor.u32 %v8497_v50, %v6073_v51 }
  0xe0   :  { %4124 = vmatpush.bf16.msra.mxu3 %v5868_v21  ;;  %v8561_v45 = vld [vmem:[#allocation5 + $0x4c4] sm:$0xf]  ;;  %v6457_v13 = vld [vmem:[#allocation5 + $0x5d0] sm:$0xf0]  ;;  %v6204_v23 = vor.u32 %v8529_v62, %v6201_v3 }
  0xe1   :  { %4083 = vmatpush.bf16.msra.mxu0 %v7768_v33  ;;  %v8593_v22 = vld [vmem:[#allocation5 + $0x5c4] sm:$0xf]  ;;  %v6057_v46 = vld [vmem:[#allocation5 + $0x2b0] sm:$0xf0]  ;;  %v6332_v4 = vor.u32 %v8561_v45, %v6329_v18 }
  0xe2   :  { %v8493_v14 = vld [vmem:[#allocation5 + $0x2a4] sm:$0xf]  ;;  %v6460_v10 = vor.u32 %v8593_v22, %v6457_v13  ;;  %v6185_v49 = vld [vmem:[#allocation5 + $0x3b0] sm:$0xf0] }
  0xe3   :  { %4097 = vmatpush.bf16.msra.mxu1 %v7896_v34  ;;  %4111 = vmatpush.bf16.msra.mxu2 %v5724_v38  ;;  %v8525_v60 = vld [vmem:[#allocation5 + $0x3a4] sm:$0xf]  ;;  %v6313_v61 = vld [vmem:[#allocation5 + $0x4b0] sm:$0xf0]  ;;  %v6060_v17 = vor.u32 %v8493_v14, %v6057_v46 }
  0xe4   :  { %4125 = vmatpush.bf16.msra.mxu3 %v5852_v39  ;;  %v8557_v15 = vld [vmem:[#allocation5 + $0x4a4] sm:$0xf]  ;;  %4084 = vmatmul.bf16.vlgmr.msra.gmra.mxu0 %v9603_v8  ;;  %v6441_v5 = vld [vmem:[#allocation5 + $0x5b0] sm:$0xf0]  ;;  %v6188_v20 = vor.u32 %v8525_v60, %v6185_v49 }
  0xe5   :  { %4132 = vmatpush.bf16.msrb.mxu0 %v6092_v42  ;;  %v8589_v16 = vld [vmem:[#allocation5 + $0x5a4] sm:$0xf]  ;;  %v6041_v21 = vld [vmem:[#allocation5 + $0x290] sm:$0xf0]  ;;  %v6316_v24 = vor.u32 %v8557_v15, %v6313_v61 }
  0xe6   :  { %4098 = vmatmul.bf16.vlgmr.msra.gmra.mxu1 %v9606_v12  ;;  %4112 = vmatmul.bf16.vlgmr.msra.gmra.mxu2 %v9530_v44  ;;  %v8489_v11 = vld [vmem:[#allocation5 + $0x284] sm:$0xf]  ;;  %v6444_v25 = vor.u32 %v8589_v16, %v6441_v5  ;;  %v6169_v27 = vld [vmem:[#allocation5 + $0x390] sm:$0xf0] }
  0xe7   :  { %4146 = vmatpush.bf16.msrb.mxu1 %v6220_v43  ;;  %4160 = vmatpush.bf16.msrb.mxu2 %v6348_v54  ;;  %v8521_v26 = vld [vmem:[#allocation5 + $0x384] sm:$0xf]  ;;  %v6297_v29 = vld [vmem:[#allocation5 + $0x490] sm:$0xf0]  ;;  %v6044_v32 = vor.u32 %v8489_v11, %v6041_v21 }
  0xe8   :  { %4174 = vmatpush.bf16.msrb.mxu3 %v6476_v59  ;;  %v8553_v28 = vld [vmem:[#allocation5 + $0x484] sm:$0xf]  ;;  %v6425_v31 = vld [vmem:[#allocation5 + $0x590] sm:$0xf0]  ;;  %v6172_v33 = vor.u32 %v8521_v26, %v6169_v27 }
  0xe9   :  { %4126 = vmatmul.bf16.vlgmr.msra.gmra.mxu3 %v9534_v55  ;;  %4133 = vmatpush.bf16.msrb.mxu0 %v6076_v19  ;;  %v8585_v30 = vld [vmem:[#allocation5 + $0x584] sm:$0xf]  ;;  %v6025_v35 = vld [vmem:[#allocation5 + $0x270] sm:$0xf0]  ;;  %v6300_v36 = vor.u32 %v8553_v28, %v6297_v29 }
  0xea   :  { %v8485_v34 = vld [vmem:[#allocation5 + $0x264] sm:$0xf]  ;;  %v6428_v37 = vor.u32 %v8585_v30, %v6425_v31  ;;  %v6153_v39 = vld [vmem:[#allocation5 + $0x370] sm:$0xf0] }
  0xeb   :  { %4147 = vmatpush.bf16.msrb.mxu1 %v6204_v23  ;;  %4161 = vmatpush.bf16.msrb.mxu2 %v6332_v4  ;;  %v8517_v38 = vld [vmem:[#allocation5 + $0x364] sm:$0xf]  ;;  %v6281_v41 = vld [vmem:[#allocation5 + $0x470] sm:$0xf0]  ;;  %v6028_v50 = vor.u32 %v8485_v34, %v6025_v35 }
  0xec   :  { %4175 = vmatpush.bf16.msrb.mxu3 %v6460_v10  ;;  %v8549_v40 = vld [vmem:[#allocation5 + $0x464] sm:$0xf]  ;;  %v6409_v43 = vld [vmem:[#allocation5 + $0x570] sm:$0xf0]  ;;  %v6156_v51 = vor.u32 %v8517_v38, %v6153_v39 }
  0xed   :  { %4134 = vmatpush.bf16.msrb.mxu0 %v6060_v17  ;;  %v8581_v42 = vld [vmem:[#allocation5 + $0x564] sm:$0xf]  ;;  %v6009_v59 = vld [vmem:[#allocation5 + $0x250] sm:$0xf0]  ;;  %v6284_v62 = vor.u32 %v8549_v40, %v6281_v41 }
  0xee   :  { %v8481_v54 = vld [vmem:[#allocation5 + $0x244] sm:$0xf]  ;;  %v6412_v3 = vor.u32 %v8581_v42, %v6409_v43  ;;  %v6137_v18 = vld [vmem:[#allocation5 + $0x350] sm:$0xf0] }
  0xef   :  { %4148 = vmatpush.bf16.msrb.mxu1 %v6188_v20  ;;  %4162 = vmatpush.bf16.msrb.mxu2 %v6316_v24  ;;  %v8513_v45 = vld [vmem:[#allocation5 + $0x344] sm:$0xf]  ;;  %v6265_v13 = vld [vmem:[#allocation5 + $0x450] sm:$0xf0]  ;;  %v6012_v14 = vor.u32 %v8481_v54, %v6009_v59  ;;  %v9612_v54 = vld [vmem:[#allocation7] sm:$0xf] }
  0xf0   :  { %4176 = vmatpush.bf16.msrb.mxu3 %v6444_v25  ;;  %v8545_v22 = vld [vmem:[#allocation5 + $0x444] sm:$0xf]  ;;  %v6393_v23 = vld [vmem:[#allocation5 + $0x550] sm:$0xf0]  ;;  %v6140_v46 = vor.u32 %v8513_v45, %v6137_v18 }
  0xf1   :  { %4135 = vmatpush.bf16.msrb.mxu0 %v6044_v32  ;;  %v8577_v19 = vld [vmem:[#allocation5 + $0x544] sm:$0xf]  ;;  %v5993_v10 = vld [vmem:[#allocation5 + $0x230] sm:$0xf0]  ;;  %v6268_v60 = vor.u32 %v8545_v22, %v6265_v13 }
  0xf2   :  { %v8477_v4 = vld [vmem:[#allocation5 + $0x224] sm:$0xf]  ;;  %v6396_v49 = vor.u32 %v8577_v19, %v6393_v23  ;;  %v6121_v61 = vld [vmem:[#allocation5 + $0x330] sm:$0xf0] }
  0xf3   :  { %4149 = vmatpush.bf16.msrb.mxu1 %v6172_v33  ;;  %4163 = vmatpush.bf16.msrb.mxu2 %v6300_v36  ;;  %v8509_v15 = vld [vmem:[#allocation5 + $0x324] sm:$0xf]  ;;  %v6249_v5 = vld [vmem:[#allocation5 + $0x430] sm:$0xf0]  ;;  %v5996_v21 = vor.u32 %v8477_v4, %v5993_v10  ;;  %v9929_v10 = vperm.slane %v9612_v54, 0 }
  0xf4   :  { %4177 = vmatpush.bf16.msrb.mxu3 %v6428_v37  ;;  %v8541_v16 = vld [vmem:[#allocation5 + $0x424] sm:$0xf]  ;;  %v6377_v20 = vld [vmem:[#allocation5 + $0x530] sm:$0xf0]  ;;  %v6124_v24 = vor.u32 %v8509_v15, %v6121_v61 }
  0xf5   :  { %4136 = vmatpush.bf16.msrb.mxu0 %v6028_v50  ;;  %v8573_v17 = vld [vmem:[#allocation5 + $0x524] sm:$0xf]  ;;  %v5977_v25 = vld [vmem:[#allocation5 + $0x210] sm:$0xf0]  ;;  %v6252_v28 = vor.u32 %v8541_v16, %v6249_v5 }
  0xf6   :  { %v8473_v11 = vld [vmem:[#allocation5 + $0x204] sm:$0xf]  ;;  %v6105_v27 = vld [vmem:[#allocation5 + $0x310] sm:$0xf0]  ;;  %v6380_v29 = vor.u32 %v8573_v17, %v6377_v20 }
  0xf7   :  { %4150 = vmatpush.bf16.msrb.mxu1 %v6156_v51  ;;  %4164 = vmatpush.bf16.msrb.mxu2 %v6284_v62  ;;  %v8505_v26 = vld [vmem:[#allocation5 + $0x304] sm:$0xf]  ;;  %v6233_v31 = vld [vmem:[#allocation5 + $0x410] sm:$0xf0]  ;;  %v5980_v39 = vor.u32 %v8473_v11, %v5977_v25 }
  0xf8   :  { %4178 = vmatpush.bf16.msrb.mxu3 %v6412_v3  ;;  %v8537_v30 = vld [vmem:[#allocation5 + $0x404] sm:$0xf]  ;;  %v6361_v33 = vld [vmem:[#allocation5 + $0x510] sm:$0xf0]  ;;  %v6108_v40 = vor.u32 %v8505_v26, %v6105_v27 }
  0xf9   :  { %4137 = vmatpush.bf16.msrb.mxu0 %v6012_v14  ;;  %v8569_v32 = vld [vmem:[#allocation5 + $0x504] sm:$0xf]  ;;  %v6601_v35 = vld [vmem:[#allocation5 + $0x6f0] sm:$0xf0]  ;;  %v6236_v50 = vor.u32 %v8537_v30, %v6233_v31 }
  0xfa   :  { %v8629_v34 = vld [vmem:[#allocation5 + $0x6e4] sm:$0xf]  ;;  %v6729_v37 = vld [vmem:[#allocation5 + $0x7f0] sm:$0xf0]  ;;  %v6364_v51 = vor.u32 %v8569_v32, %v6361_v33 }
  0xfb   :  { %4151 = vmatpush.bf16.msrb.mxu1 %v6140_v46  ;;  %4165 = vmatpush.bf16.msrb.mxu2 %v6268_v60  ;;  %v8661_v36 = vld [vmem:[#allocation5 + $0x7e4] sm:$0xf]  ;;  %v6857_v41 = vld [vmem:[#allocation5 + $0x8f0] sm:$0xf0]  ;;  %v6604_v59 = vor.u32 %v8629_v34, %v6601_v35 }
  0xfc   :  { %4179 = vmatpush.bf16.msrb.mxu3 %v6396_v49  ;;  %v8693_v38 = vld [vmem:[#allocation5 + $0x8e4] sm:$0xf]  ;;  %v6985_v43 = vld [vmem:[#allocation5 + $0x9f0] sm:$0xf0]  ;;  %v6732_v62 = vor.u32 %v8661_v36, %v6729_v37 }
  0xfd   :  { %4138 = vmatpush.bf16.msrb.mxu0 %v5996_v21  ;;  %v8725_v42 = vld [vmem:[#allocation5 + $0x9e4] sm:$0xf]  ;;  %v6585_v45 = vld [vmem:[#allocation5 + $0x6d0] sm:$0xf0]  ;;  %v6860_v18 = vor.u32 %v8693_v38, %v6857_v41  ;;  %v3861_v21 = vpop.f32.mrf.mxu0 }
  0xfe   :  { %v8625_v3 = vld [vmem:[#allocation5 + $0x6c4] sm:$0xf]  ;;  %v6988_v22 = vor.u32 %v8725_v42, %v6985_v43  ;;  %v6713_v19 = vld [vmem:[#allocation5 + $0x7d0] sm:$0xf0]  ;;  %v3862_v27 = vadd.f32 %v3861_v21, %v9929_v10  ;;  %v8468_v10 = vld [vmem:[#allocation5 + $0x1d4] sm:$0xf0] }
  0xff   :  { %4152 = vmatpush.bf16.msrb.mxu1 %v6124_v24  ;;  %4166 = vmatpush.bf16.msrb.mxu2 %v6252_v28  ;;  %v8657_v13 = vld [vmem:[#allocation5 + $0x7c4] sm:$0xf]  ;;  %v6841_v14 = vld [vmem:[#allocation5 + $0x8d0] sm:$0xf0]  ;;  %v6588_v60 = vor.u32 %v8625_v3, %v6585_v45  ;;  %v3875_v28 = vpop.f32.mrf.mxu1 }
 0x100   :  { %4180 = vmatpush.bf16.msrb.mxu3 %v6380_v29  ;;  %v8689_v23 = vld [vmem:[#allocation5 + $0x8c4] sm:$0xf]  ;;  %v6969_v4 = vld [vmem:[#allocation5 + $0x9d0] sm:$0xf0]  ;;  %v6716_v49 = vor.u32 %v8657_v13, %v6713_v19  ;;  %v3876_v33 = vadd.f32 %v3875_v28, %v3862_v27 }
 0x101   :  { %4139 = vmatpush.bf16.msrb.mxu0 %v5980_v39  ;;  %v8721_v46 = vld [vmem:[#allocation5 + $0x9c4] sm:$0xf]  ;;  %v6569_v61 = vld [vmem:[#allocation5 + $0x6b0] sm:$0xf0]  ;;  %v6844_v16 = vor.u32 %v8689_v23, %v6841_v14 }
 0x102   :  { %v8621_v15 = vld [vmem:[#allocation5 + $0x6a4] sm:$0xf]  ;;  %v6972_v5 = vor.u32 %v8721_v46, %v6969_v4  ;;  %v6697_v20 = vld [vmem:[#allocation5 + $0x7b0] sm:$0xf0] }
 0x103   :  { %4153 = vmatpush.bf16.msrb.mxu1 %v6108_v40  ;;  %4167 = vmatpush.bf16.msrb.mxu2 %v6236_v50  ;;  %v8653_v17 = vld [vmem:[#allocation5 + $0x7a4] sm:$0xf]  ;;  %v6825_v24 = vld [vmem:[#allocation5 + $0x8b0] sm:$0xf0]  ;;  %v6572_v29 = vor.u32 %v8621_v15, %v6569_v61  ;;  %v3889_v42 = vpop.f32.mrf.mxu2 }
 0x104   :  { %4181 = vmatpush.bf16.msrb.mxu3 %v6364_v51  ;;  %v8685_v11 = vld [vmem:[#allocation5 + $0x8a4] sm:$0xf]  ;;  %4140 = vmatmul.bf16.vlgmr.msrb.gmra.mxu0 %v9532_v47  ;;  %v6953_v26 = vld [vmem:[#allocation5 + $0x9b0] sm:$0xf0]  ;;  %v6700_v30 = vor.u32 %v8653_v17, %v6697_v20  ;;  %v3903_v19 = vpop.f32.mrf.mxu3 }
 0x105   :  { %4188 = vmatpush.bf16.msra.mxu0 %v6604_v59  ;;  %v8717_v25 = vld [vmem:[#allocation5 + $0x9a4] sm:$0xf]  ;;  %v6553_v32 = vld [vmem:[#allocation5 + $0x690] sm:$0xf0]  ;;  %v6828_v34 = vor.u32 %v8685_v11, %v6825_v24 }
 0x106   :  { %4168 = vmatmul.bf16.vlgmr.msrb.gmra.mxu2 %v9555_v57  ;;  %4154 = vmatmul.bf16.vlgmr.msrb.gmra.mxu1 %v9536_v56  ;;  %v8617_v31 = vld [vmem:[#allocation5 + $0x684] sm:$0xf]  ;;  %v6956_v35 = vor.u32 %v8717_v25, %v6953_v26  ;;  %v6681_v37 = vld [vmem:[#allocation5 + $0x790] sm:$0xf0] }
 0x107   :  { %4202 = vmatpush.bf16.msra.mxu1 %v6732_v62  ;;  %4216 = vmatpush.bf16.msra.mxu2 %v6860_v18  ;;  %v8649_v36 = vld [vmem:[#allocation5 + $0x784] sm:$0xf]  ;;  %v6809_v39 = vld [vmem:[#allocation5 + $0x890] sm:$0xf0]  ;;  %v6556_v43 = vor.u32 %v8617_v31, %v6553_v32  ;;  %v3890_v62 = vadd.f32 %v3889_v42, %v3876_v33 }
 0x108   :  { %4230 = vmatpush.bf16.msra.mxu3 %v6988_v22  ;;  %v8681_v38 = vld [vmem:[#allocation5 + $0x884] sm:$0xf]  ;;  %v6937_v41 = vld [vmem:[#allocation5 + $0x990] sm:$0xf0]  ;;  %v6684_v50 = vor.u32 %v8649_v36, %v6681_v37 }
 0x109   :  { %4182 = vmatmul.bf16.vlgmr.msrb.gmra.mxu3 %v9561_v6  ;;  %4189 = vmatpush.bf16.msra.mxu0 %v6588_v60  ;;  %v8713_v40 = vld [vmem:[#allocation5 + $0x984] sm:$0xf]  ;;  %v6537_v59 = vld [vmem:[#allocation5 + $0x670] sm:$0xf0]  ;;  %v6812_v3 = vor.u32 %v8681_v38, %v6809_v39  ;;  %v9621_v4 = vadd.f32 %v3903_v19, %v3890_v62  ;;  %v9623_v38 = vpop.f32.mrf.mxu0 }
 0x10a   :  { %v8613_v51 = vld [vmem:[#allocation5 + $0x664] sm:$0xf]  ;;  %v6940_v45 = vor.u32 %v8713_v40, %v6937_v41  ;;  %v6665_v22 = vld [vmem:[#allocation5 + $0x770] sm:$0xf0]  ;;  %v9625_v40 = vpop.f32.mrf.mxu1 }
 0x10b   :  { %4203 = vmatpush.bf16.msra.mxu1 %v6716_v49  ;;  %4217 = vmatpush.bf16.msra.mxu2 %v6844_v16  ;;  %v8645_v18 = vld [vmem:[#allocation5 + $0x764] sm:$0xf]  ;;  %v6793_v23 = vld [vmem:[#allocation5 + $0x870] sm:$0xf0]  ;;  %v6540_v60 = vor.u32 %v8613_v51, %v6537_v59 }
 0x10c   :  { %4231 = vmatpush.bf16.msra.mxu3 %v6972_v5  ;;  %v8677_v13 = vld [vmem:[#allocation5 + $0x864] sm:$0xf]  ;;  %v6921_v46 = vld [vmem:[#allocation5 + $0x970] sm:$0xf0]  ;;  %v6668_v49 = vor.u32 %v8645_v18, %v6665_v22 }
 0x10d   :  { %4190 = vmatpush.bf16.msra.mxu0 %v6572_v29  ;;  %v8709_v14 = vld [vmem:[#allocation5 + $0x964] sm:$0xf]  ;;  %v6521_v61 = vld [vmem:[#allocation5 + $0x650] sm:$0xf0]  ;;  %v6796_v16 = vor.u32 %v8677_v13, %v6793_v23 }
 0x10e   :  { %v8609_v15 = vld [vmem:[#allocation5 + $0x644] sm:$0xf]  ;;  %v6924_v5 = vor.u32 %v8709_v14, %v6921_v46  ;;  %v6649_v20 = vld [vmem:[#allocation5 + $0x750] sm:$0xf0] }
 0x10f   :  { %4204 = vmatpush.bf16.msra.mxu1 %v6700_v30  ;;  %4218 = vmatpush.bf16.msra.mxu2 %v6828_v34  ;;  %v8641_v17 = vld [vmem:[#allocation5 + $0x744] sm:$0xf]  ;;  %v6777_v21 = vld [vmem:[#allocation5 + $0x850] sm:$0xf0]  ;;  %v6524_v26 = vor.u32 %v8609_v15, %v6521_v61 }
 0x110   :  { %4232 = vmatpush.bf16.msra.mxu3 %v6956_v35  ;;  %v8673_v11 = vld [vmem:[#allocation5 + $0x844] sm:$0xf]  ;;  %v6905_v25 = vld [vmem:[#allocation5 + $0x950] sm:$0xf0]  ;;  %v6652_v27 = vor.u32 %v8641_v17, %v6649_v20 }
 0x111   :  { %4191 = vmatpush.bf16.msra.mxu0 %v6556_v43  ;;  %v8705_v24 = vld [vmem:[#allocation5 + $0x944] sm:$0xf]  ;;  %v6505_v29 = vld [vmem:[#allocation5 + $0x630] sm:$0xf0]  ;;  %v6780_v30 = vor.u32 %v8673_v11, %v6777_v21  ;;  %v9629_v11 = vpop.f32.mrf.mxu3 }
 0x112   :  { %v8605_v28 = vld [vmem:[#allocation5 + $0x624] sm:$0xf]  ;;  %v6908_v31 = vor.u32 %v8705_v24, %v6905_v25  ;;  %v6633_v33 = vld [vmem:[#allocation5 + $0x730] sm:$0xf0] }
 0x113   :  { %4205 = vmatpush.bf16.msra.mxu1 %v6684_v50  ;;  %4219 = vmatpush.bf16.msra.mxu2 %v6812_v3  ;;  %v8637_v32 = vld [vmem:[#allocation5 + $0x724] sm:$0xf]  ;;  %v6761_v35 = vld [vmem:[#allocation5 + $0x830] sm:$0xf0]  ;;  %v6508_v41 = vor.u32 %v8605_v28, %v6505_v29 }
 0x114   :  { %4233 = vmatpush.bf16.msra.mxu3 %v6940_v45  ;;  %v8669_v34 = vld [vmem:[#allocation5 + $0x824] sm:$0xf]  ;;  %v6889_v37 = vld [vmem:[#allocation5 + $0x930] sm:$0xf0]  ;;  %v6636_v42 = vor.u32 %v8637_v32, %v6633_v33 }
 0x115   :  { %4192 = vmatpush.bf16.msra.mxu0 %v6540_v60  ;;  %v8701_v36 = vld [vmem:[#allocation5 + $0x924] sm:$0xf]  ;;  %v6489_v43 = vld [vmem:[#allocation5 + $0x610] sm:$0xf0]  ;;  %v6764_v59 = vor.u32 %v8669_v34, %v6761_v35 }
 0x116   :  { %v8601_v39 = vld [vmem:[#allocation5 + $0x604] sm:$0xf]  ;;  %v6617_v51 = vld [vmem:[#allocation5 + $0x710] sm:$0xf0]  ;;  %v6892_v62 = vor.u32 %v8701_v36, %v6889_v37 }
 0x117   :  { %4206 = vmatpush.bf16.msra.mxu1 %v6668_v49  ;;  %4220 = vmatpush.bf16.msra.mxu2 %v6796_v16  ;;  %v8633_v50 = vld [vmem:[#allocation5 + $0x704] sm:$0xf]  ;;  %v6745_v45 = vld [vmem:[#allocation5 + $0x810] sm:$0xf0]  ;;  %v6492_v60 = vor.u32 %v8601_v39, %v6489_v43 }
 0x118   :  { %4234 = vmatpush.bf16.msra.mxu3 %v6924_v5  ;;  %v8665_v3 = vld [vmem:[#allocation5 + $0x804] sm:$0xf]  ;;  %v6873_v22 = vld [vmem:[#allocation5 + $0x910] sm:$0xf0]  ;;  %v6620_v49 = vor.u32 %v8633_v50, %v6617_v51  ;;  %v9627_v5 = vpop.f32.mrf.mxu2 }
 0x119   :  { %4193 = vmatpush.bf16.msra.mxu0 %v6524_v26  ;;  %v8697_v18 = vld [vmem:[#allocation5 + $0x904] sm:$0xf]  ;;  %v7113_v19 = vld [vmem:[#allocation5 + $0xaf0] sm:$0xf0]  ;;  %v6748_v17 = vor.u32 %v8665_v3, %v6745_v45 }
 0x11a   :  { %v8757_v13 = vld [vmem:[#allocation5 + $0xae4] sm:$0xf]  ;;  %v7241_v14 = vld [vmem:[#allocation5 + $0xbf0] sm:$0xf0]  ;;  %v6876_v20 = vor.u32 %v8697_v18, %v6873_v22 }
 0x11b   :  { %4207 = vmatpush.bf16.msra.mxu1 %v6652_v27  ;;  %4221 = vmatpush.bf16.msra.mxu2 %v6780_v30  ;;  %v8789_v23 = vld [vmem:[#allocation5 + $0xbe4] sm:$0xf]  ;;  %v7369_v15 = vld [vmem:[#allocation5 + $0xcf0] sm:$0xf0]  ;;  %v7116_v21 = vor.u32 %v8757_v13, %v7113_v19  ;;  %v3917_v35 = vpop.f32.mrf.mxu0 }
 0x11c   :  { %4235 = vmatpush.bf16.msra.mxu3 %v6908_v31  ;;  %v8821_v46 = vld [vmem:[#allocation5 + $0xce4] sm:$0xf]  ;;  %v7497_v16 = vld [vmem:[#allocation5 + $0xdf0] sm:$0xf0]  ;;  %v7244_v24 = vor.u32 %v8789_v23, %v7241_v14  ;;  %v3918_v36 = vadd.f32 %v3917_v35, %v9621_v4 }
 0x11d   :  { %4194 = vmatpush.bf16.msra.mxu0 %v6508_v41  ;;  %v8853_v61 = vld [vmem:[#allocation5 + $0xde4] sm:$0xf]  ;;  %v7097_v26 = vld [vmem:[#allocation5 + $0xad0] sm:$0xf0]  ;;  %v7372_v27 = vor.u32 %v8821_v46, %v7369_v15 }
 0x11e   :  { %v8753_v25 = vld [vmem:[#allocation5 + $0xac4] sm:$0xf]  ;;  %v7500_v28 = vor.u32 %v8853_v61, %v7497_v16  ;;  %v7225_v30 = vld [vmem:[#allocation5 + $0xbd0] sm:$0xf0] }
 0x11f   :  { %4208 = vmatpush.bf16.msra.mxu1 %v6636_v42  ;;  %4222 = vmatpush.bf16.msra.mxu2 %v6764_v59  ;;  %v8785_v29 = vld [vmem:[#allocation5 + $0xbc4] sm:$0xf]  ;;  %v7353_v32 = vld [vmem:[#allocation5 + $0xcd0] sm:$0xf0]  ;;  %v3931_v37 = vpop.f32.mrf.mxu1  ;;  %v7100_v39 = vor.u32 %v8753_v25, %v7097_v26 }
 0x120   :  { %4236 = vmatpush.bf16.msra.mxu3 %v6892_v62  ;;  %v8817_v31 = vld [vmem:[#allocation5 + $0xcc4] sm:$0xf]  ;;  %v7481_v34 = vld [vmem:[#allocation5 + $0xdd0] sm:$0xf0]  ;;  %v7228_v41 = vor.u32 %v8785_v29, %v7225_v30  ;;  %v3932_v45 = vadd.f32 %v3931_v37, %v3918_v36 }
 0x121   :  { %4195 = vmatpush.bf16.msra.mxu0 %v6492_v60  ;;  %v8849_v33 = vld [vmem:[#allocation5 + $0xdc4] sm:$0xf]  ;;  %v7081_v43 = vld [vmem:[#allocation5 + $0xab0] sm:$0xf0]  ;;  %v7356_v50 = vor.u32 %v8817_v31, %v7353_v32 }
 0x122   :  { %v8749_v42 = vld [vmem:[#allocation5 + $0xaa4] sm:$0xf]  ;;  %v7484_v51 = vor.u32 %v8849_v33, %v7481_v34  ;;  %v7209_v62 = vld [vmem:[#allocation5 + $0xbb0] sm:$0xf0]  ;;  %v3945_v46 = vpop.f32.mrf.mxu2 }
 0x123   :  { %4209 = vmatpush.bf16.msra.mxu1 %v6620_v49  ;;  %4223 = vmatpush.bf16.msra.mxu2 %v6748_v17  ;;  %v8781_v59 = vld [vmem:[#allocation5 + $0xba4] sm:$0xf]  ;;  %v7337_v4 = vld [vmem:[#allocation5 + $0xcb0] sm:$0xf0]  ;;  %v7084_v13 = vor.u32 %v8749_v42, %v7081_v43  ;;  %v3946_v17 = vadd.f32 %v3945_v46, %v3932_v45  ;;  %v9636_v26 = vpop.f32.mrf.mxu0 }
 0x124   :  { %4237 = vmatpush.bf16.msra.mxu3 %v6876_v20  ;;  %v8813_v3 = vld [vmem:[#allocation5 + $0xca4] sm:$0xf]  ;;  %4196 = vmatmul.bf16.vlgmr.msra.gmra.mxu0 %v9558_v58  ;;  %v7465_v22 = vld [vmem:[#allocation5 + $0xdb0] sm:$0xf0]  ;;  %v7212_v19 = vor.u32 %v8781_v59, %v7209_v62  ;;  %v3959_v20 = vpop.f32.mrf.mxu3  ;;  %9931 = vst [vmem:[#allocation28_spill] sm:$0xff] %v9636_v26 }
 0x125   :  { %4244 = vmatpush.bf16.msrb.mxu0 %v7116_v21  ;;  %v8845_v18 = vld [vmem:[#allocation5 + $0xda4] sm:$0xf]  ;;  %v7065_v14 = vld [vmem:[#allocation5 + $0xa90] sm:$0xf0]  ;;  %v7340_v60 = vor.u32 %v8813_v3, %v7337_v4  ;;  %v7615_v26 = vld [vmem:[#allocation5 + $0xec8] sm:$0xf] }
 0x126   :  { %4224 = vmatmul.bf16.vlgmr.msra.gmra.mxu2 %v9571_v1  ;;  %4210 = vmatmul.bf16.vlgmr.msra.gmra.mxu1 %v9564_v7  ;;  %v8745_v23 = vld [vmem:[#allocation5 + $0xa84] sm:$0xf]  ;;  %v7468_v49 = vor.u32 %v8845_v18, %v7465_v22  ;;  %v7193_v61 = vld [vmem:[#allocation5 + $0xb90] sm:$0xf0] }
 0x127   :  { %4258 = vmatpush.bf16.msrb.mxu1 %v7244_v24  ;;  %4272 = vmatpush.bf16.msrb.mxu2 %v7372_v27  ;;  %v8777_v15 = vld [vmem:[#allocation5 + $0xb84] sm:$0xf]  ;;  %v7321_v21 = vld [vmem:[#allocation5 + $0xc90] sm:$0xf0]  ;;  %v3960_v27 = vadd.f32 %v3959_v20, %v3946_v17  ;;  %v7068_v29 = vor.u32 %v8745_v23, %v7065_v14 }
 0x128   :  { %4286 = vmatpush.bf16.msrb.mxu3 %v7500_v28  ;;  %v8809_v16 = vld [vmem:[#allocation5 + $0xc84] sm:$0xf]  ;;  %v7449_v25 = vld [vmem:[#allocation5 + $0xd90] sm:$0xf0]  ;;  %v9638_v28 = vpop.f32.mrf.mxu1  ;;  %v7196_v30 = vor.u32 %v8777_v15, %v7193_v61 }
 0x129   :  { %4238 = vmatmul.bf16.vlgmr.msra.gmra.mxu3 %v9577_v9  ;;  %4245 = vmatpush.bf16.msrb.mxu0 %v7100_v39  ;;  %v8841_v24 = vld [vmem:[#allocation5 + $0xd84] sm:$0xf]  ;;  %9932 = vst [vmem:[#allocation29_spill] sm:$0xff] %v9638_v28  ;;  %v7049_v32 = vld [vmem:[#allocation5 + $0xa70] sm:$0xf0]  ;;  %v7324_v33 = vor.u32 %v8809_v16, %v7321_v21 }
 0x12a   :  { %v8741_v31 = vld [vmem:[#allocation5 + $0xa64] sm:$0xf]  ;;  %v7452_v34 = vor.u32 %v8841_v24, %v7449_v25  ;;  %v7177_v36 = vld [vmem:[#allocation5 + $0xb70] sm:$0xf0]  ;;  %v9640_v62 = vpop.f32.mrf.mxu2  ;;  %v8852_v28 = vld [vmem:[#allocation5 + $0xdd4] sm:$0xf0] }
 0x12b   :  { %4259 = vmatpush.bf16.msrb.mxu1 %v7228_v41  ;;  %4273 = vmatpush.bf16.msrb.mxu2 %v7356_v50  ;;  %v8773_v35 = vld [vmem:[#allocation5 + $0xb64] sm:$0xf]  ;;  %v7305_v39 = vld [vmem:[#allocation5 + $0xc70] sm:$0xf0]  ;;  %v7052_v43 = vor.u32 %v8741_v31, %v7049_v32  ;;  %9933 = vst [vmem:[#allocation30_spill] sm:$0xff] %v9640_v62  ;;  %v3973_v46 = vpop.f32.mrf.mxu0 }
 0x12c   :  { %4287 = vmatpush.bf16.msrb.mxu3 %v7484_v51  ;;  %v8805_v37 = vld [vmem:[#allocation5 + $0xc64] sm:$0xf]  ;;  %v7433_v42 = vld [vmem:[#allocation5 + $0xd70] sm:$0xf0]  ;;  %v7180_v50 = vor.u32 %v8773_v35, %v7177_v36  ;;  %v7487_v62 = vld [vmem:[#allocation5 + $0xdc8] sm:$0xf] }
 0x12d   :  { %4246 = vmatpush.bf16.msrb.mxu0 %v7084_v13  ;;  %v8837_v41 = vld [vmem:[#allocation5 + $0xd64] sm:$0xf]  ;;  %v7033_v59 = vld [vmem:[#allocation5 + $0xa50] sm:$0xf0]  ;;  %v7308_v3 = vor.u32 %v8805_v37, %v7305_v39  ;;  %v9642_v13 = vpop.f32.mrf.mxu3 }
 0x12e   :  { %v8737_v51 = vld [vmem:[#allocation5 + $0xa44] sm:$0xf]  ;;  %v7436_v45 = vor.u32 %v8837_v41, %v7433_v42  ;;  %v7161_v18 = vld [vmem:[#allocation5 + $0xb50] sm:$0xf0]  ;;  %9934 = vst [vmem:[#allocation31_spill] sm:$0xff] %v9642_v13 }
 0x12f   :  { %4260 = vmatpush.bf16.msrb.mxu1 %v7212_v19  ;;  %4274 = vmatpush.bf16.msrb.mxu2 %v7340_v60  ;;  %v8769_v4 = vld [vmem:[#allocation5 + $0xb44] sm:$0xf]  ;;  %v7289_v19 = vld [vmem:[#allocation5 + $0xc50] sm:$0xf0]  ;;  %v3974_v60 = vadd.f32 %v3973_v46, %v3960_v27  ;;  %v7036_v15 = vor.u32 %v8737_v51, %v7033_v59 }
 0x130   :  { %4288 = vmatpush.bf16.msrb.mxu3 %v7468_v49  ;;  %v8801_v22 = vld [vmem:[#allocation5 + $0xc44] sm:$0xf]  ;;  %v7417_v14 = vld [vmem:[#allocation5 + $0xd50] sm:$0xf0]  ;;  %v3987_v49 = vpop.f32.mrf.mxu1  ;;  %v7164_v61 = vor.u32 %v8769_v4, %v7161_v18 }
 0x131   :  { %4247 = vmatpush.bf16.msrb.mxu0 %v7068_v29  ;;  %v8833_v23 = vld [vmem:[#allocation5 + $0xd44] sm:$0xf]  ;;  %v7017_v17 = vld [vmem:[#allocation5 + $0xa30] sm:$0xf0]  ;;  %v7292_v20 = vor.u32 %v8801_v22, %v7289_v19 }
 0x132   :  { %v8733_v16 = vld [vmem:[#allocation5 + $0xa24] sm:$0xf]  ;;  %v7420_v21 = vor.u32 %v8833_v23, %v7417_v14  ;;  %v7145_v25 = vld [vmem:[#allocation5 + $0xb30] sm:$0xf0]  ;;  %v4001_v41 = vpop.f32.mrf.mxu2 }
 0x133   :  { %4261 = vmatpush.bf16.msrb.mxu1 %v7196_v30  ;;  %4275 = vmatpush.bf16.msrb.mxu2 %v7324_v33  ;;  %v8765_v24 = vld [vmem:[#allocation5 + $0xb24] sm:$0xf]  ;;  %v3988_v30 = vadd.f32 %v3987_v49, %v3974_v60  ;;  %v7273_v31 = vld [vmem:[#allocation5 + $0xc30] sm:$0xf0]  ;;  %v7020_v27 = vor.u32 %v8733_v16, %v7017_v17 }
 0x134   :  { %4289 = vmatpush.bf16.msrb.mxu3 %v7452_v34  ;;  %v8797_v29 = vld [vmem:[#allocation5 + $0xc24] sm:$0xf]  ;;  %v7401_v33 = vld [vmem:[#allocation5 + $0xd30] sm:$0xf0]  ;;  %v7148_v35 = vor.u32 %v8765_v24, %v7145_v25 }
 0x135   :  { %4248 = vmatpush.bf16.msrb.mxu0 %v7052_v43  ;;  %v8829_v32 = vld [vmem:[#allocation5 + $0xd24] sm:$0xf]  ;;  %v7001_v36 = vld [vmem:[#allocation5 + $0xa10] sm:$0xf0]  ;;  %v7276_v42 = vor.u32 %v8797_v29, %v7273_v31 }
 0x136   :  { %v8729_v34 = vld [vmem:[#allocation5 + $0xa04] sm:$0xf]  ;;  %v7129_v39 = vld [vmem:[#allocation5 + $0xb10] sm:$0xf0]  ;;  %v7404_v43 = vor.u32 %v8829_v32, %v7401_v33 }
 0x137   :  { %4262 = vmatpush.bf16.msrb.mxu1 %v7180_v50  ;;  %4276 = vmatpush.bf16.msrb.mxu2 %v7308_v3  ;;  %v8761_v37 = vld [vmem:[#allocation5 + $0xb04] sm:$0xf]  ;;  %v7257_v51 = vld [vmem:[#allocation5 + $0xc10] sm:$0xf0]  ;;  %v4002_v3 = vadd.f32 %v4001_v41, %v3988_v30  ;;  %v7004_v60 = vor.u32 %v8729_v34, %v7001_v36  ;;  %v9646_v36 = vpop.f32.mrf.mxu0 }
 0x138   :  { %4290 = vmatpush.bf16.msrb.mxu3 %v7436_v45  ;;  %v8793_v50 = vld [vmem:[#allocation5 + $0xc04] sm:$0xf]  ;;  %v4015_v45 = vpop.f32.mrf.mxu3  ;;  %v7385_v4 = vld [vmem:[#allocation5 + $0xd10] sm:$0xf0]  ;;  %v7132_v49 = vor.u32 %v8761_v37, %v7129_v39  ;;  %9935 = vst [vmem:[#allocation32_spill] sm:$0xff] %v9646_v36  ;;  %v9648_v37 = vpop.f32.mrf.mxu1 }
 0x139   :  { %4249 = vmatpush.bf16.msrb.mxu0 %v7036_v15  ;;  %v8825_v59 = vld [vmem:[#allocation5 + $0xd04] sm:$0xf]  ;;  %v7625_v22 = vld [vmem:[#allocation5 + $0xef0] sm:$0xf0]  ;;  %v9644_v46 = vadd.f32 %v4015_v45, %v4002_v3  ;;  %v7260_v17 = vor.u32 %v8793_v50, %v7257_v51  ;;  %9936 = vst [vmem:[#allocation33_spill] sm:$0xff] %v9648_v37 }
 0x13a   :  { %v8885_v18 = vld [vmem:[#allocation5 + $0xee4] sm:$0xf]  ;;  %v7753_v23 = vld [vmem:[#allocation5 + $0xff0] sm:$0xf0]  ;;  %v8724_v37 = vld [vmem:[#allocation5 + $0x9d4] sm:$0xf0] }
 0x13b   :  { %4263 = vmatpush.bf16.msrb.mxu1 %v7164_v61  ;;  %4277 = vmatpush.bf16.msrb.mxu2 %v7292_v20  ;;  %v8917_v19 = vld [vmem:[#allocation5 + $0xfe4] sm:$0xf]  ;;  %v7881_v15 = vld [vmem:[#allocation5 + $0x10f0] sm:$0xf0]  ;;  %v7388_v20 = vor.u32 %v8825_v59, %v7385_v4  ;;  %v7103_v36 = vld [vmem:[#allocation5 + $0xac8] sm:$0xf] }
 0x13c   :  { %4291 = vmatpush.bf16.msrb.mxu3 %v7420_v21  ;;  %v8949_v14 = vld [vmem:[#allocation5 + $0x10e4] sm:$0xf]  ;;  %v8009_v16 = vld [vmem:[#allocation5 + $0x11f0] sm:$0xf0]  ;;  %v7628_v21 = vor.u32 %v8885_v18, %v7625_v22  ;;  %v7756_v24 = vor.u32 %v8917_v19, %v7753_v23 }
 0x13d   :  { %4250 = vmatpush.bf16.msrb.mxu0 %v7020_v27  ;;  %v8981_v61 = vld [vmem:[#allocation5 + $0x11e4] sm:$0xf]  ;;  %v7609_v29 = vld [vmem:[#allocation5 + $0xed0] sm:$0xf0]  ;;  %v7884_v30 = vor.u32 %v8949_v14, %v7881_v15  ;;  %v9654_v15 = vpop.f32.mrf.mxu2 }
 0x13e   :  { %v8881_v25 = vld [vmem:[#allocation5 + $0xec4] sm:$0xf]  ;;  %v8012_v31 = vor.u32 %v8981_v61, %v8009_v16  ;;  %v7737_v33 = vld [vmem:[#allocation5 + $0xfd0] sm:$0xf0]  ;;  %9937 = vst [vmem:[#allocation34_spill] sm:$0xff] %v9654_v15 }
 0x13f   :  { %4264 = vmatpush.bf16.msrb.mxu1 %v7148_v35  ;;  %4278 = vmatpush.bf16.msrb.mxu2 %v7276_v42  ;;  %v8913_v32 = vld [vmem:[#allocation5 + $0xfc4] sm:$0xf]  ;;  %v7865_v34 = vld [vmem:[#allocation5 + $0x10d0] sm:$0xf0]  ;;  %v7612_v39 = vor.u32 %v8881_v25, %v7609_v29  ;;  %v6591_v15 = vld [vmem:[#allocation5 + $0x6c8] sm:$0xf] }
 0x140   :  { %4292 = vmatpush.bf16.msrb.mxu3 %v7404_v43  ;;  %v8945_v41 = vld [vmem:[#allocation5 + $0x10c4] sm:$0xf]  ;;  %v7993_v35 = vld [vmem:[#allocation5 + $0x11d0] sm:$0xf0]  ;;  %v7740_v42 = vor.u32 %v8913_v32, %v7737_v33 }
 0x141   :  { %4251 = vmatpush.bf16.msrb.mxu0 %v7004_v60  ;;  %v8977_v27 = vld [vmem:[#allocation5 + $0x11c4] sm:$0xf]  ;;  %v7593_v50 = vld [vmem:[#allocation5 + $0xeb0] sm:$0xf0]  ;;  %v7868_v51 = vor.u32 %v8945_v41, %v7865_v34 }
 0x142   :  { %v8877_v43 = vld [vmem:[#allocation5 + $0xea4] sm:$0xf]  ;;  %v7996_v59 = vor.u32 %v8977_v27, %v7993_v35  ;;  %v7721_v45 = vld [vmem:[#allocation5 + $0xfb0] sm:$0xf0] }
 0x143   :  { %4265 = vmatpush.bf16.msrb.mxu1 %v7132_v49  ;;  %4279 = vmatpush.bf16.msrb.mxu2 %v7260_v17  ;;  %v8909_v3 = vld [vmem:[#allocation5 + $0xfa4] sm:$0xf]  ;;  %v7849_v18 = vld [vmem:[#allocation5 + $0x10b0] sm:$0xf0]  ;;  %v7596_v23 = vor.u32 %v8877_v43, %v7593_v50 }
 0x144   :  { %4293 = vmatpush.bf16.msrb.mxu3 %v7388_v20  ;;  %v8941_v4 = vld [vmem:[#allocation5 + $0x10a4] sm:$0xf]  ;;  %4252 = vmatmul.bf16.vlgmr.msrb.gmra.mxu0 %v9574_v2  ;;  %v7977_v19 = vld [vmem:[#allocation5 + $0x11b0] sm:$0xf0]  ;;  %v7724_v14 = vor.u32 %v8909_v3, %v7721_v45 }
 0x145   :  { %4300 = vmatpush.bf16.msra.mxu0 %v7628_v21  ;;  %v8973_v22 = vld [vmem:[#allocation5 + $0x11a4] sm:$0xf]  ;;  %v7577_v49 = vld [vmem:[#allocation5 + $0xe90] sm:$0xf0]  ;;  %v7852_v61 = vor.u32 %v8941_v4, %v7849_v18 }
 0x146   :  { %4280 = vmatmul.bf16.vlgmr.msrb.gmra.mxu2 %v9587_v52  ;;  %4266 = vmatmul.bf16.vlgmr.msrb.gmra.mxu1 %v9580_v48  ;;  %v8873_v60 = vld [vmem:[#allocation5 + $0xe84] sm:$0xf]  ;;  %v7980_v16 = vor.u32 %v8973_v22, %v7977_v19  ;;  %v7705_v20 = vld [vmem:[#allocation5 + $0xf90] sm:$0xf0] }
 0x147   :  { %4314 = vmatpush.bf16.msra.mxu1 %v7756_v24  ;;  %4328 = vmatpush.bf16.msra.mxu2 %v7884_v30  ;;  %v8905_v17 = vld [vmem:[#allocation5 + $0xf84] sm:$0xf]  ;;  %v9656_v24 = vpop.f32.mrf.mxu3  ;;  %v7833_v25 = vld [vmem:[#allocation5 + $0x1090] sm:$0xf0]  ;;  %v7580_v33 = vor.u32 %v8873_v60, %v7577_v49  ;;  %v4043_v34 = vpop.f32.mrf.mxu1 }
 0x148   :  { %4342 = vmatpush.bf16.msra.mxu3 %v8012_v31  ;;  %v8937_v21 = vld [vmem:[#allocation5 + $0x1084] sm:$0xf]  ;;  %9938 = vst [vmem:[#allocation35_spill] sm:$0xff] %v9656_v24  ;;  %v7961_v30 = vld [vmem:[#allocation5 + $0x1190] sm:$0xf0]  ;;  %v4029_v31 = vpop.f32.mrf.mxu0  ;;  %v7708_v41 = vor.u32 %v8905_v17, %v7705_v20 }
 0x149   :  { %4294 = vmatmul.bf16.vlgmr.msrb.gmra.mxu3 %v9593_v63  ;;  %4301 = vmatpush.bf16.msra.mxu0 %v7612_v39  ;;  %v8969_v29 = vld [vmem:[#allocation5 + $0x1184] sm:$0xf]  ;;  %v4030_v32 = vadd.f32 %v4029_v31, %v9644_v46  ;;  %v7561_v35 = vld [vmem:[#allocation5 + $0xe70] sm:$0xf0]  ;;  %v7836_v39 = vor.u32 %v8937_v21, %v7833_v25  ;;  %v6079_v24 = vld [vmem:[#allocation5 + $0x2c8] sm:$0xf] }
 0x14a   :  { %v8869_v27 = vld [vmem:[#allocation5 + $0xe64] sm:$0xf]  ;;  %v7689_v50 = vld [vmem:[#allocation5 + $0xf70] sm:$0xf0] }
 0x14b   :  { %4315 = vmatpush.bf16.msra.mxu1 %v7740_v42  ;;  %4329 = vmatpush.bf16.msra.mxu2 %v7868_v51  ;;  %v7964_v42 = vor.u32 %v8969_v29, %v7961_v30  ;;  %v8901_v43 = vld [vmem:[#allocation5 + $0xf64] sm:$0xf]  ;;  %v7817_v3 = vld [vmem:[#allocation5 + $0x1070] sm:$0xf0]  ;;  %v7564_v18 = vor.u32 %v8869_v27, %v7561_v35 }
 0x14c   :  { %4343 = vmatpush.bf16.msra.mxu3 %v7996_v59  ;;  %v8933_v51 = vld [vmem:[#allocation5 + $0x1064] sm:$0xf]  ;;  %v4044_v59 = vadd.f32 %v4043_v34, %v4030_v32  ;;  %v7945_v4 = vld [vmem:[#allocation5 + $0x1170] sm:$0xf0]  ;;  %v7692_v46 = vor.u32 %v8901_v43, %v7689_v50  ;;  %v4057_v60 = vpop.f32.mrf.mxu2 }
 0x14d   :  { %4302 = vmatpush.bf16.msra.mxu0 %v7596_v23  ;;  %v8965_v45 = vld [vmem:[#allocation5 + $0x1164] sm:$0xf]  ;;  %v7545_v19 = vld [vmem:[#allocation5 + $0xe50] sm:$0xf0]  ;;  %v7820_v23 = vor.u32 %v8933_v51, %v7817_v3 }
 0x14e   :  { %v8865_v22 = vld [vmem:[#allocation5 + $0xe44] sm:$0xf]  ;;  %v4058_v17 = vadd.f32 %v4057_v60, %v4044_v59  ;;  %v7801_v21 = vld [vmem:[#allocation5 + $0x1050] sm:$0xf0] }
 0x14f   :  { %4316 = vmatpush.bf16.msra.mxu1 %v7724_v14  ;;  %4330 = vmatpush.bf16.msra.mxu2 %v7852_v61  ;;  %v7948_v14 = vor.u32 %v8965_v45, %v7945_v4  ;;  %v8897_v49 = vld [vmem:[#allocation5 + $0xf44] sm:$0xf]  ;;  %v7673_v61 = vld [vmem:[#allocation5 + $0xf50] sm:$0xf0]  ;;  %v4071_v20 = vpop.f32.mrf.mxu3  ;;  %v7548_v31 = vor.u32 %v8865_v22, %v7545_v19 }
 0x150   :  { %4344 = vmatpush.bf16.msra.mxu3 %v7980_v16  ;;  %v8929_v16 = vld [vmem:[#allocation5 + $0x1044] sm:$0xf]  ;;  %v7929_v29 = vld [vmem:[#allocation5 + $0x1150] sm:$0xf0]  ;;  %v9659_v30 = vadd.f32 %v4071_v20, %v4058_v17  ;;  %v7676_v32 = vor.u32 %v8897_v49, %v7673_v61  ;;  %v5839_v61 = vld [vmem:[#allocation5 + $0xe8] sm:$0xf] }
 0x151   :  { %4303 = vmatpush.bf16.msra.mxu0 %v7580_v33  ;;  %v8961_v25 = vld [vmem:[#allocation5 + $0x1144] sm:$0xf]  ;;  %v7804_v34 = vor.u32 %v8929_v16, %v7801_v21  ;;  %v7785_v43 = vld [vmem:[#allocation5 + $0x1030] sm:$0xf0]  ;;  %v8440_v16 = vld [vmem:[#allocation5 + $0xf4] sm:$0xf0] }
 0x152   :  { %v8861_v33 = vld [vmem:[#allocation5 + $0xe24] sm:$0xf]  ;;  %v7932_v27 = vor.u32 %v8961_v25, %v7929_v29  ;;  %v7913_v51 = vld [vmem:[#allocation5 + $0x1130] sm:$0xf0]  ;;  %v5967_v17 = vld [vmem:[#allocation5 + $0x1e8] sm:$0xf] }
 0x153   :  { %4317 = vmatpush.bf16.msra.mxu1 %v7708_v41  ;;  %4331 = vmatpush.bf16.msra.mxu2 %v7836_v39  ;;  %v7529_v41 = vld [vmem:[#allocation5 + $0xe30] sm:$0xf0]  ;;  %v8893_v35 = vld [vmem:[#allocation5 + $0xf24] sm:$0xf]  ;;  %v8472_v20 = vld [vmem:[#allocation5 + $0x1f4] sm:$0xf0] }
 0x154   :  { %4345 = vmatpush.bf16.msra.mxu3 %v7964_v42  ;;  %v7657_v39 = vld [vmem:[#allocation5 + $0xf30] sm:$0xf0]  ;;  %v8925_v42 = vld [vmem:[#allocation5 + $0x1024] sm:$0xf]  ;;  %v7532_v3 = vor.u32 %v8861_v33, %v7529_v41  ;;  %v6095_v21 = vld [vmem:[#allocation5 + $0x2e8] sm:$0xf] }
 0x155   :  { %4304 = vmatpush.bf16.msra.mxu0 %v7564_v18  ;;  %v8957_v50 = vld [vmem:[#allocation5 + $0x1124] sm:$0xf]  ;;  %v7660_v45 = vor.u32 %v8893_v35, %v7657_v39  ;;  %v7513_v4 = vld [vmem:[#allocation5 + $0xe10] sm:$0xf0]  ;;  %v7788_v22 = vor.u32 %v8925_v42, %v7785_v43  ;;  %v8536_v33 = vld [vmem:[#allocation5 + $0x3f4] sm:$0xf0]  ;;  %v5968_v35 = vor.u32 %v8472_v20, %v5967_v17 }
 0x156   :  { %v8857_v59 = vld [vmem:[#allocation5 + $0xe04] sm:$0xf]  ;;  %v7916_v19 = vor.u32 %v8957_v50, %v7913_v51  ;;  %v7897_v49 = vld [vmem:[#allocation5 + $0x1110] sm:$0xf0]  ;;  %v5823_v39 = vld [vmem:[#allocation5 + $0xc8] sm:$0xf] }
 0x157   :  { %4318 = vmatpush.bf16.msra.mxu1 %v7692_v46  ;;  %4332 = vmatpush.bf16.msra.mxu2 %v7820_v23  ;;  %v8889_v18 = vld [vmem:[#allocation5 + $0xf04] sm:$0xf]  ;;  %v7641_v46 = vld [vmem:[#allocation5 + $0xf10] sm:$0xf0]  ;;  %v7516_v25 = vor.u32 %v8857_v59, %v7513_v4  ;;  %v8436_v42 = vld [vmem:[#allocation5 + $0xd4] sm:$0xf0]  ;;  %v9661_v4 = vpop.f32.mrf.mxu0 }
 0x158   :  { %4346 = vmatpush.bf16.msra.mxu3 %v7948_v14  ;;  %v8921_v23 = vld [vmem:[#allocation5 + $0x1004] sm:$0xf]  ;;  %v7769_v14 = vld [vmem:[#allocation5 + $0x1010] sm:$0xf0]  ;;  %v7644_v29 = vor.u32 %v8889_v18, %v7641_v46  ;;  %v5951_v51 = vld [vmem:[#allocation5 + $0x1c8] sm:$0xf]  ;;  %v9663_v18 = vpop.f32.mrf.mxu1  ;;  %v5824_v46 = vor.u32 %v8436_v42, %v5823_v39 }
 0x159   :  { %4305 = vmatpush.bf16.msra.mxu0 %v7548_v31  ;;  %v8953_v60 = vld [vmem:[#allocation5 + $0x1104] sm:$0xf]  ;;  %v8504_v31 = vld [vmem:[#allocation5 + $0x2f4] sm:$0xf0]  ;;  %v7772_v41 = vor.u32 %v8921_v23, %v7769_v14  ;;  %9939 = vst [vmem:[#allocation36_spill] sm:$0xff] %v9661_v4 }
 0x15a   :  { %v6096_v43 = vor.u32 %v8504_v31, %v6095_v21  ;;  %v8500_v59 = vld [vmem:[#allocation5 + $0x2d4] sm:$0xf0]  ;;  %9940 = vst [vmem:[#allocation37_spill] sm:$0xff] %v9663_v18  ;;  %v6191_v20 = vld [vmem:[#allocation5 + $0x3a8] sm:$0xf] }
 0x15b   :  { %4319 = vmatpush.bf16.msra.mxu1 %v7676_v32  ;;  %4333 = vmatpush.bf16.msra.mxu2 %v7804_v34  ;;  %v6223_v32 = vld [vmem:[#allocation5 + $0x3e8] sm:$0xf]  ;;  %v7900_v34 = vor.u32 %v8953_v60, %v7897_v49  ;;  %v8432_v23 = vld [vmem:[#allocation5 + $0xb4] sm:$0xf0]  ;;  %v6080_v14 = vor.u32 %v8500_v59, %v6079_v24 }
 0x15c   :  { %4347 = vmatpush.bf16.msra.mxu3 %v7932_v27  ;;  %v5840_v27 = vor.u32 %v8440_v16, %v5839_v61  ;;  %v6224_v50 = vor.u32 %v8536_v33, %v6223_v32  ;;  %v5935_v49 = vld [vmem:[#allocation5 + $0x1a8] sm:$0xf]  ;;  %v8464_v61 = vld [vmem:[#allocation5 + $0x1b4] sm:$0xf0] }
 0x15d   :  { %4306 = vmatpush.bf16.msra.mxu0 %v7532_v3  ;;  %v6207_v3 = vld [vmem:[#allocation5 + $0x3c8] sm:$0xf]  ;;  %v8496_v17 = vld [vmem:[#allocation5 + $0x2b4] sm:$0xf0] }
 0x15e   :  { %v6063_v16 = vld [vmem:[#allocation5 + $0x2a8] sm:$0xf]  ;;  %v8528_v21 = vld [vmem:[#allocation5 + $0x3b4] sm:$0xf0] }
 0x15f   :  { %4320 = vmatpush.bf16.msra.mxu1 %v7660_v45  ;;  %4334 = vmatpush.bf16.msra.mxu2 %v7788_v22  ;;  %v8532_v45 = vld [vmem:[#allocation5 + $0x3d4] sm:$0xf0]  ;;  %v5952_v22 = vor.u32 %v8468_v10, %v5951_v51  ;;  %v5791_v24 = vld [vmem:[#allocation5 + $0x88] sm:$0xf]  ;;  %v6064_v31 = vor.u32 %v8496_v17, %v6063_v16  ;;  %v6192_v32 = vor.u32 %v8528_v21, %v6191_v20  ;;  %v9671_v51 = vpop.f32.mrf.mxu3  ;;  %v9676_v21 = vld [vmem:[#allocation7] sm:$0xf] }
 0x160   :  { %4348 = vmatpush.bf16.msra.mxu3 %v7916_v19  ;;  %v5807_v19 = vld [vmem:[#allocation5 + $0xa8] sm:$0xf]  ;;  %v6208_v60 = vor.u32 %v8532_v45, %v6207_v3  ;;  %v8524_v42 = vld [vmem:[#allocation5 + $0x394] sm:$0xf0]  ;;  %9942 = vst [vmem:[#allocation39_spill] sm:$0xff] %v9671_v51 }
 0x161   :  { %4307 = vmatpush.bf16.msra.mxu0 %v7516_v25  ;;  %v5808_v10 = vor.u32 %v8432_v23, %v5807_v19  ;;  %v5936_v25 = vor.u32 %v8464_v61, %v5935_v49  ;;  %v5919_v33 = vld [vmem:[#allocation5 + $0x188] sm:$0xf]  ;;  %v8488_v16 = vld [vmem:[#allocation5 + $0x274] sm:$0xf0] }
 0x162   :  { %v6175_v39 = vld [vmem:[#allocation5 + $0x388] sm:$0xf]  ;;  %v8520_v20 = vld [vmem:[#allocation5 + $0x374] sm:$0xf0] }
 0x163   :  { %4321 = vmatpush.bf16.msra.mxu1 %v7644_v29  ;;  %4335 = vmatpush.bf16.msra.mxu2 %v7772_v41  ;;  %v8428_v29 = vld [vmem:[#allocation5 + $0x94] sm:$0xf0]  ;;  %v6176_v23 = vor.u32 %v8524_v42, %v6175_v39  ;;  %v6031_v49 = vld [vmem:[#allocation5 + $0x268] sm:$0xf] }
 0x164   :  { %4349 = vmatpush.bf16.msra.mxu3 %v7900_v34  ;;  %4308 = vmatmul.bf16.vlgmr.msra.gmra.mxu0 %v9590_v53  ;;  %v8460_v41 = vld [vmem:[#allocation5 + $0x194] sm:$0xf0]  ;;  %v6047_v34 = vld [vmem:[#allocation5 + $0x288] sm:$0xf]  ;;  %v5792_v3 = vor.u32 %v8428_v29, %v5791_v24 }
 0x165   :  { %4356 = vmatpush.bf16.msrb.mxu0 %v5840_v27  ;;  %v9669_v27 = vpop.f32.mrf.mxu2  ;;  %v5920_v45 = vor.u32 %v8460_v41, %v5919_v33  ;;  %v6159_v17 = vld [vmem:[#allocation5 + $0x368] sm:$0xf]  ;;  %v8420_v29 = vld [vmem:[#allocation5 + $0x54] sm:$0xf0] }
 0x166   :  { %4336 = vmatmul.bf16.vlgmr.msra.gmra.mxu2 %v9603_v8  ;;  %4322 = vmatmul.bf16.vlgmr.msra.gmra.mxu1 %v9596_v0  ;;  %9941 = vst [vmem:[#allocation38_spill] sm:$0xff] %v9669_v27  ;;  %v5759_v24 = vld [vmem:[#allocation5 + $0x48] sm:$0xf]  ;;  %v8452_v41 = vld [vmem:[#allocation5 + $0x154] sm:$0xf0] }
 0x167   :  { %4370 = vmatpush.bf16.msrb.mxu1 %v5968_v35  ;;  %4384 = vmatpush.bf16.msrb.mxu2 %v6096_v43  ;;  %v8492_v35 = vld [vmem:[#allocation5 + $0x294] sm:$0xf0]  ;;  %v4085_v43 = vpop.f32.mrf.mxu0  ;;  %v5887_v33 = vld [vmem:[#allocation5 + $0x148] sm:$0xf] }
 0x168   :  { %4398 = vmatpush.bf16.msrb.mxu3 %v6224_v50  ;;  %v4099_v50 = vpop.f32.mrf.mxu1  ;;  %v4086_v59 = vadd.f32 %v4085_v43, %v9659_v30  ;;  %v6048_v19 = vor.u32 %v8492_v35, %v6047_v34  ;;  %v9930_v30 = vperm.slane %v9676_v21, 1  ;;  %v6015_v34 = vld [vmem:[#allocation5 + $0x248] sm:$0xf]  ;;  %v8484_v35 = vld [vmem:[#allocation5 + $0x254] sm:$0xf0] }
 0x169   :  { %4350 = vmatmul.bf16.vlgmr.msra.gmra.mxu3 %v9606_v12  ;;  %4357 = vmatpush.bf16.msrb.mxu0 %v5824_v46  ;;  %v5775_v46 = vld [vmem:[#allocation5 + $0x68] sm:$0xf]  ;;  %v8516_v42 = vld [vmem:[#allocation5 + $0x354] sm:$0xf0] }
 0x16a   :  { %v9674_v61 = vadd.f32 %v4099_v50, %v4086_v59  ;;  %v6143_v39 = vld [vmem:[#allocation5 + $0x348] sm:$0xf]  ;;  %v5760_v59 = vor.u32 %v8420_v29, %v5759_v24  ;;  %v8412_v24 = vld [vmem:[#allocation5 + $0x14] sm:$0xf0] }
 0x16b   :  { %4371 = vmatpush.bf16.msrb.mxu1 %v5952_v22  ;;  %4385 = vmatpush.bf16.msrb.mxu2 %v6080_v14  ;;  %v8424_v22 = vld [vmem:[#allocation5 + $0x74] sm:$0xf0]  ;;  %v5903_v14 = vld [vmem:[#allocation5 + $0x168] sm:$0xf] }
 0x16c   :  { %4399 = vmatpush.bf16.msrb.mxu3 %v6208_v60  ;;  %v8456_v60 = vld [vmem:[#allocation5 + $0x174] sm:$0xf0]  ;;  %9943 = vst [vmem:[#allocation40_spill] sm:$0xff] %v9674_v61  ;;  %v5855_v29 = vld [vmem:[#allocation5 + $0x108] sm:$0xf] }
 0x16d   :  { %4358 = vmatpush.bf16.msrb.mxu0 %v5808_v10  ;;  %v5776_v10 = vor.u32 %v8424_v22, %v5775_v46  ;;  %v4113_v43 = vpop.f32.mrf.mxu2  ;;  %v8416_v46 = vld [vmem:[#allocation5 + $0x34] sm:$0xf0]  ;;  %v4127_v22 = vpop.f32.mrf.mxu3  ;;  %v6607_v51 = vld [vmem:[#allocation5 + $0x6e8] sm:$0xf] }
 0x16e   :  { %v4114_v50 = vadd.f32 %v4113_v43, %v9930_v30  ;;  %v8512_v61 = vld [vmem:[#allocation5 + $0x334] sm:$0xf0]  ;;  %v5727_v43 = vld [vmem:[#allocation5 + $0x8] sm:$0xf] }
 0x16f   :  { %4372 = vmatpush.bf16.msrb.mxu1 %v5936_v25  ;;  %4386 = vmatpush.bf16.msrb.mxu2 %v6064_v31  ;;  %v5904_v25 = vor.u32 %v8456_v60, %v5903_v14  ;;  %v6032_v31 = vor.u32 %v8488_v16, %v6031_v49  ;;  %v5871_v14 = vld [vmem:[#allocation5 + $0x128] sm:$0xf]  ;;  %v8448_v60 = vld [vmem:[#allocation5 + $0x134] sm:$0xf0] }
 0x170   :  { %4400 = vmatpush.bf16.msrb.mxu3 %v6192_v32  ;;  %v6160_v32 = vor.u32 %v8520_v20, %v6159_v17  ;;  %v5999_v49 = vld [vmem:[#allocation5 + $0x228] sm:$0xf]  ;;  %v9681_v16 = vadd.f32 %v4127_v22, %v4114_v50  ;;  %v8480_v17 = vld [vmem:[#allocation5 + $0x234] sm:$0xf0] }
 0x171   :  { %4359 = vmatpush.bf16.msrb.mxu0 %v5792_v3  ;;  %v5888_v3 = vor.u32 %v8452_v41, %v5887_v33  ;;  %v6127_v20 = vld [vmem:[#allocation5 + $0x328] sm:$0xf]  ;;  %v8444_v33 = vld [vmem:[#allocation5 + $0x114] sm:$0xf0] }
 0x172   :  { %v5983_v41 = vld [vmem:[#allocation5 + $0x208] sm:$0xf]  ;;  %v8568_v50 = vld [vmem:[#allocation5 + $0x4f4] sm:$0xf0] }
 0x173   :  { %4373 = vmatpush.bf16.msrb.mxu1 %v5920_v45  ;;  %4387 = vmatpush.bf16.msrb.mxu2 %v6048_v19  ;;  %v5743_v45 = vld [vmem:[#allocation5 + $0x28] sm:$0xf]  ;;  %v6016_v19 = vor.u32 %v8484_v35, %v6015_v34  ;;  %v8476_v34 = vld [vmem:[#allocation5 + $0x214] sm:$0xf0] }
 0x174   :  { %4401 = vmatpush.bf16.msrb.mxu3 %v6176_v23  ;;  %v6144_v23 = vor.u32 %v8516_v42, %v6143_v39  ;;  %v6111_v35 = vld [vmem:[#allocation5 + $0x308] sm:$0xf]  ;;  %v8508_v39 = vld [vmem:[#allocation5 + $0x314] sm:$0xf0] }
 0x175   :  { %4360 = vmatpush.bf16.msrb.mxu0 %v5776_v10  ;;  %v5744_v10 = vor.u32 %v8416_v46, %v5743_v45  ;;  %v6351_v42 = vld [vmem:[#allocation5 + $0x4e8] sm:$0xf]  ;;  %v8600_v30 = vld [vmem:[#allocation5 + $0x5f4] sm:$0xf0] }
 0x176   :  { %v6479_v22 = vld [vmem:[#allocation5 + $0x5e8] sm:$0xf]  ;;  %v8632_v45 = vld [vmem:[#allocation5 + $0x6f4] sm:$0xf0] }
 0x177   :  { %4374 = vmatpush.bf16.msrb.mxu1 %v5904_v25  ;;  %4388 = vmatpush.bf16.msrb.mxu2 %v6032_v31  ;;  %v5872_v25 = vor.u32 %v8448_v60, %v5871_v14  ;;  %v6000_v31 = vor.u32 %v8480_v17, %v5999_v49  ;;  %v6735_v46 = vld [vmem:[#allocation5 + $0x7e8] sm:$0xf]  ;;  %v8664_v14 = vld [vmem:[#allocation5 + $0x7f4] sm:$0xf0]  ;;  %v6480_v60 = vor.u32 %v8600_v30, %v6479_v22 }
 0x178   :  { %4402 = vmatpush.bf16.msrb.mxu3 %v6160_v32  ;;  %v6128_v32 = vor.u32 %v8512_v61, %v6127_v20  ;;  %v6112_v61 = vor.u32 %v8508_v39, %v6111_v35  ;;  %v6335_v49 = vld [vmem:[#allocation5 + $0x4c8] sm:$0xf]  ;;  %v8564_v17 = vld [vmem:[#allocation5 + $0x4d4] sm:$0xf0]  ;;  %v6608_v20 = vor.u32 %v8632_v45, %v6607_v51  ;;  %v6736_v27 = vor.u32 %v8664_v14, %v6735_v46  ;;  %v9685_v51 = vpop.f32.mrf.mxu1  ;;  %v9693_v46 = vpop.f32.mrf.mxu3 }
 0x179   :  { %4361 = vmatpush.bf16.msrb.mxu0 %v5760_v59  ;;  %v5728_v59 = vor.u32 %v8412_v24, %v5727_v43  ;;  %v6463_v18 = vld [vmem:[#allocation5 + $0x5c8] sm:$0xf]  ;;  %v8596_v4 = vld [vmem:[#allocation5 + $0x5d4] sm:$0xf0]  ;;  %v9683_v24 = vpop.f32.mrf.mxu0  ;;  %9945 = vst [vmem:[#allocation42_spill] sm:$0xff] %v9685_v51 }
 0x17a   :  { %v8628_v43 = vld [vmem:[#allocation5 + $0x6d4] sm:$0xf0]  ;;  %9944 = vst [vmem:[#allocation41_spill] sm:$0xff] %v9683_v24  ;;  %v6464_v30 = vor.u32 %v8596_v4, %v6463_v18  ;;  %v6575_v39 = vld [vmem:[#allocation5 + $0x6a8] sm:$0xf] }
 0x17b   :  { %4375 = vmatpush.bf16.msrb.mxu1 %v5888_v3  ;;  %4389 = vmatpush.bf16.msrb.mxu2 %v6016_v19  ;;  %v5856_v3 = vor.u32 %v8444_v33, %v5855_v29  ;;  %v5984_v19 = vor.u32 %v8476_v34, %v5983_v41  ;;  %v6336_v29 = vor.u32 %v8564_v17, %v6335_v49  ;;  %v6319_v33 = vld [vmem:[#allocation5 + $0x4a8] sm:$0xf]  ;;  %v8592_v35 = vld [vmem:[#allocation5 + $0x5b4] sm:$0xf0] }
 0x17c   :  { %4403 = vmatpush.bf16.msrb.mxu3 %v6144_v23  ;;  %v6352_v23 = vor.u32 %v8568_v50, %v6351_v42  ;;  %v6447_v34 = vld [vmem:[#allocation5 + $0x5a8] sm:$0xf]  ;;  %v8624_v42 = vld [vmem:[#allocation5 + $0x6b4] sm:$0xf0] }
 0x17d   :  { %4362 = vmatpush.bf16.msrb.mxu0 %v5744_v10  ;;  %v6719_v10 = vld [vmem:[#allocation5 + $0x7c8] sm:$0xf]  ;;  %v8656_v22 = vld [vmem:[#allocation5 + $0x7b4] sm:$0xf0]  ;;  %v6448_v4 = vor.u32 %v8592_v35, %v6447_v34 }
 0x17e   :  { %v6703_v50 = vld [vmem:[#allocation5 + $0x7a8] sm:$0xf]  ;;  %v8652_v49 = vld [vmem:[#allocation5 + $0x794] sm:$0xf0] }
 0x17f   :  { %4376 = vmatpush.bf16.msrb.mxu1 %v5872_v25  ;;  %4390 = vmatpush.bf16.msrb.mxu2 %v6000_v31  ;;  %v8660_v25 = vld [vmem:[#allocation5 + $0x7d4] sm:$0xf0]  ;;  %v6303_v18 = vld [vmem:[#allocation5 + $0x488] sm:$0xf]  ;;  %v6704_v45 = vor.u32 %v8656_v22, %v6703_v50 }
 0x180   :  { %4404 = vmatpush.bf16.msrb.mxu3 %v6128_v32  ;;  %v8560_v31 = vld [vmem:[#allocation5 + $0x4b4] sm:$0xf0]  ;;  %v6592_v32 = vor.u32 %v8628_v43, %v6591_v15  ;;  %v6720_v41 = vor.u32 %v8660_v25, %v6719_v10  ;;  %v6431_v14 = vld [vmem:[#allocation5 + $0x588] sm:$0xf] }
 0x181   :  { %4363 = vmatpush.bf16.msrb.mxu0 %v5728_v59  ;;  %v9689_v59 = vpop.f32.mrf.mxu2  ;;  %v6320_v15 = vor.u32 %v8560_v31, %v6319_v33  ;;  %v4141_v17 = vpop.f32.mrf.mxu0  ;;  %v6287_v25 = vld [vmem:[#allocation5 + $0x468] sm:$0xf]  ;;  %v8648_v50 = vld [vmem:[#allocation5 + $0x774] sm:$0xf0] }
 0x182   :  { %v6543_v34 = vld [vmem:[#allocation5 + $0x668] sm:$0xf] }
 0x183   :  { %4377 = vmatpush.bf16.msrb.mxu1 %v5856_v3  ;;  %4391 = vmatpush.bf16.msrb.mxu2 %v5984_v19  ;;  %v6576_v3 = vor.u32 %v8624_v42, %v6575_v39  ;;  %v8588_v19 = vld [vmem:[#allocation5 + $0x594] sm:$0xf0]  ;;  %v4155_v31 = vpop.f32.mrf.mxu1  ;;  %v6671_v42 = vld [vmem:[#allocation5 + $0x768] sm:$0xf] }
 0x184   :  { %4405 = vmatpush.bf16.msrb.mxu3 %v6112_v61  ;;  %4364 = vmatmul.bf16.vlgmr.msrb.gmra.mxu0 %v9530_v44  ;;  %v6559_v61 = vld [vmem:[#allocation5 + $0x688] sm:$0xf]  ;;  %v6432_v10 = vor.u32 %v8588_v19, %v6431_v14  ;;  %v8616_v39 = vld [vmem:[#allocation5 + $0x674] sm:$0xf0] }
 0x185   :  { %4412 = vmatpush.bf16.msra.mxu0 %v6352_v23  ;;  %v8620_v23 = vld [vmem:[#allocation5 + $0x694] sm:$0xf0]  ;;  %v6527_v19 = vld [vmem:[#allocation5 + $0x648] sm:$0xf] }
 0x186   :  { %4392 = vmatmul.bf16.vlgmr.msrb.gmra.mxu2 %v9532_v47  ;;  %4378 = vmatmul.bf16.vlgmr.msrb.gmra.mxu1 %v9534_v55  ;;  %v8580_v14 = vld [vmem:[#allocation5 + $0x554] sm:$0xf0]  ;;  %v6975_v24 = vld [vmem:[#allocation5 + $0x9c8] sm:$0xf] }
 0x187   :  { %4426 = vmatpush.bf16.msra.mxu1 %v6480_v60  ;;  %4440 = vmatpush.bf16.msra.mxu2 %v6608_v20  ;;  %v6687_v60 = vld [vmem:[#allocation5 + $0x788] sm:$0xf]  ;;  %v4142_v20 = vadd.f32 %v4141_v17, %v9681_v16 }
 0x188   :  { %4454 = vmatpush.bf16.msra.mxu3 %v6736_v27  ;;  %v8556_v27 = vld [vmem:[#allocation5 + $0x494] sm:$0xf0]  ;;  %v6688_v33 = vor.u32 %v8652_v49, %v6687_v60  ;;  %v6655_v60 = vld [vmem:[#allocation5 + $0x748] sm:$0xf] }
 0x189   :  { %4406 = vmatmul.bf16.vlgmr.msrb.gmra.mxu3 %v9536_v56  ;;  %4413 = vmatpush.bf16.msra.mxu0 %v6336_v29  ;;  %v6304_v43 = vor.u32 %v8556_v27, %v6303_v18  ;;  %v8552_v29 = vld [vmem:[#allocation5 + $0x474] sm:$0xf0]  ;;  %v4156_v35 = vadd.f32 %v4155_v31, %v4142_v20  ;;  %v6544_v18 = vor.u32 %v8616_v39, %v6543_v34  ;;  %v6383_v31 = vld [vmem:[#allocation5 + $0x528] sm:$0xf] }
 0x18a   :  { %v6288_v22 = vor.u32 %v8552_v29, %v6287_v25  ;;  %v6672_v27 = vor.u32 %v8648_v50, %v6671_v42  ;;  %v8644_v49 = vld [vmem:[#allocation5 + $0x754] sm:$0xf0]  ;;  %v6255_v25 = vld [vmem:[#allocation5 + $0x428] sm:$0xf] }
 0x18b   :  { %4427 = vmatpush.bf16.msra.mxu1 %v6464_v30  ;;  %4441 = vmatpush.bf16.msra.mxu2 %v6592_v32  ;;  %v6560_v30 = vor.u32 %v8620_v23, %v6559_v61  ;;  %v6415_v32 = vld [vmem:[#allocation5 + $0x568] sm:$0xf]  ;;  %v8612_v23 = vld [vmem:[#allocation5 + $0x654] sm:$0xf0] }
 0x18c   :  { %4455 = vmatpush.bf16.msra.mxu3 %v6720_v41  ;;  %v8584_v41 = vld [vmem:[#allocation5 + $0x574] sm:$0xf0]  ;;  %v4183_v17 = vpop.f32.mrf.mxu3  ;;  %v6239_v42 = vld [vmem:[#allocation5 + $0x408] sm:$0xf] }
 0x18d   :  { %4414 = vmatpush.bf16.msra.mxu0 %v6320_v15  ;;  %v6416_v16 = vor.u32 %v8584_v41, %v6415_v32  ;;  %v6271_v15 = vld [vmem:[#allocation5 + $0x448] sm:$0xf]  ;;  %v8544_v29 = vld [vmem:[#allocation5 + $0x434] sm:$0xf0] }
 0x18e   :  { %v8576_v32 = vld [vmem:[#allocation5 + $0x534] sm:$0xf0]  ;;  %v6511_v41 = vld [vmem:[#allocation5 + $0x628] sm:$0xf]  ;;  %v6256_v50 = vor.u32 %v8544_v29, %v6255_v25 }
 0x18f   :  { %4428 = vmatpush.bf16.msra.mxu1 %v6448_v4  ;;  %4442 = vmatpush.bf16.msra.mxu2 %v6576_v3  ;;  %v8548_v4 = vld [vmem:[#allocation5 + $0x454] sm:$0xf0]  ;;  %v4169_v3 = vpop.f32.mrf.mxu2  ;;  %v7247_v29 = vld [vmem:[#allocation5 + $0xbe8] sm:$0xf] }
 0x190   :  { %4456 = vmatpush.bf16.msra.mxu3 %v6704_v45  ;;  %v6399_v45 = vld [vmem:[#allocation5 + $0x548] sm:$0xf]  ;;  %v4170_v61 = vadd.f32 %v4169_v3, %v4156_v35  ;;  %v8608_v34 = vld [vmem:[#allocation5 + $0x634] sm:$0xf0] }
 0x191   :  { %4415 = vmatpush.bf16.msra.mxu0 %v6304_v43  ;;  %v6272_v43 = vor.u32 %v8548_v4, %v6271_v15  ;;  %v6639_v35 = vld [vmem:[#allocation5 + $0x728] sm:$0xf]  ;;  %v8640_v39 = vld [vmem:[#allocation5 + $0x734] sm:$0xf0] }
 0x192   :  { %v9696_v20 = vadd.f32 %v4183_v17, %v4170_v61  ;;  %v6367_v15 = vld [vmem:[#allocation5 + $0x508] sm:$0xf]  ;;  %v8572_v4 = vld [vmem:[#allocation5 + $0x514] sm:$0xf0] }
 0x193   :  { %4429 = vmatpush.bf16.msra.mxu1 %v6432_v10  ;;  %4443 = vmatpush.bf16.msra.mxu2 %v6560_v30  ;;  %v6400_v10 = vor.u32 %v8580_v14, %v6399_v45  ;;  %v6528_v30 = vor.u32 %v8612_v23, %v6527_v19  ;;  %v6495_v3 = vld [vmem:[#allocation5 + $0x608] sm:$0xf]  ;;  %v8604_v45 = vld [vmem:[#allocation5 + $0x614] sm:$0xf0] }
 0x194   :  { %4457 = vmatpush.bf16.msra.mxu3 %v6688_v33  ;;  %v6656_v33 = vor.u32 %v8644_v49, %v6655_v60  ;;  %v6623_v14 = vld [vmem:[#allocation5 + $0x708] sm:$0xf]  ;;  %v8636_v19 = vld [vmem:[#allocation5 + $0x714] sm:$0xf0] }
 0x195   :  { %4416 = vmatpush.bf16.msra.mxu0 %v6288_v22  ;;  %v6384_v22 = vor.u32 %v8576_v32, %v6383_v31  ;;  %v6863_v61 = vld [vmem:[#allocation5 + $0x8e8] sm:$0xf]  ;;  %v8696_v23 = vld [vmem:[#allocation5 + $0x8f4] sm:$0xf0] }
 0x196   :  { %v6991_v60 = vld [vmem:[#allocation5 + $0x9e8] sm:$0xf]  ;;  %v8728_v49 = vld [vmem:[#allocation5 + $0x9f4] sm:$0xf0]  ;;  %v6864_v32 = vor.u32 %v8696_v23, %v6863_v61 }
 0x197   :  { %4430 = vmatpush.bf16.msra.mxu1 %v6416_v16  ;;  %4444 = vmatpush.bf16.msra.mxu2 %v6544_v18  ;;  %v8540_v16 = vld [vmem:[#allocation5 + $0x414] sm:$0xf0]  ;;  %v6512_v18 = vor.u32 %v8608_v34, %v6511_v41  ;;  %v7119_v17 = vld [vmem:[#allocation5 + $0xae8] sm:$0xf]  ;;  %v6992_v41 = vor.u32 %v8728_v49, %v6991_v60 }
 0x198   :  { %4458 = vmatpush.bf16.msra.mxu3 %v6672_v27  ;;  %v6640_v27 = vor.u32 %v8640_v39, %v6639_v35  ;;  %v8760_v25 = vld [vmem:[#allocation5 + $0xaf4] sm:$0xf0]  ;;  %v6847_v34 = vld [vmem:[#allocation5 + $0x8c8] sm:$0xf] }
 0x199   :  { %4417 = vmatpush.bf16.msra.mxu0 %v6272_v43  ;;  %v6240_v43 = vor.u32 %v8540_v16, %v6239_v42  ;;  %v8792_v31 = vld [vmem:[#allocation5 + $0xbf4] sm:$0xf0]  ;;  %v7120_v39 = vor.u32 %v8760_v25, %v7119_v17  ;;  %v9698_v16 = vpop.f32.mrf.mxu0  ;;  %v7087_v23 = vld [vmem:[#allocation5 + $0xaa8] sm:$0xf] }
 0x19a   :  { %v8692_v35 = vld [vmem:[#allocation5 + $0x8d4] sm:$0xf0]  ;;  %v7248_v51 = vor.u32 %v8792_v31, %v7247_v29  ;;  %v7215_v49 = vld [vmem:[#allocation5 + $0xba8] sm:$0xf] }
 0x19b   :  { %4431 = vmatpush.bf16.msra.mxu1 %v6400_v10  ;;  %4445 = vmatpush.bf16.msra.mxu2 %v6528_v30  ;;  %v6368_v10 = vor.u32 %v8572_v4, %v6367_v15  ;;  %v6496_v30 = vor.u32 %v8604_v45, %v6495_v3  ;;  %v8756_v42 = vld [vmem:[#allocation5 + $0xad4] sm:$0xf0]  ;;  %v9700_v15 = vpop.f32.mrf.mxu1  ;;  %v6848_v4 = vor.u32 %v8692_v35, %v6847_v34  ;;  %v6943_v29 = vld [vmem:[#allocation5 + $0x988] sm:$0xf] }
 0x19c   :  { %4459 = vmatpush.bf16.msra.mxu3 %v6656_v33  ;;  %v6624_v33 = vor.u32 %v8636_v19, %v6623_v14  ;;  %v8688_v3 = vld [vmem:[#allocation5 + $0x8b4] sm:$0xf0]  ;;  %v7104_v45 = vor.u32 %v8756_v42, %v7103_v36  ;;  %v6959_v19 = vld [vmem:[#allocation5 + $0x9a8] sm:$0xf] }
 0x19d   :  { %4418 = vmatpush.bf16.msra.mxu0 %v6256_v50  ;;  %v7231_v50 = vld [vmem:[#allocation5 + $0xbc8] sm:$0xf]  ;;  %v8720_v61 = vld [vmem:[#allocation5 + $0x9b4] sm:$0xf0] }
 0x19e   :  { %v8752_v60 = vld [vmem:[#allocation5 + $0xab4] sm:$0xf0]  ;;  %v6815_v36 = vld [vmem:[#allocation5 + $0x888] sm:$0xf] }
 0x19f   :  { %4432 = vmatpush.bf16.msra.mxu1 %v6384_v22  ;;  %4446 = vmatpush.bf16.msra.mxu2 %v6512_v18  ;;  %v8788_v22 = vld [vmem:[#allocation5 + $0xbd4] sm:$0xf0]  ;;  %v6976_v18 = vor.u32 %v8724_v37, %v6975_v24  ;;  %v6960_v24 = vor.u32 %v8720_v61, %v6959_v19  ;;  %v7055_v19 = vld [vmem:[#allocation5 + $0xa68] sm:$0xf] }
 0x1a0   :  { %4460 = vmatpush.bf16.msra.mxu3 %v6640_v27  ;;  %v6831_v27 = vld [vmem:[#allocation5 + $0x8a8] sm:$0xf]  ;;  %v7232_v14 = vor.u32 %v8788_v22, %v7231_v50  ;;  %v8784_v17 = vld [vmem:[#allocation5 + $0xbb4] sm:$0xf0] }
 0x1a1   :  { %4419 = vmatpush.bf16.msra.mxu0 %v6240_v43  ;;  %v6832_v37 = vor.u32 %v8688_v3, %v6831_v27  ;;  %v9706_v43 = vpop.f32.mrf.mxu2  ;;  %v7216_v25 = vor.u32 %v8784_v17, %v7215_v49  ;;  %v8716_v31 = vld [vmem:[#allocation5 + $0x994] sm:$0xf0]  ;;  %v4197_v35 = vpop.f32.mrf.mxu0 }
 0x1a2   :  { %v8780_v34 = vld [vmem:[#allocation5 + $0xb94] sm:$0xf0]  ;;  %v6944_v50 = vor.u32 %v8716_v31, %v6943_v29  ;;  %v7039_v31 = vld [vmem:[#allocation5 + $0xa48] sm:$0xf] }
 0x1a3   :  { %4433 = vmatpush.bf16.msra.mxu1 %v6368_v10  ;;  %4447 = vmatpush.bf16.msra.mxu2 %v6496_v30  ;;  %v7088_v10 = vor.u32 %v8752_v60, %v7087_v23  ;;  %v7071_v30 = vld [vmem:[#allocation5 + $0xa88] sm:$0xf]  ;;  %v4211_v22 = vpop.f32.mrf.mxu1  ;;  %v8744_v23 = vld [vmem:[#allocation5 + $0xa74] sm:$0xf0] }
 0x1a4   :  { %4461 = vmatpush.bf16.msra.mxu3 %v6624_v33  ;;  %4420 = vmatmul.bf16.vlgmr.msra.gmra.mxu0 %v9555_v57  ;;  %v9708_v33 = vpop.f32.mrf.mxu3  ;;  %v7183_v60 = vld [vmem:[#allocation5 + $0xb68] sm:$0xf]  ;;  %v8776_v49 = vld [vmem:[#allocation5 + $0xb74] sm:$0xf0] }
 0x1a5   :  { %4468 = vmatpush.bf16.msrb.mxu0 %v6864_v32  ;;  %v8748_v32 = vld [vmem:[#allocation5 + $0xa94] sm:$0xf0] }
 0x1a6   :  { %4448 = vmatmul.bf16.vlgmr.msra.gmra.mxu2 %v9558_v58  ;;  %4434 = vmatmul.bf16.vlgmr.msra.gmra.mxu1 %v9561_v6  ;;  %v7072_v27 = vor.u32 %v8748_v32, %v7071_v30  ;;  %v8708_v29 = vld [vmem:[#allocation5 + $0x954] sm:$0xf0] }
 0x1a7   :  { %4482 = vmatpush.bf16.msrb.mxu1 %v6992_v41  ;;  %4496 = vmatpush.bf16.msrb.mxu2 %v7120_v39  ;;  %v7199_v41 = vld [vmem:[#allocation5 + $0xb88] sm:$0xf]  ;;  %v4198_v39 = vadd.f32 %v4197_v35, %v9696_v20  ;;  %v8772_v35 = vld [vmem:[#allocation5 + $0xb54] sm:$0xf0] }
 0x1a8   :  { %4510 = vmatpush.bf16.msrb.mxu3 %v7248_v51  ;;  %v8684_v51 = vld [vmem:[#allocation5 + $0x894] sm:$0xf0]  ;;  %v7200_v3 = vor.u32 %v8780_v34, %v7199_v41  ;;  %v7167_v34 = vld [vmem:[#allocation5 + $0xb48] sm:$0xf] }
 0x1a9   :  { %4462 = vmatmul.bf16.vlgmr.msra.gmra.mxu3 %v9564_v7  ;;  %4469 = vmatpush.bf16.msrb.mxu0 %v6848_v4  ;;  %v6816_v42 = vor.u32 %v8684_v51, %v6815_v36  ;;  %v6799_v4 = vld [vmem:[#allocation5 + $0x868] sm:$0xf]  ;;  %v4212_v61 = vadd.f32 %v4211_v22, %v4198_v39  ;;  %v7056_v36 = vor.u32 %v8744_v23, %v7055_v19  ;;  %v8740_v41 = vld [vmem:[#allocation5 + $0xa54] sm:$0xf0] }
 0x1aa   :  { %v7184_v51 = vor.u32 %v8776_v49, %v7183_v60  ;;  %v6767_v22 = vld [vmem:[#allocation5 + $0x828] sm:$0xf]  ;;  %v8736_v19 = vld [vmem:[#allocation5 + $0xa34] sm:$0xf0] }
 0x1ab   :  { %4483 = vmatpush.bf16.msrb.mxu1 %v6976_v18  ;;  %4497 = vmatpush.bf16.msrb.mxu2 %v7104_v45  ;;  %v8680_v18 = vld [vmem:[#allocation5 + $0x874] sm:$0xf0]  ;;  %v6927_v45 = vld [vmem:[#allocation5 + $0x968] sm:$0xf] }
 0x1ac   :  { %4511 = vmatpush.bf16.msrb.mxu3 %v7232_v14  ;;  %v8712_v14 = vld [vmem:[#allocation5 + $0x974] sm:$0xf0]  ;;  %v6800_v17 = vor.u32 %v8680_v18, %v6799_v4  ;;  %v4239_v32 = vpop.f32.mrf.mxu3  ;;  %v7040_v18 = vor.u32 %v8740_v41, %v7039_v31  ;;  %v6751_v60 = vld [vmem:[#allocation5 + $0x808] sm:$0xf] }
 0x1ad   :  { %4470 = vmatpush.bf16.msrb.mxu0 %v6832_v37  ;;  %v6928_v20 = vor.u32 %v8712_v14, %v6927_v45  ;;  %v6783_v37 = vld [vmem:[#allocation5 + $0x848] sm:$0xf]  ;;  %v8672_v4 = vld [vmem:[#allocation5 + $0x834] sm:$0xf0] }
 0x1ae   :  { %v8704_v45 = vld [vmem:[#allocation5 + $0x934] sm:$0xf0]  ;;  %v7023_v14 = vld [vmem:[#allocation5 + $0xa28] sm:$0xf]  ;;  %v6768_v49 = vor.u32 %v8672_v4, %v6767_v22 }
 0x1af   :  { %4484 = vmatpush.bf16.msrb.mxu1 %v6960_v24  ;;  %4498 = vmatpush.bf16.msrb.mxu2 %v7088_v10  ;;  %v8676_v24 = vld [vmem:[#allocation5 + $0x854] sm:$0xf0]  ;;  %v4225_v10 = vpop.f32.mrf.mxu2  ;;  %v7503_v41 = vld [vmem:[#allocation5 + $0xde8] sm:$0xf] }
 0x1b0   :  { %4512 = vmatpush.bf16.msrb.mxu3 %v7216_v25  ;;  %v6911_v25 = vld [vmem:[#allocation5 + $0x948] sm:$0xf]  ;;  %v4226_v30 = vadd.f32 %v4225_v10, %v4212_v61  ;;  %v8768_v23 = vld [vmem:[#allocation5 + $0xb34] sm:$0xf0] }
 0x1b1   :  { %4471 = vmatpush.bf16.msrb.mxu0 %v6816_v42  ;;  %v6784_v42 = vor.u32 %v8676_v24, %v6783_v37  ;;  %v7151_v61 = vld [vmem:[#allocation5 + $0xb28] sm:$0xf]  ;;  %v8700_v24 = vld [vmem:[#allocation5 + $0x914] sm:$0xf0] }
 0x1b2   :  { %v9711_v39 = vadd.f32 %v4239_v32, %v4226_v30  ;;  %v6879_v37 = vld [vmem:[#allocation5 + $0x908] sm:$0xf]  ;;  %v8764_v31 = vld [vmem:[#allocation5 + $0xb14] sm:$0xf0] }
 0x1b3   :  { %4485 = vmatpush.bf16.msrb.mxu1 %v6944_v50  ;;  %4499 = vmatpush.bf16.msrb.mxu2 %v7072_v27  ;;  %v6912_v50 = vor.u32 %v8708_v29, %v6911_v25  ;;  %v7168_v27 = vor.u32 %v8772_v35, %v7167_v34  ;;  %v7007_v10 = vld [vmem:[#allocation5 + $0xa08] sm:$0xf]  ;;  %v8732_v25 = vld [vmem:[#allocation5 + $0xa14] sm:$0xf0] }
 0x1b4   :  { %4513 = vmatpush.bf16.msrb.mxu3 %v7200_v3  ;;  %v6895_v3 = vld [vmem:[#allocation5 + $0x928] sm:$0xf]  ;;  %v8824_v32 = vld [vmem:[#allocation5 + $0xcf4] sm:$0xf0] }
 0x1b5   :  { %4472 = vmatpush.bf16.msrb.mxu0 %v6800_v17  ;;  %v6896_v17 = vor.u32 %v8704_v45, %v6895_v3  ;;  %v7135_v29 = vld [vmem:[#allocation5 + $0xb08] sm:$0xf]  ;;  %v8856_v34 = vld [vmem:[#allocation5 + $0xdf4] sm:$0xf0] }
 0x1b6   :  { %v7375_v30 = vld [vmem:[#allocation5 + $0xce8] sm:$0xf]  ;;  %v8888_v22 = vld [vmem:[#allocation5 + $0xef4] sm:$0xf0] }
 0x1b7   :  { %4486 = vmatpush.bf16.msrb.mxu1 %v6928_v20  ;;  %4500 = vmatpush.bf16.msrb.mxu2 %v7056_v36  ;;  %v8668_v20 = vld [vmem:[#allocation5 + $0x814] sm:$0xf0]  ;;  %v7024_v36 = vor.u32 %v8736_v19, %v7023_v14  ;;  %v7631_v35 = vld [vmem:[#allocation5 + $0xee8] sm:$0xf]  ;;  %v7376_v45 = vor.u32 %v8824_v32, %v7375_v30  ;;  %v7504_v14 = vor.u32 %v8856_v34, %v7503_v41 }
 0x1b8   :  { %4514 = vmatpush.bf16.msrb.mxu3 %v7184_v51  ;;  %v7152_v51 = vor.u32 %v8768_v23, %v7151_v61  ;;  %v7759_v4 = vld [vmem:[#allocation5 + $0xfe8] sm:$0xf]  ;;  %v8920_v3 = vld [vmem:[#allocation5 + $0xff4] sm:$0xf0]  ;;  %v7632_v23 = vor.u32 %v8888_v22, %v7631_v35 }
 0x1b9   :  { %4473 = vmatpush.bf16.msrb.mxu0 %v6784_v42  ;;  %v6752_v42 = vor.u32 %v8668_v20, %v6751_v60  ;;  %v7359_v19 = vld [vmem:[#allocation5 + $0xcc8] sm:$0xf]  ;;  %v8820_v61 = vld [vmem:[#allocation5 + $0xcd4] sm:$0xf0]  ;;  %v7760_v13 = vor.u32 %v8920_v3, %v7759_v4  ;;  %v9713_v20 = vpop.f32.mrf.mxu0 }
 0x1ba   :  { %v8884_v60 = vld [vmem:[#allocation5 + $0xed4] sm:$0xf0]  ;;  %v7471_v32 = vld [vmem:[#allocation5 + $0xda8] sm:$0xf] }
 0x1bb   :  { %4487 = vmatpush.bf16.msrb.mxu1 %v6912_v50  ;;  %4501 = vmatpush.bf16.msrb.mxu2 %v7040_v18  ;;  %v6880_v50 = vor.u32 %v8700_v24, %v6879_v37  ;;  %v7008_v18 = vor.u32 %v8732_v25, %v7007_v10  ;;  %v9715_v37 = vpop.f32.mrf.mxu1  ;;  %v7360_v24 = vor.u32 %v8820_v61, %v7359_v19  ;;  %v8816_v10 = vld [vmem:[#allocation5 + $0xcb4] sm:$0xf0]  ;;  %v9946_v25 = vperm.slane %v9676_v21, 1  ;;  %v7599_v34 = vld [vmem:[#allocation5 + $0xea8] sm:$0xf] }
 0x1bc   :  { %4515 = vmatpush.bf16.msrb.mxu3 %v7168_v27  ;;  %v7136_v27 = vor.u32 %v8764_v31, %v7135_v29  ;;  %v7616_v31 = vor.u32 %v8884_v60, %v7615_v26  ;;  %v8848_v41 = vld [vmem:[#allocation5 + $0xdb4] sm:$0xf0]  ;;  %v7327_v26 = vld [vmem:[#allocation5 + $0xc88] sm:$0xf] }
 0x1bd   :  { %4474 = vmatpush.bf16.msrb.mxu0 %v6768_v49  ;;  %v7743_v49 = vld [vmem:[#allocation5 + $0xfc8] sm:$0xf]  ;;  %v4116_v29 = vadd.f32 %v9689_v59, %v9946_v25  ;;  %v8880_v35 = vld [vmem:[#allocation5 + $0xeb4] sm:$0xf0] }
 0x1be   :  { %v8812_v21 = vld [vmem:[#allocation5 + $0xc94] sm:$0xf0]  ;;  %v7600_v22 = vor.u32 %v8880_v35, %v7599_v34  ;;  %v7455_v3 = vld [vmem:[#allocation5 + $0xd88] sm:$0xf] }
 0x1bf   :  { %4488 = vmatpush.bf16.msrb.mxu1 %v6896_v17  ;;  %4502 = vmatpush.bf16.msrb.mxu2 %v7024_v36  ;;  %v8916_v17 = vld [vmem:[#allocation5 + $0xfd4] sm:$0xf0]  ;;  %v7488_v36 = vor.u32 %v8852_v28, %v7487_v62  ;;  %v4130_v59 = vadd.f32 %v9693_v46, %v4116_v29  ;;  %v7711_v19 = vld [vmem:[#allocation5 + $0xf88] sm:$0xf]  ;;  %v7328_v46 = vor.u32 %v8812_v21, %v7327_v26 }
 0x1c0   :  { %4516 = vmatpush.bf16.msrb.mxu3 %v7152_v51  ;;  %v7343_v51 = vld [vmem:[#allocation5 + $0xca8] sm:$0xf]  ;;  %v7744_v30 = vor.u32 %v8916_v17, %v7743_v49  ;;  %v8912_v28 = vld [vmem:[#allocation5 + $0xfb4] sm:$0xf0] }
 0x1c1   :  { %4475 = vmatpush.bf16.msrb.mxu0 %v6752_v42  ;;  %v7727_v42 = vld [vmem:[#allocation5 + $0xfa8] sm:$0xf]  ;;  %v7344_v62 = vor.u32 %v8816_v10, %v7343_v51  ;;  %v8908_v61 = vld [vmem:[#allocation5 + $0xf94] sm:$0xf0]  ;;  %v4144_v51 = vadd.f32 %v9698_v16, %v4130_v59 }
 0x1c2   :  { %v7728_v4 = vor.u32 %v8912_v28, %v7727_v42  ;;  %v7712_v25 = vor.u32 %v8908_v61, %v7711_v19  ;;  %v7439_v29 = vld [vmem:[#allocation5 + $0xd68] sm:$0xf]  ;;  %v8904_v35 = vld [vmem:[#allocation5 + $0xf74] sm:$0xf0] }
 0x1c3   :  { %4489 = vmatpush.bf16.msrb.mxu1 %v6880_v50  ;;  %4503 = vmatpush.bf16.msrb.mxu2 %v7008_v18  ;;  %v9725_v50 = vpop.f32.mrf.mxu2  ;;  %v8844_v18 = vld [vmem:[#allocation5 + $0xd94] sm:$0xf0]  ;;  %v4267_v17 = vpop.f32.mrf.mxu1  ;;  %v7695_v34 = vld [vmem:[#allocation5 + $0xf68] sm:$0xf] }
 0x1c4   :  { %4517 = vmatpush.bf16.msrb.mxu3 %v7136_v27  ;;  %4476 = vmatmul.bf16.vlgmr.msrb.gmra.mxu0 %v9571_v1  ;;  %v7583_v27 = vld [vmem:[#allocation5 + $0xe88] sm:$0xf]  ;;  %v7456_v49 = vor.u32 %v8844_v18, %v7455_v3  ;;  %v7696_v26 = vor.u32 %v8904_v35, %v7695_v34  ;;  %v8900_v19 = vld [vmem:[#allocation5 + $0xf54] sm:$0xf0] }
 0x1c5   :  { %4524 = vmatpush.bf16.msra.mxu0 %v7376_v45  ;;  %v9727_v45 = vpop.f32.mrf.mxu3  ;;  %v7295_v28 = vld [vmem:[#allocation5 + $0xc48] sm:$0xf]  ;;  %v8796_v34 = vld [vmem:[#allocation5 + $0xc14] sm:$0xf0] }
 0x1c6   :  { %4504 = vmatmul.bf16.vlgmr.msrb.gmra.mxu2 %v9574_v2  ;;  %4490 = vmatmul.bf16.vlgmr.msrb.gmra.mxu1 %v9577_v9  ;;  %v7423_v59 = vld [vmem:[#allocation5 + $0xd48] sm:$0xf] }
 0x1c7   :  { %4538 = vmatpush.bf16.msra.mxu1 %v7504_v14  ;;  %4552 = vmatpush.bf16.msra.mxu2 %v7632_v23  ;;  %v8876_v14 = vld [vmem:[#allocation5 + $0xe94] sm:$0xf0]  ;;  %v4253_v23 = vpop.f32.mrf.mxu0  ;;  %v7391_v35 = vld [vmem:[#allocation5 + $0xd08] sm:$0xf] }
 0x1c8   :  { %4566 = vmatpush.bf16.msra.mxu3 %v7760_v13  ;;  %v7472_v13 = vor.u32 %v8848_v41, %v7471_v32  ;;  %v4254_v60 = vadd.f32 %v4253_v23, %v9711_v39  ;;  %v7584_v10 = vor.u32 %v8876_v14, %v7583_v27  ;;  %v8872_v41 = vld [vmem:[#allocation5 + $0xe74] sm:$0xf0]  ;;  %v7679_v14 = vld [vmem:[#allocation5 + $0xf48] sm:$0xf] }
 0x1c9   :  { %4518 = vmatmul.bf16.vlgmr.msrb.gmra.mxu3 %v9580_v48  ;;  %4525 = vmatpush.bf16.msra.mxu0 %v7360_v24  ;;  %v7311_v24 = vld [vmem:[#allocation5 + $0xc68] sm:$0xf]  ;;  %v8868_v27 = vld [vmem:[#allocation5 + $0xe54] sm:$0xf0] }
 0x1ca   :  { %v4268_v32 = vadd.f32 %v4267_v17, %v4254_v60 }
 0x1cb   :  { %4539 = vmatpush.bf16.msra.mxu1 %v7488_v36  ;;  %4553 = vmatpush.bf16.msra.mxu2 %v7616_v31  ;;  %v8808_v36 = vld [vmem:[#allocation5 + $0xc74] sm:$0xf0]  ;;  %v4281_v21 = vpop.f32.mrf.mxu2 }
 0x1cc   :  { %4567 = vmatpush.bf16.msra.mxu3 %v7744_v30  ;;  %v8840_v31 = vld [vmem:[#allocation5 + $0xd74] sm:$0xf0]  ;;  %v7567_v30 = vld [vmem:[#allocation5 + $0xe68] sm:$0xf]  ;;  %v7312_v39 = vor.u32 %v8808_v36, %v7311_v24  ;;  %v4282_v3 = vadd.f32 %v4281_v21, %v4268_v32  ;;  %v7680_v24 = vor.u32 %v8900_v19, %v7679_v14  ;;  %v5841_v14 = vld [vmem:[#allocation5 + $0xf8] sm:$0xf0] }
 0x1cd   :  { %4526 = vmatpush.bf16.msra.mxu0 %v7344_v62  ;;  %v7440_v42 = vor.u32 %v8840_v31, %v7439_v29  ;;  %v8804_v62 = vld [vmem:[#allocation5 + $0xc54] sm:$0xf0]  ;;  %v7568_v16 = vor.u32 %v8872_v41, %v7567_v30  ;;  %v4295_v18 = vpop.f32.mrf.mxu3  ;;  %v7407_v36 = vld [vmem:[#allocation5 + $0xd28] sm:$0xf]  ;;  %v8470_v19 = vld [vmem:[#allocation5 + $0x1ec] sm:$0xf] }
 0x1ce   :  { %v9733_v23 = vadd.f32 %v4295_v18, %v4282_v3  ;;  %v7663_v29 = vld [vmem:[#allocation5 + $0xf28] sm:$0xf]  ;;  %v8896_v31 = vld [vmem:[#allocation5 + $0xf34] sm:$0xf0]  ;;  %v8438_v3 = vld [vmem:[#allocation5 + $0xec] sm:$0xf] }
 0x1cf   :  { %4540 = vmatpush.bf16.msra.mxu1 %v7472_v13  ;;  %4554 = vmatpush.bf16.msra.mxu2 %v7600_v22  ;;  %v4158_v13 = vadd.f32 %v9700_v15, %v4144_v51  ;;  %v8836_v22 = vld [vmem:[#allocation5 + $0xd54] sm:$0xf0]  ;;  %v7296_v15 = vor.u32 %v8804_v62, %v7295_v28  ;;  %v7263_v30 = vld [vmem:[#allocation5 + $0xc08] sm:$0xf]  ;;  %v7664_v28 = vor.u32 %v8896_v31, %v7663_v29  ;;  %v8434_v29 = vld [vmem:[#allocation5 + $0xcc] sm:$0xf] }
 0x1d0   :  { %4568 = vmatpush.bf16.msra.mxu3 %v7728_v4  ;;  %v7551_v4 = vld [vmem:[#allocation5 + $0xe48] sm:$0xf]  ;;  %v7424_v60 = vor.u32 %v8836_v22, %v7423_v59  ;;  %v8832_v51 = vld [vmem:[#allocation5 + $0xd34] sm:$0xf0]  ;;  %v7264_v18 = vor.u32 %v8796_v34, %v7263_v30  ;;  %v5825_v30 = vld [vmem:[#allocation5 + $0xd8] sm:$0xf0] }
 0x1d1   :  { %4527 = vmatpush.bf16.msra.mxu0 %v7328_v46  ;;  %v4172_v61 = vadd.f32 %v9706_v43, %v4158_v13  ;;  %v7279_v46 = vld [vmem:[#allocation5 + $0xc28] sm:$0xf]  ;;  %v7552_v17 = vor.u32 %v8868_v27, %v7551_v4  ;;  %v7408_v41 = vor.u32 %v8832_v51, %v7407_v36  ;;  %v8860_v13 = vld [vmem:[#allocation5 + $0xe14] sm:$0xf0]  ;;  %v5844_v36 = vor.u32 %v8438_v3, %v5841_v14 }
 0x1d2   :  { %v7519_v62 = vld [vmem:[#allocation5 + $0xe08] sm:$0xf]  ;;  %v8892_v21 = vld [vmem:[#allocation5 + $0xf14] sm:$0xf0] }
 0x1d3   :  { %4541 = vmatpush.bf16.msra.mxu1 %v7456_v49  ;;  %4555 = vmatpush.bf16.msra.mxu2 %v7584_v10  ;;  %v8800_v49 = vld [vmem:[#allocation5 + $0xc34] sm:$0xf0]  ;;  %v7535_v10 = vld [vmem:[#allocation5 + $0xe28] sm:$0xf]  ;;  %v4186_v43 = vadd.f32 %v9708_v33, %v4172_v61  ;;  %v5969_v61 = vld [vmem:[#allocation5 + $0x1f8] sm:$0xf0]  ;;  %v4283_v14 = vpop.f32.mrf.mxu2 }
 0x1d4   :  { %4569 = vmatpush.bf16.msra.mxu3 %v7712_v25  ;;  %v8864_v25 = vld [vmem:[#allocation5 + $0xe34] sm:$0xf0]  ;;  %v7280_v32 = vor.u32 %v8800_v49, %v7279_v46  ;;  %v7887_v59 = vld [vmem:[#allocation5 + $0x10e8] sm:$0xf]  ;;  %v5972_v51 = vor.u32 %v8470_v19, %v5969_v61 }
 0x1d5   :  { %4528 = vmatpush.bf16.msra.mxu0 %v7312_v39  ;;  %v8828_v39 = vld [vmem:[#allocation5 + $0xd14] sm:$0xf0]  ;;  %v8015_v33 = vld [vmem:[#allocation5 + $0x11e8] sm:$0xf] }
 0x1d6   :  { %v8952_v22 = vld [vmem:[#allocation5 + $0x10f4] sm:$0xf0]  ;;  %v7392_v27 = vor.u32 %v8828_v39, %v7391_v35  ;;  %v7855_v39 = vld [vmem:[#allocation5 + $0x10a8] sm:$0xf] }
 0x1d7   :  { %4542 = vmatpush.bf16.msra.mxu1 %v7440_v42  ;;  %4556 = vmatpush.bf16.msra.mxu2 %v7568_v16  ;;  %v7536_v42 = vor.u32 %v8864_v25, %v7535_v10  ;;  %v7647_v16 = vld [vmem:[#allocation5 + $0xf08] sm:$0xf]  ;;  %v8984_v4 = vld [vmem:[#allocation5 + $0x11f4] sm:$0xf0] }
 0x1d8   :  { %4570 = vmatpush.bf16.msra.mxu3 %v7696_v26  ;;  %v4200_v26 = vadd.f32 %v9713_v20, %v4186_v43  ;;  %v7888_v20 = vor.u32 %v8952_v22, %v7887_v59  ;;  %v8016_v49 = vor.u32 %v8984_v4, %v8015_v33  ;;  %v7999_v10 = vld [vmem:[#allocation5 + $0x11c8] sm:$0xf]  ;;  %v8980_v25 = vld [vmem:[#allocation5 + $0x11d4] sm:$0xf0]  ;;  %v8466_v43 = vld [vmem:[#allocation5 + $0x1cc] sm:$0xf] }
 0x1d9   :  { %4529 = vmatpush.bf16.msra.mxu0 %v7296_v15  ;;  %v7520_v15 = vor.u32 %v8860_v13, %v7519_v62  ;;  %v8000_v35 = vor.u32 %v8980_v25, %v7999_v10  ;;  %v8976_v13 = vld [vmem:[#allocation5 + $0x11b4] sm:$0xf0]  ;;  %v8462_v59 = vld [vmem:[#allocation5 + $0x1ac] sm:$0xf]  ;;  %v5937_v22 = vld [vmem:[#allocation5 + $0x1b8] sm:$0xf0] }
 0x1da   :  { %v4214_v46 = vadd.f32 %v9715_v37, %v4200_v26  ;;  %v4269_v37 = vpop.f32.mrf.mxu1  ;;  %v5940_v19 = vor.u32 %v8462_v59, %v5937_v22  ;;  %v7967_v61 = vld [vmem:[#allocation5 + $0x1188] sm:$0xf] }
 0x1db   :  { %4543 = vmatpush.bf16.msra.mxu1 %v7424_v60  ;;  %4557 = vmatpush.bf16.msra.mxu2 %v7552_v17  ;;  %v7648_v60 = vor.u32 %v8892_v21, %v7647_v16  ;;  %v7871_v17 = vld [vmem:[#allocation5 + $0x10c8] sm:$0xf]  ;;  %v8430_v16 = vld [vmem:[#allocation5 + $0xac] sm:$0xf]  ;;  %v5809_v21 = vld [vmem:[#allocation5 + $0xb8] sm:$0xf0] }
 0x1dc   :  { %4571 = vmatpush.bf16.msra.mxu3 %v7680_v24  ;;  %v8948_v24 = vld [vmem:[#allocation5 + $0x10d4] sm:$0xf0]  ;;  %v4228_v31 = vadd.f32 %v9725_v50, %v4214_v46  ;;  %v7983_v50 = vld [vmem:[#allocation5 + $0x11a8] sm:$0xf]  ;;  %v4297_v46 = vpop.f32.mrf.mxu3 }
 0x1dd   :  { %4530 = vmatpush.bf16.msra.mxu0 %v7280_v32  ;;  %v5953_v32 = vld [vmem:[#allocation5 + $0x1d8] sm:$0xf0]  ;;  %v7872_v34 = vor.u32 %v8948_v24, %v7871_v17  ;;  %v7984_v3 = vor.u32 %v8976_v13, %v7983_v50  ;;  %v7807_v13 = vld [vmem:[#allocation5 + $0x1048] sm:$0xf] }
 0x1de   :  { %v5956_v62 = vor.u32 %v8466_v43, %v5953_v32  ;;  %v4242_v26 = vadd.f32 %v9727_v45, %v4228_v31  ;;  %v5812_v45 = vor.u32 %v8430_v16, %v5809_v21  ;;  %v5921_v17 = vld [vmem:[#allocation5 + $0x198] sm:$0xf0]  ;;  %v7823_v31 = vld [vmem:[#allocation5 + $0x1068] sm:$0xf]  ;;  %v8932_v16 = vld [vmem:[#allocation5 + $0x1054] sm:$0xf0] }
 0x1df   :  { %4544 = vmatpush.bf16.msra.mxu1 %v7408_v41  ;;  %4558 = vmatpush.bf16.msra.mxu2 %v7536_v42  ;;  %v4255_v41 = vpop.f32.mrf.mxu0  ;;  %v8944_v42 = vld [vmem:[#allocation5 + $0x10b4] sm:$0xf0]  ;;  %v7935_v22 = vld [vmem:[#allocation5 + $0x1148] sm:$0xf] }
 0x1e0   :  { %4572 = vmatpush.bf16.msra.mxu3 %v7664_v28  ;;  %v5828_v28 = vor.u32 %v8434_v29, %v5825_v30  ;;  %v4256_v33 = vadd.f32 %v4255_v41, %v4242_v26  ;;  %v7856_v4 = vor.u32 %v8944_v42, %v7855_v39  ;;  %v8936_v30 = vld [vmem:[#allocation5 + $0x1074] sm:$0xf0]  ;;  %v7951_v41 = vld [vmem:[#allocation5 + $0x1168] sm:$0xf] }
 0x1e1   :  { %4531 = vmatpush.bf16.msra.mxu0 %v7264_v18  ;;  %v7839_v18 = vld [vmem:[#allocation5 + $0x1088] sm:$0xf]  ;;  %v7824_v50 = vor.u32 %v8936_v30, %v7823_v31  ;;  %v5745_v31 = vld [vmem:[#allocation5 + $0x38] sm:$0xf0]  ;;  %v8446_v30 = vld [vmem:[#allocation5 + $0x12c] sm:$0xf] }
 0x1e3   :  { %4545 = vmatpush.bf16.msra.mxu1 %v7392_v27  ;;  %4559 = vmatpush.bf16.msra.mxu2 %v7520_v15  ;;  %v8940_v27 = vld [vmem:[#allocation5 + $0x1094] sm:$0xf0]  ;;  %v4323_v29 = vpop.f32.mrf.mxu1 }
 0x1e4   :  { %4573 = vmatpush.bf16.msra.mxu3 %v7648_v60  ;;  %4532 = vmatmul.bf16.vlgmr.msra.gmra.mxu0 %v9587_v52  ;;  %v8972_v15 = vld [vmem:[#allocation5 + $0x1194] sm:$0xf0]  ;;  %v8426_v60 = vld [vmem:[#allocation5 + $0x8c] sm:$0xf] }
 0x1e5   :  { %4580 = vmatpush.bf16.msrb.mxu0 %v7888_v20  ;;  %v5793_v20 = vld [vmem:[#allocation5 + $0x98] sm:$0xf0]  ;;  %v7968_v25 = vor.u32 %v8972_v15, %v7967_v61  ;;  %v7808_v15 = vor.u32 %v8932_v16, %v7807_v13  ;;  %v8442_v16 = vld [vmem:[#allocation5 + $0x10c] sm:$0xf] }
 0x1e6   :  { %4560 = vmatmul.bf16.vlgmr.msra.gmra.mxu2 %v9590_v53  ;;  %4546 = vmatmul.bf16.vlgmr.msra.gmra.mxu1 %v9593_v63  ;;  %v5796_v43 = vor.u32 %v8426_v60, %v5793_v20  ;;  %v5729_v13 = vld [vmem:[#allocation5 + $0x18] sm:$0xf0] }
 0x1e7   :  { %4594 = vmatpush.bf16.msrb.mxu1 %v8016_v49  ;;  %4608 = vmatpush.bf16.msrb.mxu2 %v5844_v36  ;;  %v8458_v49 = vld [vmem:[#allocation5 + $0x18c] sm:$0xf]  ;;  %v4309_v24 = vpop.f32.mrf.mxu0  ;;  %v7840_v36 = vor.u32 %v8940_v27, %v7839_v18 }
 0x1e8   :  { %4622 = vmatpush.bf16.msrb.mxu3 %v5972_v51  ;;  %v4270_v51 = vadd.f32 %v4269_v37, %v4256_v33  ;;  %v4310_v10 = vadd.f32 %v4309_v24, %v9733_v23  ;;  %v5924_v32 = vor.u32 %v8458_v49, %v5921_v17  ;;  %v5905_v37 = vld [vmem:[#allocation5 + $0x178] sm:$0xf0]  ;;  %v8964_v33 = vld [vmem:[#allocation5 + $0x1154] sm:$0xf0]  ;;  %v7791_v17 = vld [vmem:[#allocation5 + $0x1028] sm:$0xf] }
 0x1e9   :  { %4574 = vmatmul.bf16.vlgmr.msra.gmra.mxu3 %v9596_v0  ;;  %4581 = vmatpush.bf16.msrb.mxu0 %v7872_v34  ;;  %v8968_v34 = vld [vmem:[#allocation5 + $0x1174] sm:$0xf0]  ;;  %v4337_v59 = vpop.f32.mrf.mxu2  ;;  %v7936_v49 = vor.u32 %v8964_v33, %v7935_v22  ;;  %v8502_v22 = vld [vmem:[#allocation5 + $0x2ec] sm:$0xf]  ;;  %v6097_v33 = vld [vmem:[#allocation5 + $0x2f8] sm:$0xf0] }
 0x1ea   :  { %v4284_v39 = vadd.f32 %v4283_v14, %v4270_v51  ;;  %v4324_v42 = vadd.f32 %v4323_v29, %v4310_v10  ;;  %v7952_v23 = vor.u32 %v8968_v34, %v7951_v41  ;;  %v5761_v14 = vld [vmem:[#allocation5 + $0x58] sm:$0xf0]  ;;  %v8928_v24 = vld [vmem:[#allocation5 + $0x1034] sm:$0xf0]  ;;  %v8414_v29 = vld [vmem:[#allocation5 + $0x2c] sm:$0xf] }
 0x1eb   :  { %4595 = vmatpush.bf16.msrb.mxu1 %v8000_v35  ;;  %4609 = vmatpush.bf16.msrb.mxu2 %v5828_v28  ;;  %v8422_v35 = vld [vmem:[#allocation5 + $0x6c] sm:$0xf]  ;;  %v5777_v28 = vld [vmem:[#allocation5 + $0x78] sm:$0xf0]  ;;  %v4325_v10 = vpop.f32.mrf.mxu1  ;;  %v7792_v34 = vor.u32 %v8928_v24, %v7791_v17  ;;  %v6100_v24 = vor.u32 %v8502_v22, %v6097_v33 }
 0x1ec   :  { %4623 = vmatpush.bf16.msrb.mxu3 %v5956_v62  ;;  %v8454_v62 = vld [vmem:[#allocation5 + $0x16c] sm:$0xf]  ;;  %v5780_v26 = vor.u32 %v8422_v35, %v5777_v28  ;;  %v4338_v18 = vadd.f32 %v4337_v59, %v4324_v42  ;;  %v4351_v27 = vpop.f32.mrf.mxu3  ;;  %v7903_v42 = vld [vmem:[#allocation5 + $0x1108] sm:$0xf]  ;;  %v8956_v28 = vld [vmem:[#allocation5 + $0x1114] sm:$0xf0] }
 0x1ed   :  { %4582 = vmatpush.bf16.msrb.mxu0 %v7856_v4  ;;  %v5908_v21 = vor.u32 %v8454_v62, %v5905_v37  ;;  %v8418_v4 = vld [vmem:[#allocation5 + $0x4c] sm:$0xf]  ;;  %v5748_v62 = vor.u32 %v8414_v29, %v5745_v31  ;;  %v5857_v59 = vld [vmem:[#allocation5 + $0x118] sm:$0xf0] }
 0x1ee   :  { %v4352_v20 = vadd.f32 %v4351_v27, %v4338_v18  ;;  %v8566_v18 = vld [vmem:[#allocation5 + $0x4ec] sm:$0xf]  ;;  %v6209_v31 = vld [vmem:[#allocation5 + $0x3d8] sm:$0xf0] }
 0x1ef   :  { %4596 = vmatpush.bf16.msrb.mxu1 %v7984_v3  ;;  %4610 = vmatpush.bf16.msrb.mxu2 %v5812_v45  ;;  %v4298_v3 = vadd.f32 %v4297_v46, %v4284_v39  ;;  %v8450_v45 = vld [vmem:[#allocation5 + $0x14c] sm:$0xf]  ;;  %v4311_v61 = vpop.f32.mrf.mxu0  ;;  %v7919_v46 = vld [vmem:[#allocation5 + $0x1128] sm:$0xf]  ;;  %v8924_v39 = vld [vmem:[#allocation5 + $0x1014] sm:$0xf0] }
 0x1f0   :  { %4624 = vmatpush.bf16.msrb.mxu3 %v5940_v19  ;;  %v5889_v19 = vld [vmem:[#allocation5 + $0x158] sm:$0xf0]  ;;  %v8498_v17 = vld [vmem:[#allocation5 + $0x2cc] sm:$0xf]  ;;  %vm4861_vm0 = vcmp.gt.f32.partialorder %v4352_v20, 1.0 }
 0x1f1   :  { %4583 = vmatpush.bf16.msrb.mxu0 %v7840_v36  ;;  %v4312_v60 = vadd.f32 %v4311_v61, %v4298_v3  ;;  %v5764_v36 = vor.u32 %v8418_v4, %v5761_v14  ;;  %v5892_v51 = vor.u32 %v8450_v45, %v5889_v19  ;;  %v8534_v4 = vld [vmem:[#allocation5 + $0x3ec] sm:$0xf]  ;;  %v6225_v3 = vld [vmem:[#allocation5 + $0x3f8] sm:$0xf0]  ;;  %v7904_v45 = vor.u32 %v8956_v28, %v7903_v42 }
 0x1f2   :  { %v6353_v19 = vld [vmem:[#allocation5 + $0x4f8] sm:$0xf0]  ;;  %v8598_v61 = vld [vmem:[#allocation5 + $0x5ec] sm:$0xf] }
 0x1f3   :  { %4597 = vmatpush.bf16.msrb.mxu1 %v7968_v25  ;;  %4611 = vmatpush.bf16.msrb.mxu2 %v5796_v43  ;;  %v8960_v25 = vld [vmem:[#allocation5 + $0x1134] sm:$0xf0]  ;;  %v5873_v43 = vld [vmem:[#allocation5 + $0x138] sm:$0xf0]  ;;  %v4326_v41 = vadd.f32 %v4325_v10, %v4312_v60  ;;  %v8530_v10 = vld [vmem:[#allocation5 + $0x3cc] sm:$0xf] }
 0x1f4   :  { %4625 = vmatpush.bf16.msrb.mxu3 %v5924_v32  ;;  %v7775_v32 = vld [vmem:[#allocation5 + $0x1008] sm:$0xf]  ;;  %v7920_v35 = vor.u32 %v8960_v25, %v7919_v46  ;;  %v5876_v37 = vor.u32 %v8446_v30, %v5873_v43  ;;  %v6356_v25 = vor.u32 %v8566_v18, %v6353_v19  ;;  %v8562_v30 = vld [vmem:[#allocation5 + $0x4cc] sm:$0xf]  ;;  %v6337_v43 = vld [vmem:[#allocation5 + $0x4d8] sm:$0xf0] }
 0x1f5   :  { %4584 = vmatpush.bf16.msrb.mxu0 %v7824_v50  ;;  %v4339_v50 = vpop.f32.mrf.mxu2  ;;  %v7776_v14 = vor.u32 %v8924_v39, %v7775_v32  ;;  %v8594_v32 = vld [vmem:[#allocation5 + $0x5cc] sm:$0xf]  ;;  %v6065_v39 = vld [vmem:[#allocation5 + $0x2b8] sm:$0xf0]  ;;  %v6340_v42 = vor.u32 %v8562_v30, %v6337_v43  ;;  %v8263_v46 = vld [vmem:[#allocation8 + $0x1d0] sm:$0xf] }
 0x1f6   :  { %v6049_v22 = vld [vmem:[#allocation5 + $0x298] sm:$0xf0]  ;;  %v8482_v30 = vld [vmem:[#allocation5 + $0x24c] sm:$0xf] }
 0x1f7   :  { %4598 = vmatpush.bf16.msrb.mxu1 %v7952_v23  ;;  %4612 = vmatpush.bf16.msrb.mxu2 %v5780_v26  ;;  %v8410_v23 = vld [vmem:[#allocation5 + $0xc] sm:$0xf]  ;;  %v4340_v26 = vadd.f32 %v4339_v50, %v4326_v41  ;;  %v6465_v41 = vld [vmem:[#allocation5 + $0x5d8] sm:$0xf0] }
 0x1f8   :  { %4626 = vmatpush.bf16.msrb.mxu3 %v5908_v21  ;;  %v4353_v21 = vpop.f32.mrf.mxu3  ;;  %v5732_v60 = vor.u32 %v8410_v23, %v5729_v13  ;;  %v6468_v28 = vor.u32 %v8594_v32, %v6465_v41  ;;  %v8558_v50 = vld [vmem:[#allocation5 + $0x4ac] sm:$0xf]  ;;  %v6321_v23 = vld [vmem:[#allocation5 + $0x4b8] sm:$0xf0] }
 0x1f9   :  { %4585 = vmatpush.bf16.msrb.mxu0 %v7808_v15  ;;  %v4354_v27 = vadd.f32 %v4353_v21, %v4340_v26  ;;  %v6481_v15 = vld [vmem:[#allocation5 + $0x5f8] sm:$0xf0]  ;;  %v8590_v13 = vld [vmem:[#allocation5 + $0x5ac] sm:$0xf]  ;;  %v6324_v33 = vor.u32 %v8558_v50, %v6321_v23 }
 0x1fa   :  { %v6484_v29 = vor.u32 %v8598_v61, %v6481_v15  ;;  %v6177_v18 = vld [vmem:[#allocation5 + $0x398] sm:$0xf0]  ;;  %v8486_v61 = vld [vmem:[#allocation5 + $0x26c] sm:$0xf] }
 0x1fb   :  { %4599 = vmatpush.bf16.msrb.mxu1 %v7936_v49  ;;  %4613 = vmatpush.bf16.msrb.mxu2 %v5764_v36  ;;  %v5860_v49 = vor.u32 %v8442_v16, %v5857_v59  ;;  %vm4865_vm1 = vcmp.gt.f32.partialorder %v4354_v27, 1.0  ;;  %v6228_v36 = vor.u32 %v8534_v4, %v6225_v3  ;;  %v6449_v16 = vld [vmem:[#allocation5 + $0x5b8] sm:$0xf0]  ;;  %v8490_v59 = vld [vmem:[#allocation5 + $0x28c] sm:$0xf] }
 0x1fc   :  { %4627 = vmatpush.bf16.msrb.mxu3 %v5892_v51  ;;  %v6081_v51 = vld [vmem:[#allocation5 + $0x2d8] sm:$0xf0]  ;;  %vm9745_vm2 = vmpackc.low %vm4865_vm1, %vm4861_vm0  ;;  %v6452_v4 = vor.u32 %v8590_v13, %v6449_v16  ;;  %v8522_v3 = vld [vmem:[#allocation5 + $0x38c] sm:$0xf] }
 0x1fd   :  { %4586 = vmatpush.bf16.msrb.mxu0 %v7792_v34  ;;  %v6084_v20 = vor.u32 %v8498_v17, %v6081_v51  ;;  %v6212_v34 = vor.u32 %v8530_v10, %v6209_v31  ;;  %v8554_v27 = vld [vmem:[#allocation5 + $0x48c] sm:$0xf]  ;;  %v6433_v19 = vld [vmem:[#allocation5 + $0x598] sm:$0xf0] }
 0x1fe   :  { %v6033_v15 = vld [vmem:[#allocation5 + $0x278] sm:$0xf0]  ;;  %v8518_v17 = vld [vmem:[#allocation5 + $0x36c] sm:$0xf] }
 0x1ff   :  { %4600 = vmatpush.bf16.msrb.mxu1 %v7920_v35  ;;  %4614 = vmatpush.bf16.msrb.mxu2 %v5748_v62  ;;  %v8494_v35 = vld [vmem:[#allocation5 + $0x2ac] sm:$0xf]  ;;  %v6289_v51 = vld [vmem:[#allocation5 + $0x478] sm:$0xf0] }
 0x200   :  { %4628 = vmatpush.bf16.msrb.mxu3 %v5876_v37  ;;  %v8526_v62 = vld [vmem:[#allocation5 + $0x3ac] sm:$0xf]  ;;  %v6193_v37 = vld [vmem:[#allocation5 + $0x3b8] sm:$0xf0]  ;;  %v6068_v26 = vor.u32 %v8494_v35, %v6065_v39 }
 0x201   :  { %4587 = vmatpush.bf16.msrb.mxu0 %v7776_v14  ;;  %v6196_v21 = vor.u32 %v8526_v62, %v6193_v37  ;;  %v6305_v14 = vld [vmem:[#allocation5 + $0x498] sm:$0xf0]  ;;  %v8582_v10 = vld [vmem:[#allocation5 + $0x56c] sm:$0xf] }
 0x202   :  { %v6017_v43 = vld [vmem:[#allocation5 + $0x258] sm:$0xf0]  ;;  %v8546_v35 = vld [vmem:[#allocation5 + $0x44c] sm:$0xf] }
 0x203   :  { %4601 = vmatpush.bf16.msrb.mxu1 %v7904_v45  ;;  %4615 = vmatpush.bf16.msrb.mxu2 %v5732_v60  ;;  %v8586_v45 = vld [vmem:[#allocation5 + $0x58c] sm:$0xf]  ;;  %v6308_v60 = vor.u32 %v8554_v27, %v6305_v14  ;;  %v6273_v39 = vld [vmem:[#allocation5 + $0x458] sm:$0xf0]  ;;  %v6020_v62 = vor.u32 %v8482_v30, %v6017_v43 }
 0x204   :  { %4629 = vmatpush.bf16.msrb.mxu3 %v5860_v49  ;;  %4588 = vmatmul.bf16.vlgmr.msrb.gmra.mxu0 %v9603_v8  ;;  %v6436_v49 = vor.u32 %v8586_v45, %v6433_v19  ;;  %v8478_v50 = vld [vmem:[#allocation5 + $0x22c] sm:$0xf]  ;;  %v6001_v23 = vld [vmem:[#allocation5 + $0x238] sm:$0xf0]  ;;  %v6276_v13 = vor.u32 %v8546_v35, %v6273_v39 }
 0x205   :  { %4636 = vmatpush.bf16.msra.mxu0 %v6100_v24  ;;  %v6161_v24 = vld [vmem:[#allocation5 + $0x378] sm:$0xf0]  ;;  %v8506_v45 = vld [vmem:[#allocation5 + $0x30c] sm:$0xf] }
 0x206   :  { %4602 = vmatmul.bf16.vlgmr.msrb.gmra.mxu1 %v9606_v12  ;;  %4616 = vmatmul.bf16.vlgmr.msrb.gmra.mxu2 %v9530_v44  ;;  %v6052_v44 = vor.u32 %v8490_v59, %v6049_v22  ;;  %v6164_v31 = vor.u32 %v8518_v17, %v6161_v24  ;;  %v8542_v59 = vld [vmem:[#allocation5 + $0x42c] sm:$0xf]  ;;  %v6257_v22 = vld [vmem:[#allocation5 + $0x438] sm:$0xf0] }
 0x207   :  { %4650 = vmatpush.bf16.msra.mxu1 %v6228_v36  ;;  %4664 = vmatpush.bf16.msra.mxu2 %v6356_v25  ;;  %v8550_v36 = vld [vmem:[#allocation5 + $0x46c] sm:$0xf]  ;;  %v6417_v25 = vld [vmem:[#allocation5 + $0x578] sm:$0xf0] }
 0x208   :  { %4678 = vmatpush.bf16.msra.mxu3 %v6484_v29  ;;  %v6036_v29 = vor.u32 %v8486_v61, %v6033_v15  ;;  %v6292_v32 = vor.u32 %v8550_v36, %v6289_v51  ;;  %v6420_v41 = vor.u32 %v8582_v10, %v6417_v25  ;;  %v5985_v14 = vld [vmem:[#allocation5 + $0x218] sm:$0xf0]  ;;  %v8538_v61 = vld [vmem:[#allocation5 + $0x40c] sm:$0xf] }
 0x209   :  { %4630 = vmatmul.bf16.vlgmr.msrb.gmra.mxu3 %v9534_v55  ;;  %4637 = vmatpush.bf16.msra.mxu0 %v6084_v20  ;;  %v6180_v55 = vor.u32 %v8522_v3, %v6177_v18  ;;  %v8514_v20 = vld [vmem:[#allocation5 + $0x34c] sm:$0xf]  ;;  %v6004_v18 = vor.u32 %v8478_v50, %v6001_v23  ;;  %v6113_v19 = vld [vmem:[#allocation5 + $0x318] sm:$0xf0] }
 0x20a   :  { %v8474_v3 = vld [vmem:[#allocation5 + $0x20c] sm:$0xf]  ;;  %v6241_v15 = vld [vmem:[#allocation5 + $0x418] sm:$0xf0] }
 0x20b   :  { %4651 = vmatpush.bf16.msra.mxu1 %v6212_v34  ;;  %4665 = vmatpush.bf16.msra.mxu2 %v6340_v42  ;;  %v6145_v34 = vld [vmem:[#allocation5 + $0x358] sm:$0xf0]  ;;  %v8578_v42 = vld [vmem:[#allocation5 + $0x54c] sm:$0xf]  ;;  %v5988_v25 = vor.u32 %v8474_v3, %v5985_v14 }
 0x20c   :  { %4679 = vmatpush.bf16.msra.mxu3 %v6468_v28  ;;  %v6401_v28 = vld [vmem:[#allocation5 + $0x558] sm:$0xf0]  ;;  %v6148_v37 = vor.u32 %v8514_v20, %v6145_v34  ;;  %v8630_v17 = vld [vmem:[#allocation5 + $0x6ec] sm:$0xf] }
 0x20d   :  { %4638 = vmatpush.bf16.msra.mxu0 %v6068_v26  ;;  %v6404_v16 = vor.u32 %v8578_v42, %v6401_v28  ;;  %v8510_v26 = vld [vmem:[#allocation5 + $0x32c] sm:$0xf]  ;;  %v6609_v24 = vld [vmem:[#allocation5 + $0x6f8] sm:$0xf0] }
 0x20e   :  { %v8662_v36 = vld [vmem:[#allocation5 + $0x7ec] sm:$0xf]  ;;  %v6737_v51 = vld [vmem:[#allocation5 + $0x7f8] sm:$0xf0]  ;;  %v6612_v20 = vor.u32 %v8630_v17, %v6609_v24 }
 0x20f   :  { %4652 = vmatpush.bf16.msra.mxu1 %v6196_v21  ;;  %4666 = vmatpush.bf16.msra.mxu2 %v6324_v33  ;;  %v6129_v21 = vld [vmem:[#allocation5 + $0x338] sm:$0xf0]  ;;  %v8574_v33 = vld [vmem:[#allocation5 + $0x52c] sm:$0xf]  ;;  %v6740_v34 = vor.u32 %v8662_v36, %v6737_v51 }
 0x210   :  { %4680 = vmatpush.bf16.msra.mxu3 %v6452_v4  ;;  %v6385_v4 = vld [vmem:[#allocation5 + $0x538] sm:$0xf0]  ;;  %v6132_v27 = vor.u32 %v8510_v26, %v6129_v21  ;;  %v8694_v10 = vld [vmem:[#allocation5 + $0x8ec] sm:$0xf] }
 0x211   :  { %4639 = vmatpush.bf16.msra.mxu0 %v6052_v44  ;;  %v6260_v44 = vor.u32 %v8542_v59, %v6257_v22  ;;  %v8726_v30 = vld [vmem:[#allocation5 + $0x9ec] sm:$0xf]  ;;  %v6993_v43 = vld [vmem:[#allocation5 + $0x9f8] sm:$0xf0] }
 0x212   :  { %v8626_v35 = vld [vmem:[#allocation5 + $0x6cc] sm:$0xf]  ;;  %v6593_v39 = vld [vmem:[#allocation5 + $0x6d8] sm:$0xf0]  ;;  %v6996_v28 = vor.u32 %v8726_v30, %v6993_v43 }
 0x213   :  { %4653 = vmatpush.bf16.msra.mxu1 %v6180_v55  ;;  %4667 = vmatpush.bf16.msra.mxu2 %v6308_v60  ;;  %v6388_v55 = vor.u32 %v8574_v33, %v6385_v4  ;;  %v8570_v60 = vld [vmem:[#allocation5 + $0x50c] sm:$0xf]  ;;  %v6849_v23 = vld [vmem:[#allocation5 + $0x8d8] sm:$0xf0]  ;;  %v6596_v26 = vor.u32 %v8626_v35, %v6593_v39 }
 0x214   :  { %4681 = vmatpush.bf16.msra.mxu3 %v6436_v49  ;;  %v6369_v49 = vld [vmem:[#allocation5 + $0x518] sm:$0xf0]  ;;  %v8690_v50 = vld [vmem:[#allocation5 + $0x8cc] sm:$0xf] }
 0x215   :  { %4640 = vmatpush.bf16.msra.mxu0 %v6036_v29  ;;  %v6116_v29 = vor.u32 %v8506_v45, %v6113_v19  ;;  %v8622_v59 = vld [vmem:[#allocation5 + $0x6ac] sm:$0xf]  ;;  %v6577_v22 = vld [vmem:[#allocation5 + $0x6b8] sm:$0xf0]  ;;  %v6852_v33 = vor.u32 %v8690_v50, %v6849_v23 }
 0x216   :  { %v8654_v3 = vld [vmem:[#allocation5 + $0x7ac] sm:$0xf]  ;;  %v6833_v14 = vld [vmem:[#allocation5 + $0x8b8] sm:$0xf0] }
 0x217   :  { %4654 = vmatpush.bf16.msra.mxu1 %v6164_v31  ;;  %4668 = vmatpush.bf16.msra.mxu2 %v6292_v32  ;;  %v6865_v31 = vld [vmem:[#allocation5 + $0x8f8] sm:$0xf0]  ;;  %v6244_v32 = vor.u32 %v8538_v61, %v6241_v15  ;;  %v8718_v45 = vld [vmem:[#allocation5 + $0x9ac] sm:$0xf] }
 0x218   :  { %4682 = vmatpush.bf16.msra.mxu3 %v6420_v41  ;;  %v6372_v41 = vor.u32 %v8570_v60, %v6369_v49  ;;  %v6868_v42 = vor.u32 %v8694_v10, %v6865_v31  ;;  %v6961_v19 = vld [vmem:[#allocation5 + $0x9b8] sm:$0xf0]  ;;  %v8618_v61 = vld [vmem:[#allocation5 + $0x68c] sm:$0xf] }
 0x219   :  { %4641 = vmatpush.bf16.msra.mxu0 %v6020_v62  ;;  %v8658_v62 = vld [vmem:[#allocation5 + $0x7cc] sm:$0xf]  ;;  %v6561_v15 = vld [vmem:[#allocation5 + $0x698] sm:$0xf0]  ;;  %v6964_v49 = vor.u32 %v8718_v45, %v6961_v19 }
 0x21a   :  { %v6689_v17 = vld [vmem:[#allocation5 + $0x798] sm:$0xf0]  ;;  %v8714_v36 = vld [vmem:[#allocation5 + $0x98c] sm:$0xf] }
 0x21b   :  { %4655 = vmatpush.bf16.msra.mxu1 %v6148_v37  ;;  %4669 = vmatpush.bf16.msra.mxu2 %v6276_v13  ;;  %v6721_v37 = vld [vmem:[#allocation5 + $0x7d8] sm:$0xf0]  ;;  %v8722_v13 = vld [vmem:[#allocation5 + $0x9cc] sm:$0xf] }
 0x21c   :  { %4683 = vmatpush.bf16.msra.mxu3 %v6404_v16  ;;  %v6977_v16 = vld [vmem:[#allocation5 + $0x9d8] sm:$0xf0]  ;;  %v6724_v21 = vor.u32 %v8658_v62, %v6721_v37  ;;  %v8614_v10 = vld [vmem:[#allocation5 + $0x66c] sm:$0xf] }
 0x21d   :  { %4642 = vmatpush.bf16.msra.mxu0 %v6004_v18  ;;  %v6980_v4 = vor.u32 %v8722_v13, %v6977_v16  ;;  %v6705_v18 = vld [vmem:[#allocation5 + $0x7b8] sm:$0xf0]  ;;  %v8646_v30 = vld [vmem:[#allocation5 + $0x76c] sm:$0xf] }
 0x21e   :  { %v6817_v24 = vld [vmem:[#allocation5 + $0x898] sm:$0xf0]  ;;  %v8642_v50 = vld [vmem:[#allocation5 + $0x74c] sm:$0xf] }
 0x21f   :  { %4656 = vmatpush.bf16.msra.mxu1 %v6132_v27  ;;  %4670 = vmatpush.bf16.msra.mxu2 %v6260_v44  ;;  %v8686_v27 = vld [vmem:[#allocation5 + $0x8ac] sm:$0xf]  ;;  %v6580_v44 = vor.u32 %v8622_v59, %v6577_v22  ;;  %v6945_v51 = vld [vmem:[#allocation5 + $0x998] sm:$0xf0] }
 0x220   :  { %4684 = vmatpush.bf16.msra.mxu3 %v6388_v55  ;;  %v6708_v55 = vor.u32 %v8654_v3, %v6705_v18  ;;  %v6836_v60 = vor.u32 %v8686_v27, %v6833_v14  ;;  %v6948_v31 = vor.u32 %v8714_v36, %v6945_v51  ;;  %v6673_v43 = vld [vmem:[#allocation5 + $0x778] sm:$0xf0]  ;;  %v8674_v13 = vld [vmem:[#allocation5 + $0x84c] sm:$0xf] }
 0x221   :  { %4643 = vmatpush.bf16.msra.mxu0 %v5988_v25  ;;  %v6545_v25 = vld [vmem:[#allocation5 + $0x678] sm:$0xf0]  ;;  %v6676_v39 = vor.u32 %v8646_v30, %v6673_v43  ;;  %v8638_v27 = vld [vmem:[#allocation5 + $0x72c] sm:$0xf] }
 0x222   :  { %v6548_v35 = vor.u32 %v8614_v10, %v6545_v25  ;;  %v6657_v23 = vld [vmem:[#allocation5 + $0x758] sm:$0xf0]  ;;  %v8670_v45 = vld [vmem:[#allocation5 + $0x82c] sm:$0xf] }
 0x223   :  { %4657 = vmatpush.bf16.msra.mxu1 %v6116_v29  ;;  %4671 = vmatpush.bf16.msra.mxu2 %v6244_v32  ;;  %v8678_v32 = vld [vmem:[#allocation5 + $0x86c] sm:$0xf]  ;;  %v6785_v16 = vld [vmem:[#allocation5 + $0x858] sm:$0xf0]  ;;  %v6660_v22 = vor.u32 %v8642_v50, %v6657_v23  ;;  %v9759_v23 = vpop.f32.mrf.mxu1 }
 0x224   :  { %4685 = vmatpush.bf16.msra.mxu3 %v6372_v41  ;;  %4644 = vmatmul.bf16.vlgmr.msra.gmra.mxu0 %v9532_v47  ;;  %v8650_v47 = vld [vmem:[#allocation5 + $0x78c] sm:$0xf]  ;;  %v6801_v41 = vld [vmem:[#allocation5 + $0x878] sm:$0xf0]  ;;  %v6788_v3 = vor.u32 %v8674_v13, %v6785_v16 }
 0x225   :  { %4692 = vmatpush.bf16.msrb.mxu0 %v6612_v20  ;;  %v8710_v20 = vld [vmem:[#allocation5 + $0x96c] sm:$0xf]  ;;  %v6804_v62 = vor.u32 %v8678_v32, %v6801_v41  ;;  %v6641_v14 = vld [vmem:[#allocation5 + $0x738] sm:$0xf0] }
 0x226   :  { %4672 = vmatmul.bf16.vlgmr.msra.gmra.mxu2 %v9555_v57  ;;  %4658 = vmatmul.bf16.vlgmr.msra.gmra.mxu1 %v9536_v56  ;;  %v8682_v57 = vld [vmem:[#allocation5 + $0x88c] sm:$0xf]  ;;  %v6564_v56 = vor.u32 %v8618_v61, %v6561_v15  ;;  %v6769_v19 = vld [vmem:[#allocation5 + $0x838] sm:$0xf0] }
 0x227   :  { %4706 = vmatpush.bf16.msrb.mxu1 %v6740_v34  ;;  %4720 = vmatpush.bf16.msrb.mxu2 %v6868_v42  ;;  %v6820_v29 = vor.u32 %v8682_v57, %v6817_v24  ;;  %v6929_v34 = vld [vmem:[#allocation5 + $0x978] sm:$0xf0]  ;;  %v8610_v42 = vld [vmem:[#allocation5 + $0x64c] sm:$0xf]  ;;  %v6772_v57 = vor.u32 %v8670_v45, %v6769_v19 }
 0x228   :  { %4734 = vmatpush.bf16.msrb.mxu3 %v6996_v28  ;;  %v6529_v28 = vld [vmem:[#allocation5 + $0x658] sm:$0xf0]  ;;  %v6932_v37 = vor.u32 %v8710_v20, %v6929_v34  ;;  %v8602_v61 = vld [vmem:[#allocation5 + $0x60c] sm:$0xf] }
 0x229   :  { %4686 = vmatmul.bf16.vlgmr.msra.gmra.mxu3 %v9561_v6  ;;  %4693 = vmatpush.bf16.msrb.mxu0 %v6596_v26  ;;  %v6692_v6 = vor.u32 %v8650_v47, %v6689_v17  ;;  %v8706_v26 = vld [vmem:[#allocation5 + $0x94c] sm:$0xf]  ;;  %v6532_v59 = vor.u32 %v8610_v42, %v6529_v28  ;;  %v6625_v17 = vld [vmem:[#allocation5 + $0x718] sm:$0xf0] }
 0x22a   :  { %v8634_v47 = vld [vmem:[#allocation5 + $0x70c] sm:$0xf]  ;;  %v6753_v51 = vld [vmem:[#allocation5 + $0x818] sm:$0xf0] }
 0x22b   :  { %4707 = vmatpush.bf16.msrb.mxu1 %v6724_v21  ;;  %4721 = vmatpush.bf16.msrb.mxu2 %v6852_v33  ;;  %v6913_v21 = vld [vmem:[#allocation5 + $0x958] sm:$0xf0]  ;;  %v8606_v33 = vld [vmem:[#allocation5 + $0x62c] sm:$0xf]  ;;  %v6628_v41 = vor.u32 %v8634_v47, %v6625_v17 }
 0x22c   :  { %4735 = vmatpush.bf16.msrb.mxu3 %v6980_v4  ;;  %v6513_v4 = vld [vmem:[#allocation5 + $0x638] sm:$0xf0]  ;;  %v6916_v18 = vor.u32 %v8706_v26, %v6913_v21  ;;  %v8666_v36 = vld [vmem:[#allocation5 + $0x80c] sm:$0xf] }
 0x22d   :  { %4694 = vmatpush.bf16.msrb.mxu0 %v6580_v44  ;;  %v8702_v44 = vld [vmem:[#allocation5 + $0x92c] sm:$0xf]  ;;  %v6516_v15 = vor.u32 %v8606_v33, %v6513_v4  ;;  %v7121_v25 = vld [vmem:[#allocation5 + $0xaf8] sm:$0xf0] }
 0x22e   :  { %v8758_v10 = vld [vmem:[#allocation5 + $0xaec] sm:$0xf]  ;;  %v7249_v30 = vld [vmem:[#allocation5 + $0xbf8] sm:$0xf0] }
 0x22f   :  { %4708 = vmatpush.bf16.msrb.mxu1 %v6708_v55  ;;  %4722 = vmatpush.bf16.msrb.mxu2 %v6836_v60  ;;  %v6897_v55 = vld [vmem:[#allocation5 + $0x938] sm:$0xf0]  ;;  %v6644_v60 = vor.u32 %v8638_v27, %v6641_v14  ;;  %v8822_v43 = vld [vmem:[#allocation5 + $0xcec] sm:$0xf]  ;;  %v7124_v28 = vor.u32 %v8758_v10, %v7121_v25 }
 0x230   :  { %4736 = vmatpush.bf16.msrb.mxu3 %v6964_v49  ;;  %v6497_v49 = vld [vmem:[#allocation5 + $0x618] sm:$0xf0]  ;;  %v6900_v24 = vor.u32 %v8702_v44, %v6897_v55  ;;  %v8854_v34 = vld [vmem:[#allocation5 + $0xdec] sm:$0xf] }
 0x231   :  { %4695 = vmatpush.bf16.msrb.mxu0 %v6564_v56  ;;  %v8698_v56 = vld [vmem:[#allocation5 + $0x90c] sm:$0xf]  ;;  %v6500_v32 = vor.u32 %v8602_v61, %v6497_v49  ;;  %v7377_v20 = vld [vmem:[#allocation5 + $0xcf8] sm:$0xf0] }
 0x232   :  { %v7105_v50 = vld [vmem:[#allocation5 + $0xad8] sm:$0xf0]  ;;  %v7380_v13 = vor.u32 %v8822_v43, %v7377_v20  ;;  %v8786_v26 = vld [vmem:[#allocation5 + $0xbcc] sm:$0xf]  ;;  %v9771_v20 = vpop.f32.mrf.mxu3 }
 0x233   :  { %4709 = vmatpush.bf16.msrb.mxu1 %v6692_v6  ;;  %4723 = vmatpush.bf16.msrb.mxu2 %v6820_v29  ;;  %v6881_v6 = vld [vmem:[#allocation5 + $0x918] sm:$0xf0]  ;;  %v9757_v29 = vpop.f32.mrf.mxu0  ;;  %v8850_v33 = vld [vmem:[#allocation5 + $0xdcc] sm:$0xf] }
 0x234   :  { %4737 = vmatpush.bf16.msrb.mxu3 %v6948_v31  ;;  %v8790_v31 = vld [vmem:[#allocation5 + $0xbec] sm:$0xf]  ;;  %v6884_v42 = vor.u32 %v8698_v56, %v6881_v6  ;;  %v7233_v21 = vld [vmem:[#allocation5 + $0xbd8] sm:$0xf0] }
 0x235   :  { %4696 = vmatpush.bf16.msrb.mxu0 %v6548_v35  ;;  %v7505_v35 = vld [vmem:[#allocation5 + $0xdf8] sm:$0xf0]  ;;  %v8750_v27 = vld [vmem:[#allocation5 + $0xaac] sm:$0xf] }
 0x236   :  { %v7508_v16 = vor.u32 %v8854_v34, %v7505_v35  ;;  %v7489_v4 = vld [vmem:[#allocation5 + $0xdd8] sm:$0xf0]  ;;  %v8782_v44 = vld [vmem:[#allocation5 + $0xbac] sm:$0xf] }
 0x237   :  { %4710 = vmatpush.bf16.msrb.mxu1 %v6676_v39  ;;  %4724 = vmatpush.bf16.msrb.mxu2 %v6804_v62  ;;  %v6756_v39 = vor.u32 %v8666_v36, %v6753_v51  ;;  %v7252_v62 = vor.u32 %v8790_v31, %v7249_v30  ;;  %v7089_v14 = vld [vmem:[#allocation5 + $0xab8] sm:$0xf0]  ;;  %v7492_v19 = vor.u32 %v8850_v33, %v7489_v4  ;;  %v8814_v61 = vld [vmem:[#allocation5 + $0xcac] sm:$0xf]  ;;  %v9767_v51 = vpop.f32.mrf.mxu2  ;;  %v9769_v30 = vpop.f32.mrf.mxu1 }
 0x238   :  { %4738 = vmatpush.bf16.msrb.mxu3 %v6932_v37  ;;  %v8754_v37 = vld [vmem:[#allocation5 + $0xacc] sm:$0xf]  ;;  %v7217_v55 = vld [vmem:[#allocation5 + $0xbb8] sm:$0xf0]  ;;  %v7092_v17 = vor.u32 %v8750_v27, %v7089_v14 }
 0x239   :  { %4697 = vmatpush.bf16.msrb.mxu0 %v6532_v59  ;;  %v8818_v59 = vld [vmem:[#allocation5 + $0xccc] sm:$0xf]  ;;  %v7473_v49 = vld [vmem:[#allocation5 + $0xdb8] sm:$0xf0] }
 0x23a   :  { %v7073_v36 = vld [vmem:[#allocation5 + $0xa98] sm:$0xf0]  ;;  %v8778_v56 = vld [vmem:[#allocation5 + $0xb8c] sm:$0xf] }
 0x23b   :  { %4711 = vmatpush.bf16.msrb.mxu1 %v6660_v22  ;;  %4725 = vmatpush.bf16.msrb.mxu2 %v6788_v3  ;;  %v7361_v22 = vld [vmem:[#allocation5 + $0xcd8] sm:$0xf0]  ;;  %v7108_v3 = vor.u32 %v8754_v37, %v7105_v50  ;;  %v9763_v47 = vpop.f32.mrf.mxu0  ;;  %v8810_v10 = vld [vmem:[#allocation5 + $0xc8c] sm:$0xf] }
 0x23c   :  { %4739 = vmatpush.bf16.msrb.mxu3 %v6916_v18  ;;  %v7236_v18 = vor.u32 %v8786_v26, %v7233_v21  ;;  %v7364_v45 = vor.u32 %v8818_v59, %v7361_v22  ;;  %v7201_v6 = vld [vmem:[#allocation5 + $0xb98] sm:$0xf0]  ;;  %v8842_v31 = vld [vmem:[#allocation5 + $0xd8c] sm:$0xf] }
 0x23d   :  { %4698 = vmatpush.bf16.msrb.mxu0 %v6516_v15  ;;  %v7345_v15 = vld [vmem:[#allocation5 + $0xcb8] sm:$0xf0]  ;;  %v7204_v43 = vor.u32 %v8778_v56, %v7201_v6  ;;  %v8838_v37 = vld [vmem:[#allocation5 + $0xd6c] sm:$0xf]  ;;  %v9779_v6 = vld [vmem:[#allocation7] sm:$0xf] }
 0x23e   :  { %v7329_v25 = vld [vmem:[#allocation5 + $0xc98] sm:$0xf0]  ;;  %v8738_v26 = vld [vmem:[#allocation5 + $0xa4c] sm:$0xf] }
 0x23f   :  { %4712 = vmatpush.bf16.msrb.mxu1 %v6644_v60  ;;  %4726 = vmatpush.bf16.msrb.mxu2 %v6772_v57  ;;  %v8846_v60 = vld [vmem:[#allocation5 + $0xdac] sm:$0xf]  ;;  %v7220_v57 = vor.u32 %v8782_v44, %v7217_v55  ;;  %v7332_v34 = vor.u32 %v8810_v10, %v7329_v25  ;;  %v7441_v50 = vld [vmem:[#allocation5 + $0xd78] sm:$0xf0]  ;;  %v966_v10 = vperm.slane %v9779_v6, 2  ;;  %v9782_v25 = vpop.f32.mrf.mxu3 }
 0x240   :  { %4740 = vmatpush.bf16.msrb.mxu3 %v6900_v24  ;;  %v8746_v24 = vld [vmem:[#allocation5 + $0xa8c] sm:$0xf]  ;;  %v7041_v21 = vld [vmem:[#allocation5 + $0xa58] sm:$0xf0]  ;;  %v7444_v33 = vor.u32 %v8838_v37, %v7441_v50 }
 0x241   :  { %4699 = vmatpush.bf16.msrb.mxu0 %v6500_v32  ;;  %v8742_v32 = vld [vmem:[#allocation5 + $0xa6c] sm:$0xf]  ;;  %v7297_v27 = vld [vmem:[#allocation5 + $0xc58] sm:$0xf0]  ;;  %v7044_v44 = vor.u32 %v8738_v26, %v7041_v21 }
 0x242   :  { %v8770_v4 = vld [vmem:[#allocation5 + $0xb4c] sm:$0xf]  ;;  %v7409_v56 = vld [vmem:[#allocation5 + $0xd38] sm:$0xf0] }
 0x243   :  { %4713 = vmatpush.bf16.msrb.mxu1 %v6628_v41  ;;  %4727 = vmatpush.bf16.msrb.mxu2 %v6756_v39  ;;  %v7057_v41 = vld [vmem:[#allocation5 + $0xa78] sm:$0xf0]  ;;  %v8774_v39 = vld [vmem:[#allocation5 + $0xb6c] sm:$0xf]  ;;  %v9773_v59 = vpop.f32.mrf.mxu0 }
 0x244   :  { %4741 = vmatpush.bf16.msrb.mxu3 %v6884_v42  ;;  %4700 = vmatmul.bf16.vlgmr.msrb.gmra.mxu0 %v9558_v58  ;;  %v7348_v58 = vor.u32 %v8814_v61, %v7345_v15  ;;  %v7185_v42 = vld [vmem:[#allocation5 + $0xb78] sm:$0xf0]  ;;  %v8834_v14 = vld [vmem:[#allocation5 + $0xd4c] sm:$0xf] }
 0x245   :  { %4748 = vmatpush.bf16.msra.mxu0 %v7124_v28  ;;  %v8806_v28 = vld [vmem:[#allocation5 + $0xc6c] sm:$0xf]  ;;  %v7025_v15 = vld [vmem:[#allocation5 + $0xa38] sm:$0xf0] }
 0x246   :  { %4728 = vmatmul.bf16.vlgmr.msrb.gmra.mxu2 %v9571_v1  ;;  %4714 = vmatmul.bf16.vlgmr.msrb.gmra.mxu1 %v9564_v7  ;;  %v7476_v1 = vor.u32 %v8846_v60, %v7473_v49  ;;  %v7457_v7 = vld [vmem:[#allocation5 + $0xd98] sm:$0xf0]  ;;  %v8734_v61 = vld [vmem:[#allocation5 + $0xa2c] sm:$0xf]  ;;  %v9777_v60 = vpop.f32.mrf.mxu1 }
 0x247   :  { %4762 = vmatpush.bf16.msra.mxu1 %v7252_v62  ;;  %4776 = vmatpush.bf16.msra.mxu2 %v7380_v13  ;;  %v7460_v35 = vor.u32 %v8842_v31, %v7457_v7  ;;  %v7313_v62 = vld [vmem:[#allocation5 + $0xc78] sm:$0xf0]  ;;  %v7060_v13 = vor.u32 %v8742_v32, %v7057_v41  ;;  %v8730_v31 = vld [vmem:[#allocation5 + $0xa0c] sm:$0xf]  ;;  %v7028_v7 = vor.u32 %v8734_v61, %v7025_v15 }
 0x248   :  { %4790 = vmatpush.bf16.msra.mxu3 %v7508_v16  ;;  %v7188_v16 = vor.u32 %v8774_v39, %v7185_v42  ;;  %v7316_v22 = vor.u32 %v8806_v28, %v7313_v62  ;;  %v8762_v32 = vld [vmem:[#allocation5 + $0xb0c] sm:$0xf]  ;;  %v7137_v41 = vld [vmem:[#allocation5 + $0xb18] sm:$0xf0]  ;;  %v9949_v62 = vperm.slane %v9612_v54, 0 }
 0x249   :  { %4742 = vmatmul.bf16.vlgmr.msrb.gmra.mxu3 %v9577_v9  ;;  %4749 = vmatpush.bf16.msra.mxu0 %v7108_v3  ;;  %v7076_v9 = vor.u32 %v8746_v24, %v7073_v36  ;;  %v7169_v3 = vld [vmem:[#allocation5 + $0xb58] sm:$0xf0]  ;;  %v8798_v36 = vld [vmem:[#allocation5 + $0xc2c] sm:$0xf] }
 0x24a   :  { %v7172_v55 = vor.u32 %v8770_v4, %v7169_v3  ;;  %v7153_v24 = vld [vmem:[#allocation5 + $0xb38] sm:$0xf0]  ;;  %v8794_v39 = vld [vmem:[#allocation5 + $0xc0c] sm:$0xf]  ;;  %v3864_v37 = vadd.f32 %v9623_v38, %v9949_v62  ;;  %v7140_v3 = vor.u32 %v8762_v32, %v7137_v41 }
 0x24b   :  { %4763 = vmatpush.bf16.msra.mxu1 %v7236_v18  ;;  %4777 = vmatpush.bf16.msra.mxu2 %v7364_v45  ;;  %v8802_v18 = vld [vmem:[#allocation5 + $0xc4c] sm:$0xf]  ;;  %v7425_v45 = vld [vmem:[#allocation5 + $0xd58] sm:$0xf0]  ;;  %v9787_v26 = vpop.f32.mrf.mxu0 }
 0x24c   :  { %4791 = vmatpush.bf16.msra.mxu3 %v7492_v19  ;;  %v9775_v19 = vpop.f32.mrf.mxu2  ;;  %v7300_v49 = vor.u32 %v8802_v18, %v7297_v27  ;;  %v7265_v42 = vld [vmem:[#allocation5 + $0xc18] sm:$0xf0]  ;;  %v8826_v28 = vld [vmem:[#allocation5 + $0xd0c] sm:$0xf] }
 0x24d   :  { %4750 = vmatpush.bf16.msra.mxu0 %v7092_v17  ;;  %v7428_v17 = vor.u32 %v8834_v14, %v7425_v45  ;;  %v7393_v50 = vld [vmem:[#allocation5 + $0xd18] sm:$0xf0]  ;;  %v8918_v21 = vld [vmem:[#allocation5 + $0xfec] sm:$0xf]  ;;  %v7268_v54 = vor.u32 %v8794_v39, %v7265_v42 }
 0x24e   :  { %v7889_v18 = vld [vmem:[#allocation5 + $0x10f8] sm:$0xf0]  ;;  %v8982_v27 = vld [vmem:[#allocation5 + $0x11ec] sm:$0xf]  ;;  %v7396_v38 = vor.u32 %v8826_v28, %v7393_v50 }
 0x24f   :  { %4764 = vmatpush.bf16.msra.mxu1 %v7220_v57  ;;  %4778 = vmatpush.bf16.msra.mxu2 %v7348_v58  ;;  %v8766_v57 = vld [vmem:[#allocation5 + $0xb2c] sm:$0xf]  ;;  %v7281_v58 = vld [vmem:[#allocation5 + $0xc38] sm:$0xf0] }
 0x250   :  { %4792 = vmatpush.bf16.msra.mxu3 %v7476_v1  ;;  %v8830_v1 = vld [vmem:[#allocation5 + $0xd2c] sm:$0xf]  ;;  %v8017_v14 = vld [vmem:[#allocation5 + $0x11f8] sm:$0xf0] }
 0x251   :  { %4751 = vmatpush.bf16.msra.mxu0 %v7076_v9  ;;  %v7156_v9 = vor.u32 %v8766_v57, %v7153_v24  ;;  %v8882_v15 = vld [vmem:[#allocation5 + $0xecc] sm:$0xf]  ;;  %v9793_v57 = vpop.f32.mrf.mxu1  ;;  %v7729_v62 = vld [vmem:[#allocation5 + $0xfb8] sm:$0xf0] }
 0x252   :  { %v8910_v28 = vld [vmem:[#allocation5 + $0xfac] sm:$0xf] }
 0x253   :  { %4765 = vmatpush.bf16.msra.mxu1 %v7204_v43  ;;  %4779 = vmatpush.bf16.msra.mxu2 %v7332_v34  ;;  %v7009_v43 = vld [vmem:[#allocation5 + $0xa18] sm:$0xf0]  ;;  %v7284_v34 = vor.u32 %v8798_v36, %v7281_v58  ;;  %v8020_v36 = vor.u32 %v8982_v27, %v8017_v14  ;;  %v8914_v58 = vld [vmem:[#allocation5 + $0xfcc] sm:$0xf] }
 0x254   :  { %4793 = vmatpush.bf16.msra.mxu3 %v7460_v35  ;;  %v7412_v35 = vor.u32 %v8830_v1, %v7409_v56  ;;  %v7012_v4 = vor.u32 %v8730_v31, %v7009_v43  ;;  %v9789_v45 = vpop.f32.mrf.mxu2  ;;  %v7745_v1 = vld [vmem:[#allocation5 + $0xfd8] sm:$0xf0]  ;;  %v8946_v56 = vld [vmem:[#allocation5 + $0x10cc] sm:$0xf]  ;;  %v4368_v31 = vadd.f32 %v9763_v47, %v966_v10  ;;  %v9796_v43 = vpop.f32.mrf.mxu3 }
 0x255   :  { %4752 = vmatpush.bf16.msra.mxu0 %v7060_v13  ;;  %v8886_v13 = vld [vmem:[#allocation5 + $0xeec] sm:$0xf]  ;;  %v7748_v41 = vor.u32 %v8914_v58, %v7745_v1  ;;  %v9800_v47 = vpop.f32.mrf.mxu0  ;;  %v7841_v14 = vld [vmem:[#allocation5 + $0x1098] sm:$0xf0] }
 0x256   :  { %v4382_v50 = vadd.f32 %v9769_v30, %v4368_v31  ;;  %v8938_v27 = vld [vmem:[#allocation5 + $0x108c] sm:$0xf]  ;;  %v7697_v1 = vld [vmem:[#allocation5 + $0xf78] sm:$0xf0] }
 0x257   :  { %4766 = vmatpush.bf16.msra.mxu1 %v7188_v16  ;;  %4780 = vmatpush.bf16.msra.mxu2 %v7316_v22  ;;  %v7633_v16 = vld [vmem:[#allocation5 + $0xef8] sm:$0xf0] }
 0x258   :  { %4794 = vmatpush.bf16.msra.mxu3 %v7444_v33  ;;  %v7761_v22 = vld [vmem:[#allocation5 + $0xff8] sm:$0xf0]  ;;  %v8950_v33 = vld [vmem:[#allocation5 + $0x10ec] sm:$0xf] }
 0x259   :  { %4753 = vmatpush.bf16.msra.mxu0 %v7044_v44  ;;  %v3878_v44 = vadd.f32 %v9625_v40, %v3864_v37  ;;  %v7764_v61 = vor.u32 %v8918_v21, %v7761_v22  ;;  %v7892_v24 = vor.u32 %v8950_v33, %v7889_v18  ;;  %v8001_v40 = vld [vmem:[#allocation5 + $0x11d8] sm:$0xf0]  ;;  %v8942_v37 = vld [vmem:[#allocation5 + $0x10ac] sm:$0xf]  ;;  %v7732_v22 = vor.u32 %v8910_v28, %v7729_v62 }
 0x25a   :  { %v8874_v33 = vld [vmem:[#allocation5 + $0xe8c] sm:$0xf] }
 0x25b   :  { %4767 = vmatpush.bf16.msra.mxu1 %v7172_v55  ;;  %4781 = vmatpush.bf16.msra.mxu2 %v7300_v49  ;;  %v7636_v55 = vor.u32 %v8886_v13, %v7633_v16  ;;  %v7617_v49 = vld [vmem:[#allocation5 + $0xed8] sm:$0xf0]  ;;  %v8974_v13 = vld [vmem:[#allocation5 + $0x11ac] sm:$0xf] }
 0x25c   :  { %4795 = vmatpush.bf16.msra.mxu3 %v7428_v17  ;;  %v4366_v17 = vadd.f32 %v9757_v29, %v966_v10  ;;  %v3892_v29 = vadd.f32 %v9627_v5, %v3878_v44  ;;  %v7620_v32 = vor.u32 %v8882_v15, %v7617_v49  ;;  %v7857_v5 = vld [vmem:[#allocation5 + $0x10b8] sm:$0xf0]  ;;  %v8906_v18 = vld [vmem:[#allocation5 + $0xf8c] sm:$0xf] }
 0x25d   :  { %4754 = vmatpush.bf16.msra.mxu0 %v7028_v7  ;;  %v7873_v7 = vld [vmem:[#allocation5 + $0x10d8] sm:$0xf0]  ;;  %v8870_v15 = vld [vmem:[#allocation5 + $0xe6c] sm:$0xf] }
 0x25e   :  { %v4380_v39 = vadd.f32 %v9759_v23, %v4366_v17  ;;  %v7876_v10 = vor.u32 %v8946_v56, %v7873_v7  ;;  %v7985_v16 = vld [vmem:[#allocation5 + $0x11b8] sm:$0xf0]  ;;  %v3906_v23 = vadd.f32 %v9629_v11, %v3892_v29  ;;  %v4396_v11 = vadd.f32 %v9775_v19, %v4382_v50  ;;  %v8902_v19 = vld [vmem:[#allocation5 + $0xf6c] sm:$0xf]  ;;  %v9819_v29 = vpop.f32.mrf.mxu0 }
 0x25f   :  { %4768 = vmatpush.bf16.msra.mxu1 %v7156_v9  ;;  %4782 = vmatpush.bf16.msra.mxu2 %v7284_v34  ;;  %v8978_v9 = vld [vmem:[#allocation5 + $0x11cc] sm:$0xf]  ;;  %v9950_v44 = vld [vmem:[#allocation28_spill] sm:$0xff] }
 0x260   :  { %4796 = vmatpush.bf16.msra.mxu3 %v7412_v35  ;;  %v8878_v34 = vld [vmem:[#allocation5 + $0xeac] sm:$0xf]  ;;  %v7601_v35 = vld [vmem:[#allocation5 + $0xeb8] sm:$0xf0]  ;;  %v8004_v42 = vor.u32 %v8978_v9, %v8001_v40  ;;  %v4394_v30 = vadd.f32 %v9767_v51, %v4380_v39  ;;  %v4410_v31 = vadd.f32 %v9782_v25, %v4396_v11 }
 0x261   :  { %4755 = vmatpush.bf16.msra.mxu0 %v7012_v4  ;;  %v7604_v21 = vor.u32 %v8878_v34, %v7601_v35  ;;  %v7585_v4 = vld [vmem:[#allocation5 + $0xe98] sm:$0xf0]  ;;  %v8934_v56 = vld [vmem:[#allocation5 + $0x106c] sm:$0xf]  ;;  %v7700_v34 = vor.u32 %v8902_v19, %v7697_v1 }
 0x262   :  { %v7588_v51 = vor.u32 %v8874_v33, %v7585_v4  ;;  %v7569_v49 = vld [vmem:[#allocation5 + $0xe78] sm:$0xf0]  ;;  %v4408_v17 = vadd.f32 %v9771_v20, %v4394_v30  ;;  %v8966_v9 = vld [vmem:[#allocation5 + $0x116c] sm:$0xf] }
 0x263   :  { %4769 = vmatpush.bf16.msra.mxu1 %v7140_v3  ;;  %4783 = vmatpush.bf16.msra.mxu2 %v7268_v54  ;;  %v7860_v3 = vor.u32 %v8942_v37, %v7857_v5  ;;  %v8970_v54 = vld [vmem:[#allocation5 + $0x118c] sm:$0xf]  ;;  %v7825_v7 = vld [vmem:[#allocation5 + $0x1078] sm:$0xf0]  ;;  %v7572_v20 = vor.u32 %v8870_v15, %v7569_v49  ;;  %v4424_v5 = vadd.f32 %v9787_v26, %v4410_v31 }
 0x264   :  { %4797 = vmatpush.bf16.msra.mxu3 %v7396_v38  ;;  %4756 = vmatmul.bf16.vlgmr.msra.gmra.mxu0 %v9574_v2  ;;  %v9809_v2 = vpop.f32.mrf.mxu2  ;;  %v7969_v38 = vld [vmem:[#allocation5 + $0x1198] sm:$0xf0]  ;;  %v8866_v35 = vld [vmem:[#allocation5 + $0xe4c] sm:$0xf]  ;;  %v7828_v25 = vor.u32 %v8934_v56, %v7825_v7 }
 0x265   :  { %4804 = vmatpush.bf16.msrb.mxu0 %v7636_v55  ;;  %v3920_v55 = vadd.f32 %v9950_v44, %v3906_v23  ;;  %v7972_v58 = vor.u32 %v8970_v54, %v7969_v38  ;;  %v7953_v40 = vld [vmem:[#allocation5 + $0x1178] sm:$0xf0]  ;;  %v8898_v62 = vld [vmem:[#allocation5 + $0xf4c] sm:$0xf]  ;;  %v4438_v54 = vadd.f32 %v9793_v57, %v4424_v5 }
 0x266   :  { %4784 = vmatmul.bf16.vlgmr.msra.gmra.mxu2 %v9587_v52  ;;  %4770 = vmatmul.bf16.vlgmr.msra.gmra.mxu1 %v9580_v48  ;;  %v9811_v52 = vpop.f32.mrf.mxu1  ;;  %v7988_v48 = vor.u32 %v8974_v13, %v7985_v16  ;;  %v7553_v39 = vld [vmem:[#allocation5 + $0xe58] sm:$0xf0]  ;;  %v7956_v28 = vor.u32 %v8966_v9, %v7953_v40  ;;  %v8930_v50 = vld [vmem:[#allocation5 + $0x104c] sm:$0xf]  ;;  %v9834_v15 = vpop.f32.mrf.mxu0 }
 0x267   :  { %4818 = vmatpush.bf16.msrb.mxu1 %v7764_v61  ;;  %4832 = vmatpush.bf16.msrb.mxu2 %v7892_v24  ;;  %v9816_v24 = vpop.f32.mrf.mxu3  ;;  %v7681_v37 = vld [vmem:[#allocation5 + $0xf58] sm:$0xf0]  ;;  %v8962_v16 = vld [vmem:[#allocation5 + $0x114c] sm:$0xf] }
 0x268   :  { %4846 = vmatpush.bf16.msrb.mxu3 %v8020_v36  ;;  %v7844_v36 = vor.u32 %v8938_v27, %v7841_v14  ;;  %v7809_v13 = vld [vmem:[#allocation5 + $0x1058] sm:$0xf0]  ;;  %v7684_v4 = vor.u32 %v8898_v62, %v7681_v37  ;;  %v8862_v30 = vld [vmem:[#allocation5 + $0xe2c] sm:$0xf]  ;;  %v8215_v37 = vld [vmem:[#allocation8 + $0x170] sm:$0xf] }
 0x269   :  { %4798 = vmatmul.bf16.vlgmr.msra.gmra.mxu3 %v9593_v63  ;;  %4805 = vmatpush.bf16.msrb.mxu0 %v7620_v32  ;;  %v7713_v63 = vld [vmem:[#allocation5 + $0xf98] sm:$0xf0]  ;;  %v9951_v32 = vld [vmem:[#allocation29_spill] sm:$0xff]  ;;  %v7812_v26 = vor.u32 %v8930_v50, %v7809_v13  ;;  %v8894_v27 = vld [vmem:[#allocation5 + $0xf2c] sm:$0xf] }
 0x26a   :  { %v7716_v61 = vor.u32 %v8906_v18, %v7713_v63  ;;  %v7937_v23 = vld [vmem:[#allocation5 + $0x1158] sm:$0xf0]  ;;  %v8926_v14 = vld [vmem:[#allocation5 + $0x102c] sm:$0xf] }
 0x26b   :  { %4819 = vmatpush.bf16.msrb.mxu1 %v7748_v41  ;;  %4833 = vmatpush.bf16.msrb.mxu2 %v7876_v10  ;;  %v3934_v41 = vadd.f32 %v9951_v32, %v3920_v55  ;;  %v4422_v10 = vadd.f32 %v9773_v59, %v4408_v17  ;;  %v7556_v59 = vor.u32 %v8866_v35, %v7553_v39  ;;  %v7665_v11 = vld [vmem:[#allocation5 + $0xf38] sm:$0xf0]  ;;  %v8958_v44 = vld [vmem:[#allocation5 + $0x112c] sm:$0xf] }
 0x26c   :  { %4847 = vmatpush.bf16.msrb.mxu3 %v8004_v42  ;;  %v9823_v42 = vpop.f32.mrf.mxu2  ;;  %v7940_v63 = vor.u32 %v8962_v16, %v7937_v23  ;;  %v7793_v38 = vld [vmem:[#allocation5 + $0x1038] sm:$0xf0]  ;;  %v7668_v17 = vor.u32 %v8894_v27, %v7665_v11  ;;  %v8890_v19 = vld [vmem:[#allocation5 + $0xf0c] sm:$0xf] }
 0x26d   :  { %4806 = vmatpush.bf16.msrb.mxu0 %v7604_v21  ;;  %v9952_v21 = vld [vmem:[#allocation30_spill] sm:$0xff]  ;;  %v7921_v55 = vld [vmem:[#allocation5 + $0x1138] sm:$0xf0]  ;;  %v7796_v57 = vor.u32 %v8926_v14, %v7793_v38 }
 0x26e   :  { %v9827_v33 = vpop.f32.mrf.mxu1  ;;  %v7924_v56 = vor.u32 %v8958_v44, %v7921_v55  ;;  %v7649_v31 = vld [vmem:[#allocation5 + $0xf18] sm:$0xf0]  ;;  %v8922_v7 = vld [vmem:[#allocation5 + $0x100c] sm:$0xf]  ;;  %v4535_v38 = vpop.f32.mrf.mxu0  ;;  %v8071_v55 = vld [vmem:[#allocation8 + $0x50] sm:$0xf] }
 0x26f   :  { %4820 = vmatpush.bf16.msrb.mxu1 %v7732_v22  ;;  %4834 = vmatpush.bf16.msrb.mxu2 %v7860_v3  ;;  %v3948_v22 = vadd.f32 %v9952_v21, %v3934_v41  ;;  %v7537_v3 = vld [vmem:[#allocation5 + $0xe38] sm:$0xf0]  ;;  %v9830_v18 = vpop.f32.mrf.mxu3  ;;  %v8954_v40 = vld [vmem:[#allocation5 + $0x110c] sm:$0xf]  ;;  %v8087_v41 = vld [vmem:[#allocation8 + $0x70] sm:$0xf]  ;;  %v7652_v62 = vor.u32 %v8890_v19, %v7649_v31 }
 0x270   :  { %4848 = vmatpush.bf16.msrb.mxu3 %v7988_v48  ;;  %v4436_v48 = vadd.f32 %v9777_v60, %v4422_v10  ;;  %v4452_v60 = vadd.f32 %v9809_v2, %v4438_v54  ;;  %v7540_v49 = vor.u32 %v8862_v30, %v7537_v3  ;;  %v7777_v9 = vld [vmem:[#allocation5 + $0x1018] sm:$0xf0]  ;;  %v8151_v10 = vld [vmem:[#allocation8 + $0xf0] sm:$0xf]  ;;  %v9014_v27 = vld [vmem:[#allocation8 + $0xe4] sm:$0xf0] }
 0x271   :  { %4807 = vmatpush.bf16.msrb.mxu0 %v7588_v51  ;;  %v9953_v51 = vld [vmem:[#allocation31_spill] sm:$0xff]  ;;  %v7905_v32 = vld [vmem:[#allocation5 + $0x1118] sm:$0xf0]  ;;  %v7780_v13 = vor.u32 %v8922_v7, %v7777_v9  ;;  %v9030_v11 = vld [vmem:[#allocation8 + $0x164] sm:$0xf0] }
 0x272   :  { %v4450_v1 = vadd.f32 %v9789_v45, %v4436_v48  ;;  %v9954_v2 = vld [vmem:[#allocation32_spill] sm:$0xff]  ;;  %v4466_v45 = vadd.f32 %v9816_v24, %v4452_v60  ;;  %v7908_v16 = vor.u32 %v8954_v40, %v7905_v32  ;;  %v9956_v14 = vld [vmem:[#allocation34_spill] sm:$0xff]  ;;  %v8063_v7 = vld [vmem:[#allocation8 + $0x40] sm:$0xf] }
 0x273   :  { %4821 = vmatpush.bf16.msrb.mxu1 %v7716_v61  ;;  %4835 = vmatpush.bf16.msrb.mxu2 %v7844_v36  ;;  %v3962_v61 = vadd.f32 %v9953_v51, %v3948_v22  ;;  %v8858_v36 = vld [vmem:[#allocation5 + $0xe0c] sm:$0xf]  ;;  %v9000_v39 = vld [vmem:[#allocation8 + $0x74] sm:$0xf0] }
 0x274   :  { %4849 = vmatpush.bf16.msrb.mxu3 %v7972_v58  ;;  %v7521_v58 = vld [vmem:[#allocation5 + $0xe18] sm:$0xf0]  ;;  %v4464_v5 = vadd.f32 %v9796_v43, %v4450_v1  ;;  %v4480_v23 = vadd.f32 %v9819_v29, %v4466_v45  ;;  %v8088_v21 = vor.u32 %v9000_v39, %v8087_v41  ;;  %v8207_v43 = vld [vmem:[#allocation8 + $0x160] sm:$0xf]  ;;  %v9957_v1 = vld [vmem:[#allocation35_spill] sm:$0xff] }
 0x275   :  { %4808 = vmatpush.bf16.msrb.mxu0 %v7572_v20  ;;  %v3976_v20 = vadd.f32 %v9954_v2, %v3962_v61  ;;  %v9032_v50 = vld [vmem:[#allocation8 + $0x174] sm:$0xf0]  ;;  %v8208_v60 = vor.u32 %v9030_v11, %v8207_v43  ;;  %v8127_v41 = vld [vmem:[#allocation8 + $0xc0] sm:$0xf]  ;;  %v9010_v2 = vld [vmem:[#allocation8 + $0xc4] sm:$0xf0] }
 0x276   :  { %v9839_v35 = vpop.f32.mrf.mxu1  ;;  %v4478_v24 = vadd.f32 %v9800_v47, %v4464_v5  ;;  %v8216_v48 = vor.u32 %v9032_v50, %v8215_v37  ;;  %v4494_v29 = vadd.f32 %v9827_v33, %v4480_v23  ;;  %v8199_v33 = vld [vmem:[#allocation8 + $0x150] sm:$0xf]  ;;  %v9028_v19 = vld [vmem:[#allocation8 + $0x154] sm:$0xf0]  ;;  %v9026_v39 = vld [vmem:[#allocation8 + $0x144] sm:$0xf0]  ;;  %v8128_v45 = vor.u32 %v9010_v2, %v8127_v41 }
 0x277   :  { %4822 = vmatpush.bf16.msrb.mxu1 %v7700_v34  ;;  %4836 = vmatpush.bf16.msrb.mxu2 %v7828_v25  ;;  %v4507_v34 = vpop.f32.mrf.mxu2  ;;  %v9016_v25 = vld [vmem:[#allocation8 + $0xf4] sm:$0xf0]  ;;  %v4521_v3 = vpop.f32.mrf.mxu3  ;;  %v8111_v43 = vld [vmem:[#allocation8 + $0xa0] sm:$0xf]  ;;  %v9006_v11 = vld [vmem:[#allocation8 + $0xa4] sm:$0xf0] }
 0x278   :  { %4850 = vmatpush.bf16.msrb.mxu3 %v7956_v28  ;;  %v7524_v28 = vor.u32 %v8858_v36, %v7521_v58  ;;  %v8152_v22 = vor.u32 %v9016_v25, %v8151_v10  ;;  %v4492_v51 = vadd.f32 %v9811_v52, %v4478_v24  ;;  %v9012_v36 = vld [vmem:[#allocation8 + $0xd4] sm:$0xf0]  ;;  %v4508_v58 = vadd.f32 %v4507_v34, %v4494_v29  ;;  %v8191_v34 = vld [vmem:[#allocation8 + $0x140] sm:$0xf]  ;;  %v9961_v29 = vld [vmem:[#allocation39_spill] sm:$0xff] }
 0x279   :  { %4809 = vmatpush.bf16.msrb.mxu0 %v7556_v59  ;;  %v8079_v59 = vld [vmem:[#allocation8 + $0x60] sm:$0xf]  ;;  %v9958_v9 = vld [vmem:[#allocation36_spill] sm:$0xff]  ;;  %v8192_v5 = vor.u32 %v9026_v39, %v8191_v34  ;;  %v9002_v34 = vld [vmem:[#allocation8 + $0x84] sm:$0xf0] }
 0x27a   :  { %v4506_v52 = vadd.f32 %v9823_v42, %v4492_v51  ;;  %v9008_v23 = vld [vmem:[#allocation8 + $0xb4] sm:$0xf0]  ;;  %v8159_v39 = vld [vmem:[#allocation8 + $0x100] sm:$0xf] }
 0x27b   :  { %4823 = vmatpush.bf16.msrb.mxu1 %v7684_v4  ;;  %4837 = vmatpush.bf16.msrb.mxu2 %v7812_v26  ;;  %v9955_v4 = vld [vmem:[#allocation33_spill] sm:$0xff]  ;;  %v8998_v26 = vld [vmem:[#allocation8 + $0x64] sm:$0xf0] }
 0x27c   :  { %4851 = vmatpush.bf16.msrb.mxu3 %v7940_v63  ;;  %v3990_v30 = vadd.f32 %v9955_v4, %v3976_v20  ;;  %v8143_v63 = vld [vmem:[#allocation8 + $0xe0] sm:$0xf]  ;;  %v8080_v44 = vor.u32 %v8998_v26, %v8079_v59  ;;  %v4522_v20 = vadd.f32 %v4521_v3, %v4508_v58  ;;  %v4520_v42 = vadd.f32 %v9830_v18, %v4506_v52  ;;  %v9960_v18 = vld [vmem:[#allocation38_spill] sm:$0xff]  ;;  %v8167_v52 = vld [vmem:[#allocation8 + $0x110] sm:$0xf] }
 0x27d   :  { %4810 = vmatpush.bf16.msrb.mxu0 %v7540_v49  ;;  %v8144_v47 = vor.u32 %v9014_v27, %v8143_v63  ;;  %v8996_v49 = vld [vmem:[#allocation8 + $0x54] sm:$0xf0]  ;;  %v8047_v26 = vld [vmem:[#allocation8 + $0x20] sm:$0xf]  ;;  %v8990_v27 = vld [vmem:[#allocation8 + $0x24] sm:$0xf0] }
 0x27e   :  { %v4004_v54 = vadd.f32 %v9956_v14, %v3990_v30  ;;  %v4534_v50 = vadd.f32 %v9834_v15, %v4520_v42  ;;  %v8048_v51 = vor.u32 %v8990_v27, %v8047_v26  ;;  %v9018_v42 = vld [vmem:[#allocation8 + $0x104] sm:$0xf0]  ;;  %v9964_v26 = vld [vmem:[#allocation40_spill] sm:$0xff] }
 0x27f   :  { %4824 = vmatpush.bf16.msrb.mxu1 %v7668_v17  ;;  %4838 = vmatpush.bf16.msrb.mxu2 %v7796_v57  ;;  %v9849_v61 = vpop.f32.mrf.mxu2  ;;  %v8135_v17 = vld [vmem:[#allocation8 + $0xd0] sm:$0xf]  ;;  %v4575_v32 = vpop.f32.mrf.mxu3  ;;  %vm4860_vm5 = vcmp.gt.f32.partialorder %v9964_v26, 1.0  ;;  %v8073_v27 = vld [vmem:[#allocation8 + $0x58] sm:$0xf0] }
 0x280   :  { %4852 = vmatpush.bf16.msrb.mxu3 %v7924_v56  ;;  %v4018_v57 = vadd.f32 %v9957_v1, %v4004_v54  ;;  %v4549_v56 = vpop.f32.mrf.mxu1  ;;  %v8136_v31 = vor.u32 %v9012_v36, %v8135_v17  ;;  %v4548_v15 = vadd.f32 %v9839_v35, %v4534_v50  ;;  %v8175_v54 = vld [vmem:[#allocation8 + $0x120] sm:$0xf]  ;;  %v9004_v1 = vld [vmem:[#allocation8 + $0x94] sm:$0xf0] }
 0x281   :  { %4811 = vmatpush.bf16.msrb.mxu0 %v7524_v28  ;;  %v9859_v10 = vpop.f32.mrf.mxu0  ;;  %v8055_v28 = vld [vmem:[#allocation8 + $0x30] sm:$0xf]  ;;  %v9962_v17 = vld [vmem:[#allocation41_spill] sm:$0xff] }
 0x282   :  { %v4032_v40 = vadd.f32 %v9958_v9, %v4018_v57  ;;  %v8031_v9 = vld [vmem:[#allocation8] sm:$0xf] }
 0x283   :  { %4825 = vmatpush.bf16.msrb.mxu1 %v7652_v62  ;;  %4839 = vmatpush.bf16.msrb.mxu2 %v7780_v13  ;;  %v9959_v62 = vld [vmem:[#allocation37_spill] sm:$0xff]  ;;  %v8992_v13 = vld [vmem:[#allocation8 + $0x34] sm:$0xf0] }
 0x284   :  { %4853 = vmatpush.bf16.msrb.mxu3 %v7908_v16  ;;  %4812 = vmatmul.bf16.vlgmr.msrb.gmra.mxu0 %v9590_v53  ;;  %v8072_v53 = vor.u32 %v8996_v49, %v8071_v55  ;;  %v4046_v37 = vadd.f32 %v9959_v62, %v4032_v40  ;;  %v8119_v16 = vld [vmem:[#allocation8 + $0xb0] sm:$0xf]  ;;  %v8056_v3 = vor.u32 %v8992_v13, %v8055_v28  ;;  %v8986_v40 = vld [vmem:[#allocation8 + $0x4] sm:$0xf0]  ;;  %v8153_v28 = vld [vmem:[#allocation8 + $0xf8] sm:$0xf0] }
 0x285   :  { %5278 = vmatpush.bf16.msra.mxu0 %v8088_v21  ;;  %v8183_v21 = vld [vmem:[#allocation8 + $0x130] sm:$0xf]  ;;  %v9031_v62 = vld [vmem:[#allocation8 + $0x174] sm:$0xf] }
 0x286   :  { %4826 = vmatmul.bf16.vlgmr.msrb.gmra.mxu1 %v9596_v0  ;;  %4840 = vmatmul.bf16.vlgmr.msrb.gmra.mxu2 %v9603_v8  ;;  %v8200_v0 = vor.u32 %v9028_v19, %v8199_v33  ;;  %v8994_v8 = vld [vmem:[#allocation8 + $0x44] sm:$0xf0]  ;;  %v4060_v59 = vadd.f32 %v9960_v18, %v4046_v37  ;;  %v8039_v49 = vld [vmem:[#allocation8 + $0x10] sm:$0xf]  ;;  %v8988_v33 = vld [vmem:[#allocation8 + $0x14] sm:$0xf0] }
 0x287   :  { %5292 = vmatpush.bf16.msra.mxu1 %v8152_v22  ;;  %5306 = vmatpush.bf16.msra.mxu2 %v8216_v48  ;;  %v8064_v25 = vor.u32 %v8994_v8, %v8063_v7  ;;  %v9024_v22 = vld [vmem:[#allocation8 + $0x134] sm:$0xf0]  ;;  %v4563_v4 = vpop.f32.mrf.mxu2  ;;  %v8120_v48 = vor.u32 %v9008_v23, %v8119_v16  ;;  %v4577_v55 = vpop.f32.mrf.mxu3  ;;  %v8103_v19 = vld [vmem:[#allocation8 + $0x90] sm:$0xf]  ;;  %v9963_v8 = vld [vmem:[#allocation42_spill] sm:$0xff]  ;;  %v8160_v16 = vor.u32 %v9018_v42, %v8159_v39 }
 0x288   :  { %4854 = vmatmul.bf16.vlgmr.msrb.gmra.mxu3 %v9606_v12  ;;  %v4536_v12 = vadd.f32 %v4535_v38, %v4522_v20  ;;  %v9864_v30 = vpop.f32.mrf.mxu1  ;;  %v8184_v63 = vor.u32 %v9024_v22, %v8183_v21  ;;  %v9022_v38 = vld [vmem:[#allocation8 + $0x124] sm:$0xf0]  ;;  %v8104_v7 = vor.u32 %v9004_v1, %v8103_v19  ;;  %v8217_v37 = vld [vmem:[#allocation8 + $0x178] sm:$0xf0]  ;;  %v8177_v39 = vld [vmem:[#allocation8 + $0x128] sm:$0xf0] }
 0x289   :  { %5279 = vmatpush.bf16.msra.mxu0 %v8080_v44  ;;  %v4074_v44 = vadd.f32 %v9961_v29, %v4060_v59  ;;  %v4591_v36 = vpop.f32.mrf.mxu0  ;;  %v8176_v58 = vor.u32 %v9022_v38, %v8175_v54  ;;  %v8220_v18 = vor.u32 %v9031_v62, %v8217_v37  ;;  %v8081_v59 = vld [vmem:[#allocation8 + $0x68] sm:$0xf0]  ;;  %v8137_v54 = vld [vmem:[#allocation8 + $0xd8] sm:$0xf0]  ;;  %v9420_v29 = vmov 1.0|1.0  }
 0x28a   :  { %v4550_v24 = vadd.f32 %v4549_v56, %v4536_v12  ;;  %v9020_v56 = vld [vmem:[#allocation8 + $0x114] sm:$0xf0]  ;;  %v8105_v62 = vld [vmem:[#allocation8 + $0x98] sm:$0xf0]  ;;  %v9019_v37 = vld [vmem:[#allocation8 + $0x114] sm:$0xf] }
 0x28b   :  { %5293 = vmatpush.bf16.msra.mxu1 %v8144_v47  ;;  %5307 = vmatpush.bf16.msra.mxu2 %v8208_v60  ;;  %v4562_v47 = vadd.f32 %v9849_v61, %v4548_v15  ;;  %v8112_v60 = vor.u32 %v9006_v11, %v8111_v43  ;;  %v4088_v35 = vadd.f32 %v9962_v17, %v4074_v44  ;;  %v9027_v44 = vld [vmem:[#allocation8 + $0x154] sm:$0xf]  ;;  %v8065_v17 = vld [vmem:[#allocation8 + $0x48] sm:$0xf0]  ;;  %v967_v38 = vperm.slane %v9779_v6, 3 }
 0x28c   :  { %v4564_v14 = vadd.f32 %v4563_v4, %v4550_v24  ;;  %v8040_v61 = vor.u32 %v8988_v33, %v8039_v49  ;;  %v8168_v20 = vor.u32 %v9020_v56, %v8167_v52  ;;  %v9013_v4 = vld [vmem:[#allocation8 + $0xe4] sm:$0xf]  ;;  %v8145_v24 = vld [vmem:[#allocation8 + $0xe8] sm:$0xf0]  ;;  %v8991_v52 = vld [vmem:[#allocation8 + $0x34] sm:$0xf] }
 0x28d   :  { %5280 = vmatpush.bf16.msra.mxu0 %v8072_v53  ;;  %v4576_v53 = vadd.f32 %v4575_v32, %v4562_v47  ;;  %v4102_v41 = vadd.f32 %v9963_v8, %v4088_v35  ;;  %v8089_v32 = vld [vmem:[#allocation8 + $0x78] sm:$0xf0]  ;;  %v8148_v43 = vor.u32 %v9013_v4, %v8145_v24  ;;  %v8993_v49 = vld [vmem:[#allocation8 + $0x44] sm:$0xf]  ;;  %v8193_v33 = vld [vmem:[#allocation8 + $0x148] sm:$0xf0] }
 0x28e   :  { %v4578_v57 = vadd.f32 %v4577_v55, %v4564_v14  ;;  %v9011_v14 = vld [vmem:[#allocation8 + $0xd4] sm:$0xf]  ;;  %v8201_v47 = vld [vmem:[#allocation8 + $0x158] sm:$0xf0]  ;;  %v9009_v35 = vld [vmem:[#allocation8 + $0xc4] sm:$0xf]  ;;  %v8068_v19 = vor.u32 %v8993_v49, %v8065_v17 }
 0x28f   :  { %5294 = vmatpush.bf16.msra.mxu1 %v8136_v31  ;;  %5308 = vmatpush.bf16.msra.mxu2 %v8200_v0  ;;  %v8095_v0 = vld [vmem:[#allocation8 + $0x80] sm:$0xf]  ;;  %v4590_v12 = vadd.f32 %v9859_v10, %v4576_v53  ;;  %vm4864_vm3 = vcmp.gt.f32.partialorder %v4102_v41, 1.0  ;;  %v8997_v10 = vld [vmem:[#allocation8 + $0x64] sm:$0xf]  ;;  %v4631_v26 = vpop.f32.mrf.mxu3 }
 0x290   :  { %v4592_v31 = vadd.f32 %v4591_v36, %v4578_v57  ;;  %v4605_v2 = vpop.f32.mrf.mxu1  ;;  %v8096_v13 = vor.u32 %v9002_v34, %v8095_v0  ;;  %v8084_v15 = vor.u32 %v8997_v10, %v8081_v59  ;;  %vm9875_vm6 = vmpackc.low %vm4864_vm3, %vm4860_vm5  ;;  %v8129_v36 = vld [vmem:[#allocation8 + $0xc8] sm:$0xf0]  ;;  %v8057_v56 = vld [vmem:[#allocation8 + $0x38] sm:$0xf0] }
 0x291   :  { %5281 = vmatpush.bf16.msra.mxu0 %v8064_v25  ;;  %v8999_v25 = vld [vmem:[#allocation8 + $0x74] sm:$0xf]  ;;  %v4604_v21 = vadd.f32 %v9864_v30, %v4590_v12  ;;  %v8132_v1 = vor.u32 %v9009_v35, %v8129_v36  ;;  %v8989_v8 = vld [vmem:[#allocation8 + $0x24] sm:$0xf]  ;;  %v8049_v41 = vld [vmem:[#allocation8 + $0x28] sm:$0xf0] }
 0x292   :  { %v4606_v50 = vadd.f32 %v4605_v2, %v4592_v31  ;;  %v8092_v23 = vor.u32 %v8999_v25, %v8089_v32  ;;  %v9007_v53 = vld [vmem:[#allocation8 + $0xb4] sm:$0xf]  ;;  %v8121_v31 = vld [vmem:[#allocation8 + $0xb8] sm:$0xf0]  ;;  %v9005_v2 = vld [vmem:[#allocation8 + $0xa4] sm:$0xf]  ;;  %v8052_v42 = vor.u32 %v8989_v8, %v8049_v41 }
 0x293   :  { %5295 = vmatpush.bf16.msra.mxu1 %v8128_v45  ;;  %5309 = vmatpush.bf16.msra.mxu2 %v8192_v5  ;;  %v9015_v45 = vld [vmem:[#allocation8 + $0xf4] sm:$0xf]  ;;  %v8032_v5 = vor.u32 %v8986_v40, %v8031_v9  ;;  %vm4862_vm7 = vcmp.gt.f32.partialorder %v4604_v21, 1.0  ;;  %v8060_v9 = vor.u32 %v8991_v52, %v8057_v56  ;;  %v8124_v40 = vor.u32 %v9007_v53, %v8121_v31  ;;  %v9021_v34 = vld [vmem:[#allocation8 + $0x124] sm:$0xf] }
 0x294   :  { %v8156_v22 = vor.u32 %v9015_v45, %v8153_v28  ;;  %vm4866_vm4 = vcmp.gt.f32.partialorder %v4606_v50, 1.0  ;;  %v8180_v25 = vor.u32 %v9021_v34, %v8177_v39  ;;  %v8987_v32 = vld [vmem:[#allocation8 + $0x14] sm:$0xf]  ;;  %v8041_v45 = vld [vmem:[#allocation8 + $0x18] sm:$0xf0] }
 0x295   :  { %5282 = vmatpush.bf16.msra.mxu0 %v8056_v3  ;;  %v9029_v3 = vld [vmem:[#allocation8 + $0x164] sm:$0xf]  ;;  %vm9880_vm8 = vmpackc.low %vm4866_vm4, %vm4862_vm7  ;;  %v9003_v28 = vld [vmem:[#allocation8 + $0x94] sm:$0xf] }
 0x296   :  { %v8169_v50 = vld [vmem:[#allocation8 + $0x118] sm:$0xf0]  ;;  %v8033_v21 = vld [vmem:[#allocation8 + $0x8] sm:$0xf0]  ;;  %v9017_v10 = vld [vmem:[#allocation8 + $0x104] sm:$0xf] }
 0x297   :  { %5296 = vmatpush.bf16.msra.mxu1 %v8120_v48  ;;  %5310 = vmatpush.bf16.msra.mxu2 %v8184_v63  ;;  %v8209_v48 = vld [vmem:[#allocation8 + $0x168] sm:$0xf0]  ;;  %v8995_v63 = vld [vmem:[#allocation8 + $0x54] sm:$0xf]  ;;  %v8255_v35 = vld [vmem:[#allocation8 + $0x1c0] sm:$0xf] }
 0x298   :  { %v8212_v11 = vor.u32 %v9029_v3, %v8209_v48  ;;  %v8076_v55 = vor.u32 %v8995_v63, %v8073_v27  ;;  %v8161_v59 = vld [vmem:[#allocation8 + $0x108] sm:$0xf0]  ;;  %v4617_v48 = vpop.f32.mrf.mxu2  ;;  %v4633_v63 = vpop.f32.mrf.mxu3  ;;  %v9042_v36 = vld [vmem:[#allocation8 + $0x1c4] sm:$0xf0]  ;;  %v8239_v56 = vld [vmem:[#allocation8 + $0x1a0] sm:$0xf] }
 0x299   :  { %5283 = vmatpush.bf16.msra.mxu0 %v8048_v51  ;;  %v8140_v51 = vor.u32 %v9011_v14, %v8137_v54  ;;  %v8164_v3 = vor.u32 %v9017_v10, %v8161_v59  ;;  %v9038_v53 = vld [vmem:[#allocation8 + $0x1a4] sm:$0xf0]  ;;  %v9036_v34 = vld [vmem:[#allocation8 + $0x194] sm:$0xf0]  ;;  %v8223_v39 = vld [vmem:[#allocation8 + $0x180] sm:$0xf] }
 0x29a   :  { %v8273_v10 = vld [vmem:[#allocation8 + $0x1e8] sm:$0xf0] }
 0x29b   :  { %5297 = vmatpush.bf16.msra.mxu1 %v8112_v60  ;;  %5311 = vmatpush.bf16.msra.mxu2 %v8176_v58  ;;  %v8204_v60 = vor.u32 %v9027_v44, %v8201_v47  ;;  %v9025_v58 = vld [vmem:[#allocation8 + $0x144] sm:$0xf]  ;;  %v8271_v44 = vld [vmem:[#allocation8 + $0x1e0] sm:$0xf]  ;;  %v9046_v47 = vld [vmem:[#allocation8 + $0x1e4] sm:$0xf0] }
 0x29c   :  { %v8196_v57 = vor.u32 %v9025_v58, %v8193_v33  ;;  %v8272_v30 = vor.u32 %v9046_v47, %v8271_v44  ;;  %v8256_v58 = vor.u32 %v9042_v36, %v8255_v35  ;;  %v8247_v33 = vld [vmem:[#allocation8 + $0x1b0] sm:$0xf]  ;;  %v9041_v47 = vld [vmem:[#allocation8 + $0x1c4] sm:$0xf] }
 0x29d   :  { %5284 = vmatpush.bf16.msra.mxu0 %v8040_v61  ;;  %v9023_v61 = vld [vmem:[#allocation8 + $0x134] sm:$0xf] }
 0x29f   :  { %5298 = vmatpush.bf16.msra.mxu1 %v8104_v7  ;;  %5312 = vmatpush.bf16.msra.mxu2 %v8168_v20  ;;  %v8185_v7 = vld [vmem:[#allocation8 + $0x138] sm:$0xf0]  ;;  %v8113_v20 = vld [vmem:[#allocation8 + $0xa8] sm:$0xf0] }
 0x2a0   :  { %v8188_v0 = vor.u32 %v9023_v61, %v8185_v7  ;;  %v8116_v12 = vor.u32 %v9005_v2, %v8113_v20  ;;  %v8231_v20 = vld [vmem:[#allocation8 + $0x190] sm:$0xf] }
 0x2a1   :  { %5285 = vmatpush.bf16.msra.mxu0 %v8032_v5  ;;  %v8044_v5 = vor.u32 %v8987_v32, %v8041_v45  ;;  %v4645_v27 = vpop.f32.mrf.mxu0  ;;  %v9034_v32 = vld [vmem:[#allocation8 + $0x184] sm:$0xf0] }
 0x2a3   :  { %5299 = vmatpush.bf16.msra.mxu1 %v8096_v13  ;;  %5313 = vmatpush.bf16.msra.mxu2 %v8160_v16  ;;  %v8108_v13 = vor.u32 %v9003_v28, %v8105_v62  ;;  %v8172_v16 = vor.u32 %v9019_v37, %v8169_v50  ;;  %v4659_v54 = vpop.f32.mrf.mxu1  ;;  %v8224_v62 = vor.u32 %v9034_v32, %v8223_v39 }
 0x2a4   :  { %8286 = vmatmul.msk.bf16.vlgmr.msra.gmra.mxu0 %vm9875_vm6, %v9420_v29 }
 0x2a5   :  { %5334 = vmatpush.bf16.msrb.mxu0 %v8092_v23  ;;  %v8985_v23 = vld [vmem:[#allocation8 + $0x4] sm:$0xf] }
 0x2a6   :  { %8288 = vmatmul.msk.bf16.vlgmr.msra.gmra.mxu1 %vm9745_vm2, %v9420_v29  ;;  %8290 = vmatmul.msk.bf16.vlgmr.msra.gmra.mxu2 %vm9880_vm8, %v9420_v29  ;;  %v8036_v4 = vor.u32 %v8985_v23, %v8033_v21 }
 0x2a7   :  { %5348 = vmatpush.bf16.msrb.mxu1 %v8156_v22  ;;  %5362 = vmatpush.bf16.msrb.mxu2 %v8220_v18  ;;  %v9001_v22 = vld [vmem:[#allocation8 + $0x84] sm:$0xf]  ;;  %v8097_v18 = vld [vmem:[#allocation8 + $0x88] sm:$0xf0] }
 0x2a8   :  { %v8100_v24 = vor.u32 %v9001_v22, %v8097_v18  ;;  %v9045_v18 = vld [vmem:[#allocation8 + $0x1e4] sm:$0xf] }
 0x2a9   :  { %5335 = vmatpush.bf16.msrb.mxu0 %v8084_v15  ;;  %v4619_v15 = vpop.f32.mrf.mxu2  ;;  %v4647_v17 = vpop.f32.mrf.mxu0 }
 0x2aa   :  { %v4620_v6 = vadd.f32 %v4619_v15, %v967_v38 }
 0x2ab   :  { %5349 = vmatpush.bf16.msrb.mxu1 %v8148_v43  ;;  %5363 = vmatpush.bf16.msrb.mxu2 %v8212_v11  ;;  %v8279_v43 = vld [vmem:[#allocation8 + $0x1f0] sm:$0xf]  ;;  %v9048_v11 = vld [vmem:[#allocation8 + $0x1f4] sm:$0xf0] }
 0x2ac   :  { %v8280_v14 = vor.u32 %v9048_v11, %v8279_v43  ;;  %v4634_v41 = vadd.f32 %v4633_v63, %v4620_v6  ;;  %v9043_v43 = vld [vmem:[#allocation8 + $0x1d4] sm:$0xf]  ;;  %v8265_v11 = vld [vmem:[#allocation8 + $0x1d8] sm:$0xf0] }
 0x2ad   :  { %5336 = vmatpush.bf16.msrb.mxu0 %v8076_v55  ;;  %v8233_v6 = vld [vmem:[#allocation8 + $0x198] sm:$0xf0] }
 0x2ae   :  { %5320 = vmatpush.bf16.msra.mxu3 %v8280_v14  ;;  %v4648_v45 = vadd.f32 %v4647_v17, %v4634_v41  ;;  %v8268_v14 = vor.u32 %v9043_v43, %v8265_v11  ;;  %v9033_v41 = vld [vmem:[#allocation8 + $0x184] sm:$0xf] }
 0x2af   :  { %5350 = vmatpush.bf16.msrb.mxu1 %v8140_v51  ;;  %5364 = vmatpush.bf16.msrb.mxu2 %v8204_v60  ;;  %v4687_v51 = vpop.f32.mrf.mxu3  ;;  %v9044_v60 = vld [vmem:[#allocation8 + $0x1d4] sm:$0xf0]  ;;  %v9049_v43 = vld [vmem:[#allocation11] sm:$0xff] }
 0x2b0   :  { %v8264_v49 = vor.u32 %v9044_v60, %v8263_v46  ;;  %v9039_v60 = vld [vmem:[#allocation8 + $0x1b4] sm:$0xf]  ;;  %v9061_v11 = vld [vmem:[#allocation11 + $0x60] sm:$0xff] }
 0x2b1   :  { %5337 = vmatpush.bf16.msrb.mxu0 %v8068_v19  ;;  %v4673_v55 = vpop.f32.mrf.mxu2  ;;  %v9040_v19 = vld [vmem:[#allocation8 + $0x1b4] sm:$0xf0] }
 0x2b2   :  { %5321 = vmatpush.bf16.msra.mxu3 %v8272_v30  ;;  %v8248_v52 = vor.u32 %v9040_v19, %v8247_v33  ;;  %v8257_v30 = vld [vmem:[#allocation8 + $0x1c8] sm:$0xf0]  ;;  %v9037_v33 = vld [vmem:[#allocation8 + $0x1a4] sm:$0xf] }
 0x2b3   :  { %5351 = vmatpush.bf16.msrb.mxu1 %v8132_v1  ;;  %5365 = vmatpush.bf16.msrb.mxu2 %v8196_v57  ;;  %v4661_v1 = vpop.f32.mrf.mxu1  ;;  %v4618_v57 = vadd.f32 %v4617_v48, %v967_v38  ;;  %v8260_v46 = vor.u32 %v9041_v47, %v8257_v30  ;;  %v8241_v19 = vld [vmem:[#allocation8 + $0x1a8] sm:$0xf0]  ;;  %v4952_v30 = vld [vmem:[#allocation10] sm:$0x3] }
 0x2b4   :  { %v9058_v47 = vld [vmem:[#allocation11 + $0x48] sm:$0xff] }
 0x2b5   :  { %5338 = vmatpush.bf16.msrb.mxu0 %v8060_v9  ;;  %v4632_v61 = vadd.f32 %v4631_v26, %v4618_v57 }
 0x2b6   :  { %5322 = vmatpush.bf16.msra.mxu3 %v8264_v49  ;;  %v8249_v49 = vld [vmem:[#allocation8 + $0x1b8] sm:$0xf0] }
 0x2b7   :  { %5352 = vmatpush.bf16.msrb.mxu1 %v8124_v40  ;;  %5366 = vmatpush.bf16.msrb.mxu2 %v8188_v0  ;;  %v4689_v7 = vpop.f32.mrf.mxu3  ;;  %v8240_v40 = vor.u32 %v9038_v53, %v8239_v56  ;;  %v4646_v8 = vadd.f32 %v4645_v27, %v4632_v61  ;;  %v8252_v36 = vor.u32 %v9039_v60, %v8249_v49  ;;  %v9057_v49 = vld [vmem:[#allocation11 + $0x40] sm:$0xff] }
 0x2b9   :  { %5339 = vmatpush.bf16.msrb.mxu0 %v8052_v42  ;;  %v4675_v31 = vpop.f32.mrf.mxu2  ;;  %v4660_v42 = vadd.f32 %v4659_v54, %v4646_v8 }
 0x2ba   :  { %5323 = vmatpush.bf16.msra.mxu3 %v8256_v58 }
 0x2bb   :  { %5353 = vmatpush.bf16.msrb.mxu1 %v8116_v12  ;;  %5367 = vmatpush.bf16.msrb.mxu2 %v8180_v25  ;;  %v8232_v25 = vor.u32 %v9036_v34, %v8231_v20  ;;  %v4674_v37 = vadd.f32 %v4673_v55, %v4660_v42 }
 0x2bd   :  { %5340 = vmatpush.bf16.msrb.mxu0 %v8044_v5  ;;  %v4662_v5 = vadd.f32 %v4661_v1, %v4648_v45  ;;  %v4688_v21 = vadd.f32 %v4687_v51, %v4674_v37 }
 0x2be   :  { %5324 = vmatpush.bf16.msra.mxu3 %v8248_v52  ;;  %v8244_v52 = vor.u32 %v9037_v33, %v8241_v19 }
 0x2bf   :  { %5354 = vmatpush.bf16.msrb.mxu1 %v8108_v13  ;;  %5368 = vmatpush.bf16.msrb.mxu2 %v8172_v16  ;;  %v9047_v13 = vld [vmem:[#allocation8 + $0x1f4] sm:$0xf]  ;;  %v8281_v16 = vld [vmem:[#allocation8 + $0x1f8] sm:$0xf0]  ;;  %v4676_v22 = vadd.f32 %v4675_v31, %v4662_v5 }
 0x2c0   :  { %v8284_v23 = vor.u32 %v9047_v13, %v8281_v16 }
 0x2c1   :  { %5341 = vmatpush.bf16.msrb.mxu0 %v8036_v4  ;;  %v4701_v9 = vpop.f32.mrf.mxu0  ;;  %v8276_v4 = vor.u32 %v9045_v18, %v8273_v10  ;;  %v4690_v26 = vadd.f32 %v4689_v7, %v4676_v22  ;;  %v9056_v10 = vld [vmem:[#allocation11 + $0x38] sm:$0xff] }
 0x2c2   :  { %5325 = vmatpush.bf16.msra.mxu3 %v8240_v40  ;;  %v9035_v40 = vld [vmem:[#allocation8 + $0x194] sm:$0xf] }
 0x2c3   :  { %5355 = vmatpush.bf16.msrb.mxu1 %v8100_v24  ;;  %5369 = vmatpush.bf16.msrb.mxu2 %v8164_v3  ;;  %v4715_v0 = vpop.f32.mrf.mxu1  ;;  %v4702_v24 = vadd.f32 %v4701_v9, %v4688_v21  ;;  %v8236_v8 = vor.u32 %v9035_v40, %v8233_v6  ;;  %v4955_v40 = vperm.slane %v4952_v30, 1 }
 0x2c4   :  { %8294 = vmatmul.msk.bf16.vlgmr.msrb.gmra.mxu0 %vm9875_vm6, %v9420_v29 }
 0x2c5   :  { %v4716_v63 = vadd.f32 %v4715_v0, %v4702_v24  ;;  %5536 = vmatpush.bf16.msra.mxu0 %v9056_v10  ;;  %v9054_v24 = vld [vmem:[#allocation11 + $0x28] sm:$0xff] }
 0x2c6   :  { %8296 = vmatmul.msk.bf16.vlgmr.msrb.gmra.mxu1 %vm9745_vm2, %v9420_v29  ;;  %8298 = vmatmul.msk.bf16.vlgmr.msrb.gmra.mxu2 %vm9880_vm8, %v9420_v29 }
 0x2c7   :  { %5326 = vmatpush.bf16.msra.mxu3 %v8232_v25 }
 0x2c9   :  { %v4729_v2 = vpop.f32.mrf.mxu2  ;;  %v4703_v28 = vpop.f32.mrf.mxu0 }
 0x2ca   :  { %v4704_v27 = vadd.f32 %v4703_v28, %v4690_v26  ;;  %v4730_v54 = vadd.f32 %v4729_v2, %v4716_v63  ;;  %v8225_v2 = vld [vmem:[#allocation8 + $0x188] sm:$0xf0]  ;;  %v9051_v26 = vld [vmem:[#allocation11 + $0x10] sm:$0xff] }
 0x2cb   :  { %v4717_v50 = vpop.f32.mrf.mxu1  ;;  %5327 = vmatpush.bf16.msra.mxu3 %v8224_v62  ;;  %v8228_v42 = vor.u32 %v9033_v41, %v8225_v2  ;;  %v9050_v63 = vld [vmem:[#allocation11 + $0x8] sm:$0xff] }
 0x2cc   :  { %v4743_v12 = vpop.f32.mrf.mxu3  ;;  %v4718_v55 = vadd.f32 %v4717_v50, %v4704_v27  ;;  %v9062_v27 = vld [vmem:[#allocation11 + $0x68] sm:$0xff] }
 0x2cd   :  { %v4744_v38 = vadd.f32 %v4743_v12, %v4730_v54 }
 0x2cf   :  { %5376 = vmatpush.bf16.msrb.mxu3 %v8284_v23 }
 0x2d1   :  { %v4731_v59 = vpop.f32.mrf.mxu2 }
 0x2d2   :  { %v4732_v17 = vadd.f32 %v4731_v59, %v4718_v55  ;;  %v9064_v59 = vld [vmem:[#allocation11 + $0x78] sm:$0xff] }
 0x2d3   :  { %5377 = vmatpush.bf16.msrb.mxu3 %v8276_v4  ;;  %v9055_v4 = vld [vmem:[#allocation11 + $0x30] sm:$0xff]  ;;  %5550 = vmatpush.bf16.msra.mxu1 %v9064_v59 }
 0x2d4   :  { %v4745_v3 = vpop.f32.mrf.mxu3  ;;  %5537 = vmatpush.bf16.msra.mxu0 %v9055_v4  ;;  %v9421_v4 = vmov 0.0  }
 0x2d5   :  { %v4746_v57 = vadd.f32 %v4745_v3, %v4732_v17  ;;  %v9053_v3 = vld [vmem:[#allocation11 + $0x20] sm:$0xff] }
 0x2d7   :  { %5378 = vmatpush.bf16.msrb.mxu3 %v8268_v14  ;;  %v9060_v14 = vld [vmem:[#allocation11 + $0x58] sm:$0xff] }
 0x2d8   :  { %5538 = vmatpush.bf16.msra.mxu0 %v9054_v24 }
 0x2db   :  { %5379 = vmatpush.bf16.msrb.mxu3 %v8260_v46  ;;  %v4954_v46 = vperm.slane %v4952_v30, 0 }
 0x2dc   :  { %5539 = vmatpush.bf16.msra.mxu0 %v9053_v3 }
 0x2df   :  { %5380 = vmatpush.bf16.msrb.mxu3 %v8252_v36 }
 0x2e1   :  { %v4757_v48 = vpop.f32.mrf.mxu0 }
 0x2e2   :  { %v4758_v58 = vadd.f32 %v4757_v48, %v4744_v38  ;;  %v9052_v48 = vld [vmem:[#allocation11 + $0x18] sm:$0xff] }
 0x2e3   :  { %v4771_v15 = vpop.f32.mrf.mxu1  ;;  %5381 = vmatpush.bf16.msrb.mxu3 %v8244_v52  ;;  %5540 = vmatpush.bf16.msra.mxu0 %v9052_v48  ;;  %v9072_v38 = vld [vmem:[#allocation14 + $0x38] sm:$0xff] }
 0x2e4   :  { %v4772_v56 = vadd.f32 %v4771_v15, %v4758_v58  ;;  %v9063_v15 = vld [vmem:[#allocation11 + $0x70] sm:$0xff]  ;;  %5639 = vmatpush.bf16.msra.mxu2 %v9072_v38 }
 0x2e5   :  { %5551 = vmatpush.bf16.msra.mxu1 %v9063_v15 }
 0x2e7   :  { %5382 = vmatpush.bf16.msrb.mxu3 %v8236_v8  ;;  %5541 = vmatpush.bf16.msra.mxu0 %v9051_v26 }
 0x2e9   :  { %v4785_v44 = vpop.f32.mrf.mxu2  ;;  %v4759_v35 = vpop.f32.mrf.mxu0  ;;  %5552 = vmatpush.bf16.msra.mxu1 %v9062_v27 }
 0x2ea   :  { %v4760_v53 = vadd.f32 %v4759_v35, %v4746_v57  ;;  %v4786_v61 = vadd.f32 %v4785_v44, %v4772_v56  ;;  %v9059_v44 = vld [vmem:[#allocation11 + $0x50] sm:$0xff] }
 0x2eb   :  { %v4773_v1 = vpop.f32.mrf.mxu1  ;;  %5383 = vmatpush.bf16.msrb.mxu3 %v8228_v42  ;;  %5542 = vmatpush.bf16.msra.mxu0 %v9050_v63  ;;  %v9098_v63 = vld [vmem:[#allocation16] ss:$0 sm:$0xff] }
 0x2ec   :  { %v4799_v51 = vpop.f32.mrf.mxu3  ;;  %v4774_v0 = vadd.f32 %v4773_v1, %v4760_v53 }
 0x2ed   :  { %v4800_v34 = vadd.f32 %v4799_v51, %v4786_v61  ;;  %5553 = vmatpush.bf16.msra.mxu1 %v9061_v11 }
 0x2ef   :  { %5543 = vmatpush.bf16.msra.mxu0 %v9049_v43 }
 0x2f1   :  { %v4787_v31 = vpop.f32.mrf.mxu2  ;;  %5554 = vmatpush.bf16.msra.mxu1 %v9060_v14 }
 0x2f2   :  { %v4788_v39 = vadd.f32 %v4787_v31, %v4774_v0 }
 0x2f4   :  { %v4801_v7 = vpop.f32.mrf.mxu3 }
 0x2f5   :  { %v4802_v32 = vadd.f32 %v4801_v7, %v4788_v39  ;;  %5555 = vmatpush.bf16.msra.mxu1 %v9059_v44 }
 0x2f9   :  { %5556 = vmatpush.bf16.msra.mxu1 %v9058_v47 }
 0x2fd   :  { %5557 = vmatpush.bf16.msra.mxu1 %v9057_v49 }
 0x301   :  { %v4813_v9 = vpop.f32.mrf.mxu0 }
 0x302   :  { %v4814_v12 = vadd.f32 %v4813_v9, %v4800_v34 }
 0x303   :  { %v4827_v20 = vpop.f32.mrf.mxu1 }
 0x304   :  { %v4828_v62 = vadd.f32 %v4827_v20, %v4814_v12 }
 0x309   :  { %v4841_v25 = vpop.f32.mrf.mxu2  ;;  %v4815_v28 = vpop.f32.mrf.mxu0 }
 0x30a   :  { %v4816_v37 = vadd.f32 %v4815_v28, %v4802_v32  ;;  %v4842_v50 = vadd.f32 %v4841_v25, %v4828_v62  ;;  %v9071_v28 = vld [vmem:[#allocation14 + $0x30] sm:$0xff]  ;;  %v9070_v62 = vld [vmem:[#allocation14 + $0x28] sm:$0xff] }
 0x30b   :  { %v4855_v45 = vpop.f32.mrf.mxu3  ;;  %v4829_v5 = vpop.f32.mrf.mxu1  ;;  %5640 = vmatpush.bf16.msra.mxu2 %v9071_v28 }
 0x30c   :  { %v4830_v13 = vadd.f32 %v4829_v5, %v4816_v37  ;;  %v4856_v23 = vadd.f32 %v4855_v45, %v4842_v50  ;;  %v9069_v37 = vld [vmem:[#allocation14 + $0x20] sm:$0xff]  ;;  %v9068_v50 = vld [vmem:[#allocation14 + $0x18] sm:$0xff]  ;;  %v9067_v5 = vld [vmem:[#allocation14 + $0x10] sm:$0xff] }
 0x30e   :  { %vm4863_vm9 = vcmp.gt.f32.partialorder %v4856_v23, 1.0 }
 0x30f   :  { %5641 = vmatpush.bf16.msra.mxu2 %v9070_v62 }
 0x311   :  { %v4843_v16 = vpop.f32.mrf.mxu2 }
 0x312   :  { %v4844_v21 = vadd.f32 %v4843_v16, %v4830_v13  ;;  %v9066_v13 = vld [vmem:[#allocation14 + $0x8] sm:$0xff]  ;;  %v9065_v16 = vld [vmem:[#allocation14] sm:$0xff] }
 0x313   :  { %v4857_v22 = vpop.f32.mrf.mxu3  ;;  %5642 = vmatpush.bf16.msra.mxu2 %v9069_v37 }
 0x314   :  { %v4858_v18 = vadd.f32 %v4857_v22, %v4844_v21  ;;  %v9097_v21 = vld [vmem:[#allocation13] ss:$0 sm:$0xff] }
 0x316   :  { %vm4867_vm10 = vcmp.gt.f32.partialorder %v4858_v18, 1.0 }
 0x317   :  { %vm8291_vm11 = vmpackc.low %vm4867_vm10, %vm4863_vm9  ;;  %5643 = vmatpush.bf16.msra.mxu2 %v9068_v50 }
 0x318   :  { %8292 = vmatmul.msk.bf16.vlgmr.msra.gmra.mxu3 %vm8291_vm11, %v9420_v29 }
 0x31b   :  { %5644 = vmatpush.bf16.msra.mxu2 %v9067_v5 }
 0x31f   :  { %5645 = vmatpush.bf16.msra.mxu2 %v9066_v13 }
 0x321   :  { %v5287_v54 = vpop.f32.mrf.mxu0 }
 0x322   :  { %v5288_v17 = vadd.f32 %v5287_v54, %v4954_v46 }
 0x323   :  { %v5301_v55 = vpop.f32.mrf.mxu1  ;;  %5646 = vmatpush.bf16.msra.mxu2 %v9065_v16 }
 0x324   :  { %v5302_v19 = vadd.f32 %v5301_v55, %v5288_v17 }
 0x328   :  { %8300 = vmatmul.msk.bf16.vlgmr.msrb.gmra.mxu3 %vm8291_vm11, %v9420_v29 }
 0x329   :  { %v5315_v51 = vpop.f32.mrf.mxu2  ;;  %v5289_v60 = vpop.f32.mrf.mxu0 }
 0x32a   :  { %v5290_v36 = vadd.f32 %v5289_v60, %v4954_v46  ;;  %v5316_v57 = vadd.f32 %v5315_v51, %v5302_v19 }
 0x32b   :  { %v5303_v58 = vpop.f32.mrf.mxu1 }
 0x32c   :  { %v5304_v52 = vadd.f32 %v5303_v58, %v5290_v36 }
 0x331   :  { %v5317_v33 = vpop.f32.mrf.mxu2 }
 0x332   :  { %v5318_v56 = vadd.f32 %v5317_v33, %v5304_v52 }
 0x341   :  { %v5343_v1 = vpop.f32.mrf.mxu0 }
 0x342   :  { %v5344_v0 = vadd.f32 %v5343_v1, %v4955_v40 }
 0x343   :  { %v5357_v7 = vpop.f32.mrf.mxu1 }
 0x344   :  { %v5358_v2 = vadd.f32 %v5357_v7, %v5344_v0 }
 0x349   :  { %v5371_v9 = vpop.f32.mrf.mxu2  ;;  %v5345_v6 = vpop.f32.mrf.mxu0 }
 0x34a   :  { %v5346_v41 = vadd.f32 %v5345_v6, %v4955_v40  ;;  %v5372_v39 = vadd.f32 %v5371_v9, %v5358_v2 }
 0x34b   :  { %v5359_v20 = vpop.f32.mrf.mxu1 }
 0x34c   :  { %v5360_v42 = vadd.f32 %v5359_v20, %v5346_v41 }
 0x351   :  { %v5373_v34 = vpop.f32.mrf.mxu2 }
 0x352   :  { %v5374_v12 = vadd.f32 %v5373_v34, %v5360_v42 }
 0x39b   :  { %v5329_v35 = vpop.f32.mrf.mxu3 }
 0x39c   :  { %v5330_v53 = vadd.f32 %v5329_v35, %v5316_v57 }
 0x39e   :  { %vm5390_vm12 = vcmp.gt.f32.partialorder %v5330_v53, 1.0 }
 0x3a3   :  { %v5331_v31 = vpop.f32.mrf.mxu3 }
 0x3a4   :  { %v5332_v61 = vadd.f32 %v5331_v31, %v5318_v56 }
 0x3a6   :  { %vm5392_vm13 = vcmp.gt.f32.partialorder %v5332_v61, 1.0 }
 0x3a7   :  { %vm8369_vm14 = vmpackc.low %vm5392_vm13, %vm5390_vm12 }
 0x3a8   :  { %8370 = vmatmul.msk.bf16.vlgmr.msra.gmra.mxu0 %vm8369_vm14, %v9420_v29 }
 0x3ab   :  { %v5385_v8 = vpop.f32.mrf.mxu3 }
 0x3ac   :  { %v5386_v25 = vadd.f32 %v5385_v8, %v5372_v39 }
 0x3ae   :  { %vm5391_vm15 = vcmp.gt.f32.partialorder %v5386_v25, 1.0 }
 0x3b3   :  { %v5387_v32 = vpop.f32.mrf.mxu3 }
 0x3b4   :  { %v5388_v45 = vadd.f32 %v5387_v32, %v5374_v12 }
 0x3b6   :  { %vm5393_vm0 = vcmp.gt.f32.partialorder %v5388_v45, 1.0 }
 0x3b7   :  { %vm8371_vm1 = vmpackc.low %vm5393_vm0, %vm5391_vm15 }
 0x3b8   :  { %8372 = vmatmul.msk.bf16.vlgmr.msra.gmra.mxu1 %vm8371_vm1, %v9420_v29 }
 0x425   :  { %v5545_v23 = vpop.f32.mrf.mxu0 }
 0x426   :  { %v5546_v22 = vadd.f32 %v9097_v21, %v5545_v23 }
 0x42d   :  { %v5547_v59 = vpop.f32.mrf.mxu0 }
 0x42e   :  { %v5548_v3 = vadd.f32 %v9097_v21, %v5547_v59 }
 0x435   :  { %v5559_v18 = vpop.f32.mrf.mxu1 }
 0x436   :  { %v5560_v10 = vadd.f32 %v5559_v18, %v5546_v22 }
 0x438   :  { %vm5564_vm2 = vcmp.gt.f32.partialorder %v5560_v10, 1.0  ;;  %5657 = vst [vmem:[#allocation20] sm:$0xff] %v5560_v10 }
 0x439   :  { %v8373_v24 = vsel %vm5564_vm2, 1.0, %v9421_v4 }
 0x43a   :  { %5655 = vst [vmem:[#allocation18] sm:$0xff] %v8373_v24 }
 0x43d   :  { %v5561_v48 = vpop.f32.mrf.mxu1 }
 0x43e   :  { %v5562_v26 = vadd.f32 %v5561_v48, %v5548_v3 }
 0x440   :  { %vm5565_vm3 = vcmp.gt.f32.partialorder %v5562_v26, 1.0  ;;  %5658 = vst [vmem:[#allocation20 + $0x8] sm:$0xff] %v5562_v26 }
 0x441   :  { %v8374_v15 = vsel %vm5565_vm3, 1.0, %v9421_v4  ;;  %vm8407_vm4 = vmpackc.low %vm5565_vm3, %vm5564_vm2 }
 0x442   :  { %5656 = vst [vmem:[#allocation18 + $0x8] sm:$0xff] %v8374_v15  ;;  %8408 = vmatmul.msk.bf16.vlgmr.msra.gmra.mxu2 %vm8407_vm4, %v9420_v29 }
 0x4c5   :  { %v5648_v27 = vpop.f32.mrf.mxu2 }
 0x4c6   :  { %v5649_v43 = vadd.f32 %v9098_v63, %v5648_v27 }
 0x4c8   :  { %5653 = vst [vmem:[#allocation17] sm:$0xff] %v5649_v43 }
 0x4cd   :  { %v5650_v11 = vpop.f32.mrf.mxu2 }
 0x4ce   :  { %v5651_v14 = vadd.f32 %v9098_v63, %v5650_v11 }
 0x4d0   :  { %5654 = vst [vmem:[#allocation17 + $0x8] sm:$0xff] %v5651_v14 }
 0x4d1   :  { %5662 = vsyncadd [#allocation4], 224  ;;  %s5665_s23 = sshll.u32 %s9926_s9, 4  ;;  %s9422_s24 = smov [#allocation17]   ;;  %s5666_s23 = int_to_ptr.hbm [resolvable:$true] %s5665_s23 }
 0x4d2   :  { %s5663_s5 = sshll.u32 %s9422_s24, 4  ;;  %s9423_s25 = smov 32   ;;  %s5664_s5 = int_to_ptr.vmem [resolvable:$true] %s5663_s5 }
 0x4d3   :  { %s9424_s26 = smov 2  }
 0x4d4   :  { %5671 = dma.vmem_to_hbm [thread:$0]  %s5664_s5, 32, %s5666_s23, [#allocation4], %s9423_s25, %s9423_s25, %s9424_s26  }
 0x4d5   :  { %5675 = vsyncadd [#allocation19], 224  ;;  %s5678_s28 = sshll.u32 %s9927_s10, 4  ;;  %s9425_s29 = smov [#allocation18]   ;;  %s5679_s28 = int_to_ptr.hbm [resolvable:$true] %s5678_s28 }
 0x4d6   :  { %s5676_s30 = sshll.u32 %s9425_s29, 4  ;;  %s5677_s30 = int_to_ptr.vmem [resolvable:$true] %s5676_s30 }
 0x4d7   :  { %5684 = dma.vmem_to_hbm [thread:$0]  %s5677_s30, 32, %s5679_s28, [#allocation19], %s9423_s25, %s9423_s25, %s9424_s26  }
 0x4d8   :  { %5688 = vsyncadd [#allocation19], 224  ;;  %s5691_s12 = sshll.u32 %s9928_s11, 4  ;;  %s9426_s13 = smov [#allocation20]   ;;  %s5692_s12 = int_to_ptr.hbm [resolvable:$true] %s5691_s12 }
 0x4d9   :  { %s5689_s0 = sshll.u32 %s9426_s13, 4  ;;  %s5690_s0 = int_to_ptr.vmem [resolvable:$true] %s5689_s0 }
 0x4da   :  { %5697 = dma.vmem_to_hbm [thread:$0]  %s5690_s0, 32, %s5692_s12, [#allocation19], %s9423_s25, %s9423_s25, %s9424_s26  }
 0x4db   :  { %9399 = dma.done.wait [#allocation4], 256  }
 0x4dc   :  { %9400 = vsyncadd [#allocation4], 4294967040 }
 0x4dd   :  { %9401 = dma.done.wait [#allocation19], 512  }
 0x4de   :  { %9402 = vsyncadd [#allocation19], 4294966784 }
 0x4df   :  { %5710 = vsyncpa [#allocation3], 1 }
 0x4e0   :  { %5711 = vsyncpa [#allocation6], 1 }
 0x4e1   :  { %5712 = vsyncpa [#allocation9], 1 }
 0x4e2   :  { %5713 = vsyncpa [#allocation12], 1 }
 0x4e3   :  { %5714 = vsyncpa [#allocation15], 1 }
 0x4e4   :  { %5715 = vsyncpa [#allocation4], 1 }
 0x4e5   :  { %5716 = vsyncpa [#allocation19], 1 }

</bundles_post_ra>
